<compile_context>
chip_gen: v7x
topology: tpu7x:2x2x1
jax: 0.10.0
libtpu: 0.0.40
codegen_flags: <defaults>
</compile_context>

<pallas_src>
import functools

import jax
import jax.numpy as jnp
from jax.experimental import pallas as pl
from jax.experimental.pallas import tpu as pltpu


_BN_EPS = 1e-5
_MIN_PALLAS_M = 256     # below this, pallas_call launch overhead dominates
_MAX_TM = 4096          # lane-tile cap (keeps <= a few MiB VMEM at K <= 128)


def _cdiv(a, b):
    return (a + b - 1) // b


def _round_up(x, m):
    return _cdiv(x, m) * m


# ----------------------------------------------------------------------------
# Pallas kernels: fused ((Cout,K) @ (K,TM) matmul + per-channel shift
#                        [+ residual] [+ Swish]); lane axis = TM (dense).
# ----------------------------------------------------------------------------
def _conv_mm_kernel(w_ref, shift_ref, x_ref, out_ref, *, act):
    y = jnp.dot(w_ref[...], x_ref[...], preferred_element_type=jnp.float32)
    y = y + shift_ref[...]                 # (Cout, 1) broadcast over lanes
    if act:
        y = y * jax.nn.sigmoid(y)          # Swish
    out_ref[...] = y.astype(out_ref.dtype)


def _conv_mm_res_kernel(w_ref, shift_ref, x_ref, res_ref, out_ref, *, act):
    y = jnp.dot(w_ref[...], x_ref[...], preferred_element_type=jnp.float32)
    y = y + shift_ref[...]
    y = y + res_ref[...]                   # residual add (ResBlock skip)
    if act:
        y = y * jax.nn.sigmoid(y)          # Swish
    out_ref[...] = y.astype(out_ref.dtype)


def _fused_matmul(w2, shift, patches_t, residual=None, act=True):
    """w2: (Cout, K) bf16 (BN scale folded), shift: (Cout,) f32,
       patches_t: (K, M) bf16, residual: (Cout, M) f32 or None -> (Cout, M) f32."""
    Cout, K = w2.shape
    M = patches_t.shape[1]

    # TM <= _MAX_TM, multiple of 128, and >= 2 grid steps whenever M >= 256
    # (keeps both v7x TensorCores busy; big tiles amortize per-step overhead).
    TM = min(_MAX_TM, _round_up(max(_cdiv(M, 2), 128), 128))
    Mp = _round_up(M, TM)
    if Mp != M:
        patches_t = jnp.pad(patches_t, ((0, 0), (0, Mp - M)))
        if residual is not None:
            residual = jnp.pad(residual, ((0, 0), (0, Mp - M)))

    shift2 = shift.reshape(Cout, 1).astype(jnp.float32)

    in_specs = [
        pl.BlockSpec((Cout, K), lambda i: (0, 0)),    # folded weights: resident
        pl.BlockSpec((Cout, 1), lambda i: (0, 0)),    # per-channel shift: resident
        pl.BlockSpec((K, TM), lambda i: (0, i)),      # patches^T tile (lane-dense)
    ]
    args = [w2, shift2, patches_t]
    if residual is None:
        kernel = functools.partial(_conv_mm_kernel, act=act)
    else:
        kernel = functools.partial(_conv_mm_res_kernel, act=act)
        in_specs.append(pl.BlockSpec((Cout, TM), lambda i: (0, i)))  # lane-dense
        args.append(residual)

    out = pl.pallas_call(
        kernel,
        out_shape=jax.ShapeDtypeStruct((Cout, Mp), jnp.float32),
        grid_spec=pltpu.PrefetchScalarGridSpec(
            num_scalar_prefetch=0,
            grid=(Mp // TM,),
            in_specs=in_specs,
            out_specs=pl.BlockSpec((Cout, TM), lambda i: (0, i)),
        ),
        compiler_params=pltpu.CompilerParams(dimension_semantics=("parallel",)),
    )(*args)
    return out[:, :M] if Mp != M else out


# ----------------------------------------------------------------------------
# Plain-JAX glue: transpose-free patch extraction in CNHW layout
# ----------------------------------------------------------------------------
def _im2col_t(x, kh, kw, stride, pad, dtype):
    """x: (C, N, H, W) -> patches^T (C*kh*kw, N*Ho*Wo).
       K ordered (Cin, kh, kw); M ordered (N, Ho, Wo). No transposes."""
    C, N, H, W = x.shape
    xp = jnp.pad(x, ((0, 0), (0, 0), (pad, pad), (pad, pad)))
    Ho = (H + 2 * pad - kh) // stride + 1
    Wo = (W + 2 * pad - kw) // stride + 1
    taps = []
    for i in range(kh):
        for j in range(kw):
            taps.append(xp[:, :, i:i + stride * Ho:stride, j:j + stride * Wo:stride])
    pt = jnp.stack(taps, axis=1).reshape(C * kh * kw, N * Ho * Wo)
    return pt.astype(dtype), Ho, Wo


def _conv_layer(x, p, stride, pad, act=True, use_bn=True, residual=None):
    """Conv2d(+BN)(+residual)(+Swish). x / residual / output all in (C, N, H, W)."""
    w = p["w"]                                       # (Cout, Cin, kh, kw) PyTorch layout
    Cout, Cin, kh, kw = w.shape
    N = x.shape[1]

    if use_bn:
        scale = p["gamma"] / jnp.sqrt(p["var"] + _BN_EPS)
        shift = p["beta"] + scale * (p["b"] - p["mean"])
    else:
        scale = jnp.ones((Cout,), jnp.float32)
        shift = p["b"]
    w2 = w.reshape(Cout, Cin * kh * kw) * scale[:, None]   # fold BN scale into weights

    Ho = (x.shape[2] + 2 * pad - kh) // stride + 1
    Wo = (x.shape[3] + 2 * pad - kw) // stride + 1
    M = N * Ho * Wo

    if M >= _MIN_PALLAS_M:
        patches_t, Ho, Wo = _im2col_t(x, kh, kw, stride, pad, jnp.bfloat16)
        res_flat = (residual.reshape(Cout, M).astype(jnp.float32)
                    if residual is not None else None)
        out = _fused_matmul(w2.astype(jnp.bfloat16), shift, patches_t, res_flat, act)
    else:
        # Tail layers: launch overhead >> compute; let XLA do it.
        patches_t, Ho, Wo = _im2col_t(x, kh, kw, stride, pad, jnp.float32)
        y = jnp.dot(w2, patches_t, precision=jax.lax.Precision.HIGHEST) + shift[:, None]
        if residual is not None:
            y = y + residual.reshape(Cout, M)
        if act:
            y = y * jax.nn.sigmoid(y)
        out = y
    return out.reshape(Cout, N, Ho, Wo)


def _downsample(x, p):
    return _conv_layer(x, p, stride=2, pad=1, act=True, use_bn=True)


def _resblock(x, p1, p2):
    h = _conv_layer(x, p1, stride=1, pad=1, act=True, use_bn=True)
    # out = Swish(x + BN(conv(h))) -- residual + activation fused in kernel
    return _conv_layer(h, p2, stride=1, pad=1, act=True, use_bn=True, residual=x)


def encoder_forward(x, params):
    # x arrives in PyTorch NCHW; internally we use channel-major CNHW.
    h = jnp.transpose(x, (1, 0, 2, 3))
    xs = []
    for blk in params["blocks"]:
        h = _downsample(h, blk["down1"])
        h = _resblock(h, blk["res1"], blk["res2"])
        h = _downsample(h, blk["down2"])
        xs.append(h)
    c = _conv_layer(h, params["cond1"], stride=1, pad=0, act=True, use_bn=True)
    c = _conv_layer(c, params["cond2"], stride=1, pad=0, act=False, use_bn=False)
    mu, log_var = jnp.split(c, 2, axis=0)              # == .chunk(2, dim=1)
    to_nchw = lambda t: jnp.transpose(t, (1, 0, 2, 3))  # boundary-only layout fix
    xs = [to_nchw(t) for t in xs][::-1]
    return to_nchw(mu), to_nchw(log_var), xs


# ----------------------------------------------------------------------------
# Deterministic parameter initialization (matches weights_init conventions)
# ----------------------------------------------------------------------------
def _init_conv_bn(key, cin, cout, k, use_bn=True):
    kw_, kb_ = jax.random.split(key)
    p = {
        "w": 0.02 * jax.random.normal(kw_, (cout, cin, k, k), jnp.float32),
        "b": jnp.zeros((cout,), jnp.float32),
    }
    if use_bn:
        p.update({
            "gamma": 1.0 + 0.02 * jax.random.normal(kb_, (cout,), jnp.float32),
            "beta": jnp.zeros((cout,), jnp.float32),
            "mean": jnp.zeros((cout,), jnp.float32),
            "var": jnp.ones((cout,), jnp.float32),
        })
    return p


def init_encoder_params(key, input_dim, dim, z_dim):
    keys = jax.random.split(key, 16)
    ki = iter(keys)
    block_dims = [
        (input_dim, dim // 8, dim // 4),   # block 0
        (dim // 4, dim // 4, dim // 2),    # block 1
        (dim // 2, dim // 2, dim),         # block 2
    ]
    blocks = []
    for (ci, cm, co) in block_dims:
        blocks.append({
            "down1": _init_conv_bn(next(ki), ci, cm, 4),
            "res1": _init_conv_bn(next(ki), cm, cm, 3),
            "res2": _init_conv_bn(next(ki), cm, cm, 3),
            "down2": _init_conv_bn(next(ki), cm, co, 4),
        })
    return {
        "blocks": blocks,
        "cond1": _init_conv_bn(next(ki), dim, z_dim, 2),
        "cond2": _init_conv_bn(next(ki), z_dim, 2 * z_dim, 1, use_bn=False),
    }


# ----------------------------------------------------------------------------
if __name__ == "__main__":
    # 6 stride-2 downsamples followed by a valid 2x2 conv require spatial >= 128.
    batch, input_dim, dim, z_dim, spatial = 2, 3, 32, 8, 128

    key = jax.random.PRNGKey(0)
    k_x, k_p = jax.random.split(key)
    x = jax.random.normal(k_x, (batch, input_dim, spatial, spatial), jnp.float32)
    params = init_encoder_params(k_p, input_dim, dim, z_dim)

    fwd = jax.jit(lambda inp: encoder_forward(inp, params))
    mu, log_var, xs = fwd(x)
    jax.block_until_ready((mu, log_var, xs))

    assert mu.shape == (batch, z_dim, 1, 1)
    assert log_var.shape == (batch, z_dim, 1, 1)
    assert xs[0].shape == (batch, dim, 2, 2)          # xs is reversed (deepest first)
    assert xs[1].shape == (batch, dim // 2, 8, 8)
    assert xs[2].shape == (batch, dim // 4, 32, 32)
    assert jnp.all(jnp.isfinite(mu)) and jnp.all(jnp.isfinite(log_var))

    print("KERNEL_OK")
</pallas_src>

<mosaic_0001>
module attributes {stable_mosaic.version = 11 : i64} {
  func.func @_conv_mm_kernel(%arg0: i32, %arg1: memref<4x48xbf16, #tpu.memory_space<vmem>>, %arg2: memref<4x1xf32, #tpu.memory_space<vmem>>, %arg3: memref<48x4096xbf16, #tpu.memory_space<vmem>>, %arg4: memref<4x4096xf32, #tpu.memory_space<vmem>>) attributes {dimension_semantics = [#tpu.dimension_semantics<parallel>], iteration_bounds = array<i64: 2>, scalar_prefetch = 0 : i64, scratch_operands = 0 : i64, tpu.core_type = #tpu.core_type<tc>, window_params = [{pipeline_mode = #tpu.pipeline_mode<synchronous>, transform_indices = @transform_0, window_bounds = array<i64: 4, 48>}, {pipeline_mode = #tpu.pipeline_mode<synchronous>, transform_indices = @transform_1, window_bounds = array<i64: 4, 1>}, {transform_indices = @transform_2, window_bounds = array<i64: 48, 4096>}, {transform_indices = @transform_3, window_bounds = array<i64: 4, 4096>}]} {
    %c0 = arith.constant 0 : index
    %c0_0 = arith.constant 0 : index
    %0 = vector.load %arg1[%c0, %c0_0] : memref<4x48xbf16, #tpu.memory_space<vmem>>, vector<4x48xbf16>
    %c0_1 = arith.constant 0 : index
    %c0_2 = arith.constant 0 : index
    %1 = vector.load %arg3[%c0_1, %c0_2] : memref<48x4096xbf16, #tpu.memory_space<vmem>>, vector<48x4096xbf16>
    %cst = arith.constant dense<0.000000e+00> : vector<4x4096xf32>
    %2 = tpu.matmul %0, %1, %cst {dimension_numbers = #tpu.dot_dimension_numbers<[1], [0], [0], [1], [0, 0, 1, 1], [], []>} : vector<4x48xbf16>, vector<48x4096xbf16>, vector<4x4096xf32> -> vector<4x4096xf32>
    %c0_3 = arith.constant 0 : index
    %c0_4 = arith.constant 0 : index
    %3 = vector.load %arg2[%c0_3, %c0_4] : memref<4x1xf32, #tpu.memory_space<vmem>>, vector<4x1xf32>
    %4 = vector.broadcast %3 : vector<4x1xf32> to vector<4x4096xf32>
    %5 = arith.addf %2, %4 : vector<4x4096xf32>
    %6 = arith.negf %5 : vector<4x4096xf32>
    %7 = math.exp %6 : vector<4x4096xf32>
    %cst_5 = arith.constant 1.000000e+00 : f32
    %8 = vector.broadcast %cst_5 : f32 to vector<4x4096xf32>
    %9 = arith.addf %8, %7 : vector<4x4096xf32>
    %10 = arith.divf %8, %9 : vector<4x4096xf32>
    %11 = arith.mulf %5, %10 : vector<4x4096xf32>
    %c0_6 = arith.constant 0 : index
    %c0_7 = arith.constant 0 : index
    %12 = vector.load %arg4[%c0_6, %c0_7] : memref<4x4096xf32, #tpu.memory_space<vmem>>, vector<4x4096xf32>
    tpu.vector_store %arg4[%c0_6, %c0_7], %11 {strides = array<i32>} : memref<4x4096xf32, #tpu.memory_space<vmem>>, vector<4x4096xf32>,
    return
  }
  func.func @transform_0(%arg0: i32) -> (i32, i32) {
    %c0_i32 = arith.constant 0 : i32
    %c0_i32_0 = arith.constant 0 : i32
    %c0_i32_1 = arith.constant 0 : i32
    return %c0_i32, %c0_i32_0 : i32, i32
  }
  func.func @transform_1(%arg0: i32) -> (i32, i32) {
    %c0_i32 = arith.constant 0 : i32
    %c0_i32_0 = arith.constant 0 : i32
    %c0_i32_1 = arith.constant 0 : i32
    return %c0_i32, %c0_i32_0 : i32, i32
  }
  func.func @transform_2(%arg0: i32) -> (i32, i32) {
    %c0_i32 = arith.constant 0 : i32
    %c0_i32_0 = arith.constant 0 : i32
    return %c0_i32, %arg0 : i32, i32
  }
  func.func @transform_3(%arg0: i32) -> (i32, i32) {
    %c0_i32 = arith.constant 0 : i32
    %c0_i32_0 = arith.constant 0 : i32
    return %c0_i32, %arg0 : i32, i32
  }
}

module attributes {stable_mosaic.version = 11 : i64} {
  func.func @_conv_mm_kernel(%arg0: i32, %arg1: memref<4x36xbf16, #tpu.memory_space<vmem>>, %arg2: memref<4x1xf32, #tpu.memory_space<vmem>>, %arg3: memref<36x4096xbf16, #tpu.memory_space<vmem>>, %arg4: memref<4x4096xf32, #tpu.memory_space<vmem>>) attributes {dimension_semantics = [#tpu.dimension_semantics<parallel>], iteration_bounds = array<i64: 2>, scalar_prefetch = 0 : i64, scratch_operands = 0 : i64, tpu.core_type = #tpu.core_type<tc>, window_params = [{pipeline_mode = #tpu.pipeline_mode<synchronous>, transform_indices = @transform_0, window_bounds = array<i64: 4, 36>}, {pipeline_mode = #tpu.pipeline_mode<synchronous>, transform_indices = @transform_1, window_bounds = array<i64: 4, 1>}, {transform_indices = @transform_2, window_bounds = array<i64: 36, 4096>}, {transform_indices = @transform_3, window_bounds = array<i64: 4, 4096>}]} {
    %c0 = arith.constant 0 : index
    %c0_0 = arith.constant 0 : index
    %0 = vector.load %arg1[%c0, %c0_0] : memref<4x36xbf16, #tpu.memory_space<vmem>>, vector<4x36xbf16>
    %c0_1 = arith.constant 0 : index
    %c0_2 = arith.constant 0 : index
    %1 = vector.load %arg3[%c0_1, %c0_2] : memref<36x4096xbf16, #tpu.memory_space<vmem>>, vector<36x4096xbf16>
    %cst = arith.constant dense<0.000000e+00> : vector<4x4096xf32>
    %2 = tpu.matmul %0, %1, %cst {dimension_numbers = #tpu.dot_dimension_numbers<[1], [0], [0], [1], [0, 0, 1, 1], [], []>} : vector<4x36xbf16>, vector<36x4096xbf16>, vector<4x4096xf32> -> vector<4x4096xf32>
    %c0_3 = arith.constant 0 : index
    %c0_4 = arith.constant 0 : index
    %3 = vector.load %arg2[%c0_3, %c0_4] : memref<4x1xf32, #tpu.memory_space<vmem>>, vector<4x1xf32>
    %4 = vector.broadcast %3 : vector<4x1xf32> to vector<4x4096xf32>
    %5 = arith.addf %2, %4 : vector<4x4096xf32>
    %6 = arith.negf %5 : vector<4x4096xf32>
    %7 = math.exp %6 : vector<4x4096xf32>
    %cst_5 = arith.constant 1.000000e+00 : f32
    %8 = vector.broadcast %cst_5 : f32 to vector<4x4096xf32>
    %9 = arith.addf %8, %7 : vector<4x4096xf32>
    %10 = arith.divf %8, %9 : vector<4x4096xf32>
    %11 = arith.mulf %5, %10 : vector<4x4096xf32>
    %c0_6 = arith.constant 0 : index
    %c0_7 = arith.constant 0 : index
    %12 = vector.load %arg4[%c0_6, %c0_7] : memref<4x4096xf32, #tpu.memory_space<vmem>>, vector<4x4096xf32>
    tpu.vector_store %arg4[%c0_6, %c0_7], %11 {strides = array<i32>} : memref<4x4096xf32, #tpu.memory_space<vmem>>, vector<4x4096xf32>,
    return
  }
  func.func @transform_0(%arg0: i32) -> (i32, i32) {
    %c0_i32 = arith.constant 0 : i32
    %c0_i32_0 = arith.constant 0 : i32
    %c0_i32_1 = arith.constant 0 : i32
    return %c0_i32, %c0_i32_0 : i32, i32
  }
  func.func @transform_1(%arg0: i32) -> (i32, i32) {
    %c0_i32 = arith.constant 0 : i32
    %c0_i32_0 = arith.constant 0 : i32
    %c0_i32_1 = arith.constant 0 : i32
    return %c0_i32, %c0_i32_0 : i32, i32
  }
  func.func @transform_2(%arg0: i32) -> (i32, i32) {
    %c0_i32 = arith.constant 0 : i32
    %c0_i32_0 = arith.constant 0 : i32
    return %c0_i32, %arg0 : i32, i32
  }
  func.func @transform_3(%arg0: i32) -> (i32, i32) {
    %c0_i32 = arith.constant 0 : i32
    %c0_i32_0 = arith.constant 0 : i32
    return %c0_i32, %arg0 : i32, i32
  }
}

module attributes {stable_mosaic.version = 11 : i64} {
  func.func @_conv_mm_res_kernel(%arg0: i32, %arg1: memref<4x36xbf16, #tpu.memory_space<vmem>>, %arg2: memref<4x1xf32, #tpu.memory_space<vmem>>, %arg3: memref<36x4096xbf16, #tpu.memory_space<vmem>>, %arg4: memref<4x4096xf32, #tpu.memory_space<vmem>>, %arg5: memref<4x4096xf32, #tpu.memory_space<vmem>>) attributes {dimension_semantics = [#tpu.dimension_semantics<parallel>], iteration_bounds = array<i64: 2>, scalar_prefetch = 0 : i64, scratch_operands = 0 : i64, tpu.core_type = #tpu.core_type<tc>, window_params = [{pipeline_mode = #tpu.pipeline_mode<synchronous>, transform_indices = @transform_0, window_bounds = array<i64: 4, 36>}, {pipeline_mode = #tpu.pipeline_mode<synchronous>, transform_indices = @transform_1, window_bounds = array<i64: 4, 1>}, {transform_indices = @transform_2, window_bounds = array<i64: 36, 4096>}, {transform_indices = @transform_3, window_bounds = array<i64: 4, 4096>}, {transform_indices = @transform_4, window_bounds = array<i64: 4, 4096>}]} {
    %c0 = arith.constant 0 : index
    %c0_0 = arith.constant 0 : index
    %0 = vector.load %arg1[%c0, %c0_0] : memref<4x36xbf16, #tpu.memory_space<vmem>>, vector<4x36xbf16>
    %c0_1 = arith.constant 0 : index
    %c0_2 = arith.constant 0 : index
    %1 = vector.load %arg3[%c0_1, %c0_2] : memref<36x4096xbf16, #tpu.memory_space<vmem>>, vector<36x4096xbf16>
    %cst = arith.constant dense<0.000000e+00> : vector<4x4096xf32>
    %2 = tpu.matmul %0, %1, %cst {dimension_numbers = #tpu.dot_dimension_numbers<[1], [0], [0], [1], [0, 0, 1, 1], [], []>} : vector<4x36xbf16>, vector<36x4096xbf16>, vector<4x4096xf32> -> vector<4x4096xf32>
    %c0_3 = arith.constant 0 : index
    %c0_4 = arith.constant 0 : index
    %3 = vector.load %arg2[%c0_3, %c0_4] : memref<4x1xf32, #tpu.memory_space<vmem>>, vector<4x1xf32>
    %4 = vector.broadcast %3 : vector<4x1xf32> to vector<4x4096xf32>
    %5 = arith.addf %2, %4 : vector<4x4096xf32>
    %c0_5 = arith.constant 0 : index
    %c0_6 = arith.constant 0 : index
    %6 = vector.load %arg4[%c0_5, %c0_6] : memref<4x4096xf32, #tpu.memory_space<vmem>>, vector<4x4096xf32>
    %7 = arith.addf %5, %6 : vector<4x4096xf32>
    %8 = arith.negf %7 : vector<4x4096xf32>
    %9 = math.exp %8 : vector<4x4096xf32>
    %cst_7 = arith.constant 1.000000e+00 : f32
    %10 = vector.broadcast %cst_7 : f32 to vector<4x4096xf32>
    %11 = arith.addf %10, %9 : vector<4x4096xf32>
    %12 = arith.divf %10, %11 : vector<4x4096xf32>
    %13 = arith.mulf %7, %12 : vector<4x4096xf32>
    %c0_8 = arith.constant 0 : index
    %c0_9 = arith.constant 0 : index
    %14 = vector.load %arg5[%c0_8, %c0_9] : memref<4x4096xf32, #tpu.memory_space<vmem>>, vector<4x4096xf32>
    tpu.vector_store %arg5[%c0_8, %c0_9], %13 {strides = array<i32>} : memref<4x4096xf32, #tpu.memory_space<vmem>>, vector<4x4096xf32>,
    return
  }
  func.func @transform_0(%arg0: i32) -> (i32, i32) {
    %c0_i32 = arith.constant 0 : i32
    %c0_i32_0 = arith.constant 0 : i32
    %c0_i32_1 = arith.constant 0 : i32
    return %c0_i32, %c0_i32_0 : i32, i32
  }
  func.func @transform_1(%arg0: i32) -> (i32, i32) {
    %c0_i32 = arith.constant 0 : i32
    %c0_i32_0 = arith.constant 0 : i32
    %c0_i32_1 = arith.constant 0 : i32
    return %c0_i32, %c0_i32_0 : i32, i32
  }
  func.func @transform_2(%arg0: i32) -> (i32, i32) {
    %c0_i32 = arith.constant 0 : i32
    %c0_i32_0 = arith.constant 0 : i32
    return %c0_i32, %arg0 : i32, i32
  }
  func.func @transform_3(%arg0: i32) -> (i32, i32) {
    %c0_i32 = arith.constant 0 : i32
    %c0_i32_0 = arith.constant 0 : i32
    return %c0_i32, %arg0 : i32, i32
  }
  func.func @transform_4(%arg0: i32) -> (i32, i32) {
    %c0_i32 = arith.constant 0 : i32
    %c0_i32_0 = arith.constant 0 : i32
    return %c0_i32, %arg0 : i32, i32
  }
}

module attributes {stable_mosaic.version = 11 : i64} {
  func.func @_conv_mm_kernel(%arg0: i32, %arg1: memref<8x64xbf16, #tpu.memory_space<vmem>>, %arg2: memref<8x1xf32, #tpu.memory_space<vmem>>, %arg3: memref<64x1024xbf16, #tpu.memory_space<vmem>>, %arg4: memref<8x1024xf32, #tpu.memory_space<vmem>>) attributes {dimension_semantics = [#tpu.dimension_semantics<parallel>], iteration_bounds = array<i64: 2>, scalar_prefetch = 0 : i64, scratch_operands = 0 : i64, tpu.core_type = #tpu.core_type<tc>, window_params = [{pipeline_mode = #tpu.pipeline_mode<synchronous>, transform_indices = @transform_0, window_bounds = array<i64: 8, 64>}, {pipeline_mode = #tpu.pipeline_mode<synchronous>, transform_indices = @transform_1, window_bounds = array<i64: 8, 1>}, {transform_indices = @transform_2, window_bounds = array<i64: 64, 1024>}, {transform_indices = @transform_3, window_bounds = array<i64: 8, 1024>}]} {
    %c0 = arith.constant 0 : index
    %c0_0 = arith.constant 0 : index
    %0 = vector.load %arg1[%c0, %c0_0] : memref<8x64xbf16, #tpu.memory_space<vmem>>, vector<8x64xbf16>
    %c0_1 = arith.constant 0 : index
    %c0_2 = arith.constant 0 : index
    %1 = vector.load %arg3[%c0_1, %c0_2] : memref<64x1024xbf16, #tpu.memory_space<vmem>>, vector<64x1024xbf16>
    %cst = arith.constant dense<0.000000e+00> : vector<8x1024xf32>
    %2 = tpu.matmul %0, %1, %cst {dimension_numbers = #tpu.dot_dimension_numbers<[1], [0], [0], [1], [0, 0, 1, 1], [], []>} : vector<8x64xbf16>, vector<64x1024xbf16>, vector<8x1024xf32> -> vector<8x1024xf32>
    %c0_3 = arith.constant 0 : index
    %c0_4 = arith.constant 0 : index
    %3 = vector.load %arg2[%c0_3, %c0_4] : memref<8x1xf32, #tpu.memory_space<vmem>>, vector<8x1xf32>
    %4 = vector.broadcast %3 : vector<8x1xf32> to vector<8x1024xf32>
    %5 = arith.addf %2, %4 : vector<8x1024xf32>
    %6 = arith.negf %5 : vector<8x1024xf32>
    %7 = math.exp %6 : vector<8x1024xf32>
    %cst_5 = arith.constant 1.000000e+00 : f32
    %8 = vector.broadcast %cst_5 : f32 to vector<8x1024xf32>
    %9 = arith.addf %8, %7 : vector<8x1024xf32>
    %10 = arith.divf %8, %9 : vector<8x1024xf32>
    %11 = arith.mulf %5, %10 : vector<8x1024xf32>
    %c0_6 = arith.constant 0 : index
    %c0_7 = arith.constant 0 : index
    %12 = vector.load %arg4[%c0_6, %c0_7] : memref<8x1024xf32, #tpu.memory_space<vmem>>, vector<8x1024xf32>
    tpu.vector_store %arg4[%c0_6, %c0_7], %11 {strides = array<i32>} : memref<8x1024xf32, #tpu.memory_space<vmem>>, vector<8x1024xf32>,
    return
  }
  func.func @transform_0(%arg0: i32) -> (i32, i32) {
    %c0_i32 = arith.constant 0 : i32
    %c0_i32_0 = arith.constant 0 : i32
    %c0_i32_1 = arith.constant 0 : i32
    return %c0_i32, %c0_i32_0 : i32, i32
  }
  func.func @transform_1(%arg0: i32) -> (i32, i32) {
    %c0_i32 = arith.constant 0 : i32
    %c0_i32_0 = arith.constant 0 : i32
    %c0_i32_1 = arith.constant 0 : i32
    return %c0_i32, %c0_i32_0 : i32, i32
  }
  func.func @transform_2(%arg0: i32) -> (i32, i32) {
    %c0_i32 = arith.constant 0 : i32
    %c0_i32_0 = arith.constant 0 : i32
    return %c0_i32, %arg0 : i32, i32
  }
  func.func @transform_3(%arg0: i32) -> (i32, i32) {
    %c0_i32 = arith.constant 0 : i32
    %c0_i32_0 = arith.constant 0 : i32
    return %c0_i32, %arg0 : i32, i32
  }
}

module attributes {stable_mosaic.version = 11 : i64} {
  func.func @_conv_mm_kernel(%arg0: i32, %arg1: memref<8x128xbf16, #tpu.memory_space<vmem>>, %arg2: memref<8x1xf32, #tpu.memory_space<vmem>>, %arg3: memref<128x256xbf16, #tpu.memory_space<vmem>>, %arg4: memref<8x256xf32, #tpu.memory_space<vmem>>) attributes {dimension_semantics = [#tpu.dimension_semantics<parallel>], iteration_bounds = array<i64: 2>, scalar_prefetch = 0 : i64, scratch_operands = 0 : i64, tpu.core_type = #tpu.core_type<tc>, window_params = [{pipeline_mode = #tpu.pipeline_mode<synchronous>, transform_indices = @transform_0, window_bounds = array<i64: 8, 128>}, {pipeline_mode = #tpu.pipeline_mode<synchronous>, transform_indices = @transform_1, window_bounds = array<i64: 8, 1>}, {transform_indices = @transform_2, window_bounds = array<i64: 128, 256>}, {transform_indices = @transform_3, window_bounds = array<i64: 8, 256>}]} {
    %c0 = arith.constant 0 : index
    %c0_0 = arith.constant 0 : index
    %0 = vector.load %arg1[%c0, %c0_0] : memref<8x128xbf16, #tpu.memory_space<vmem>>, vector<8x128xbf16>
    %c0_1 = arith.constant 0 : index
    %c0_2 = arith.constant 0 : index
    %1 = vector.load %arg3[%c0_1, %c0_2] : memref<128x256xbf16, #tpu.memory_space<vmem>>, vector<128x256xbf16>
    %cst = arith.constant dense<0.000000e+00> : vector<8x256xf32>
    %2 = tpu.matmul %0, %1, %cst {dimension_numbers = #tpu.dot_dimension_numbers<[1], [0], [0], [1], [0, 0, 1, 1], [], []>} : vector<8x128xbf16>, vector<128x256xbf16>, vector<8x256xf32> -> vector<8x256xf32>
    %c0_3 = arith.constant 0 : index
    %c0_4 = arith.constant 0 : index
    %3 = vector.load %arg2[%c0_3, %c0_4] : memref<8x1xf32, #tpu.memory_space<vmem>>, vector<8x1xf32>
    %4 = vector.broadcast %3 : vector<8x1xf32> to vector<8x256xf32>
    %5 = arith.addf %2, %4 : vector<8x256xf32>
    %6 = arith.negf %5 : vector<8x256xf32>
    %7 = math.exp %6 : vector<8x256xf32>
    %cst_5 = arith.constant 1.000000e+00 : f32
    %8 = vector.broadcast %cst_5 : f32 to vector<8x256xf32>
    %9 = arith.addf %8, %7 : vector<8x256xf32>
    %10 = arith.divf %8, %9 : vector<8x256xf32>
    %11 = arith.mulf %5, %10 : vector<8x256xf32>
    %c0_6 = arith.constant 0 : index
    %c0_7 = arith.constant 0 : index
    %12 = vector.load %arg4[%c0_6, %c0_7] : memref<8x256xf32, #tpu.memory_space<vmem>>, vector<8x256xf32>
    tpu.vector_store %arg4[%c0_6, %c0_7], %11 {strides = array<i32>} : memref<8x256xf32, #tpu.memory_space<vmem>>, vector<8x256xf32>,
    return
  }
  func.func @transform_0(%arg0: i32) -> (i32, i32) {
    %c0_i32 = arith.constant 0 : i32
    %c0_i32_0 = arith.constant 0 : i32
    %c0_i32_1 = arith.constant 0 : i32
    return %c0_i32, %c0_i32_0 : i32, i32
  }
  func.func @transform_1(%arg0: i32) -> (i32, i32) {
    %c0_i32 = arith.constant 0 : i32
    %c0_i32_0 = arith.constant 0 : i32
    %c0_i32_1 = arith.constant 0 : i32
    return %c0_i32, %c0_i32_0 : i32, i32
  }
  func.func @transform_2(%arg0: i32) -> (i32, i32) {
    %c0_i32 = arith.constant 0 : i32
    %c0_i32_0 = arith.constant 0 : i32
    return %c0_i32, %arg0 : i32, i32
  }
  func.func @transform_3(%arg0: i32) -> (i32, i32) {
    %c0_i32 = arith.constant 0 : i32
    %c0_i32_0 = arith.constant 0 : i32
    return %c0_i32, %arg0 : i32, i32
  }
}

module attributes {stable_mosaic.version = 11 : i64} {
  func.func @_conv_mm_kernel(%arg0: i32, %arg1: memref<8x72xbf16, #tpu.memory_space<vmem>>, %arg2: memref<8x1xf32, #tpu.memory_space<vmem>>, %arg3: memref<72x256xbf16, #tpu.memory_space<vmem>>, %arg4: memref<8x256xf32, #tpu.memory_space<vmem>>) attributes {dimension_semantics = [#tpu.dimension_semantics<parallel>], iteration_bounds = array<i64: 2>, scalar_prefetch = 0 : i64, scratch_operands = 0 : i64, tpu.core_type = #tpu.core_type<tc>, window_params = [{pipeline_mode = #tpu.pipeline_mode<synchronous>, transform_indices = @transform_0, window_bounds = array<i64: 8, 72>}, {pipeline_mode = #tpu.pipeline_mode<synchronous>, transform_indices = @transform_1, window_bounds = array<i64: 8, 1>}, {transform_indices = @transform_2, window_bounds = array<i64: 72, 256>}, {transform_indices = @transform_3, window_bounds = array<i64: 8, 256>}]} {
    %c0 = arith.constant 0 : index
    %c0_0 = arith.constant 0 : index
    %0 = vector.load %arg1[%c0, %c0_0] : memref<8x72xbf16, #tpu.memory_space<vmem>>, vector<8x72xbf16>
    %c0_1 = arith.constant 0 : index
    %c0_2 = arith.constant 0 : index
    %1 = vector.load %arg3[%c0_1, %c0_2] : memref<72x256xbf16, #tpu.memory_space<vmem>>, vector<72x256xbf16>
    %cst = arith.constant dense<0.000000e+00> : vector<8x256xf32>
    %2 = tpu.matmul %0, %1, %cst {dimension_numbers = #tpu.dot_dimension_numbers<[1], [0], [0], [1], [0, 0, 1, 1], [], []>} : vector<8x72xbf16>, vector<72x256xbf16>, vector<8x256xf32> -> vector<8x256xf32>
    %c0_3 = arith.constant 0 : index
    %c0_4 = arith.constant 0 : index
    %3 = vector.load %arg2[%c0_3, %c0_4] : memref<8x1xf32, #tpu.memory_space<vmem>>, vector<8x1xf32>
    %4 = vector.broadcast %3 : vector<8x1xf32> to vector<8x256xf32>
    %5 = arith.addf %2, %4 : vector<8x256xf32>
    %6 = arith.negf %5 : vector<8x256xf32>
    %7 = math.exp %6 : vector<8x256xf32>
    %cst_5 = arith.constant 1.000000e+00 : f32
    %8 = vector.broadcast %cst_5 : f32 to vector<8x256xf32>
    %9 = arith.addf %8, %7 : vector<8x256xf32>
    %10 = arith.divf %8, %9 : vector<8x256xf32>
    %11 = arith.mulf %5, %10 : vector<8x256xf32>
    %c0_6 = arith.constant 0 : index
    %c0_7 = arith.constant 0 : index
    %12 = vector.load %arg4[%c0_6, %c0_7] : memref<8x256xf32, #tpu.memory_space<vmem>>, vector<8x256xf32>
    tpu.vector_store %arg4[%c0_6, %c0_7], %11 {strides = array<i32>} : memref<8x256xf32, #tpu.memory_space<vmem>>, vector<8x256xf32>,
    return
  }
  func.func @transform_0(%arg0: i32) -> (i32, i32) {
    %c0_i32 = arith.constant 0 : i32
    %c0_i32_0 = arith.constant 0 : i32
    %c0_i32_1 = arith.constant 0 : i32
    return %c0_i32, %c0_i32_0 : i32, i32
  }
  func.func @transform_1(%arg0: i32) -> (i32, i32) {
    %c0_i32 = arith.constant 0 : i32
    %c0_i32_0 = arith.constant 0 : i32
    %c0_i32_1 = arith.constant 0 : i32
    return %c0_i32, %c0_i32_0 : i32, i32
  }
  func.func @transform_2(%arg0: i32) -> (i32, i32) {
    %c0_i32 = arith.constant 0 : i32
    %c0_i32_0 = arith.constant 0 : i32
    return %c0_i32, %arg0 : i32, i32
  }
  func.func @transform_3(%arg0: i32) -> (i32, i32) {
    %c0_i32 = arith.constant 0 : i32
    %c0_i32_0 = arith.constant 0 : i32
    return %c0_i32, %arg0 : i32, i32
  }
}

module attributes {stable_mosaic.version = 11 : i64} {
  func.func @_conv_mm_res_kernel(%arg0: i32, %arg1: memref<8x72xbf16, #tpu.memory_space<vmem>>, %arg2: memref<8x1xf32, #tpu.memory_space<vmem>>, %arg3: memref<72x256xbf16, #tpu.memory_space<vmem>>, %arg4: memref<8x256xf32, #tpu.memory_space<vmem>>, %arg5: memref<8x256xf32, #tpu.memory_space<vmem>>) attributes {dimension_semantics = [#tpu.dimension_semantics<parallel>], iteration_bounds = array<i64: 2>, scalar_prefetch = 0 : i64, scratch_operands = 0 : i64, tpu.core_type = #tpu.core_type<tc>, window_params = [{pipeline_mode = #tpu.pipeline_mode<synchronous>, transform_indices = @transform_0, window_bounds = array<i64: 8, 72>}, {pipeline_mode = #tpu.pipeline_mode<synchronous>, transform_indices = @transform_1, window_bounds = array<i64: 8, 1>}, {transform_indices = @transform_2, window_bounds = array<i64: 72, 256>}, {transform_indices = @transform_3, window_bounds = array<i64: 8, 256>}, {transform_indices = @transform_4, window_bounds = array<i64: 8, 256>}]} {
    %c0 = arith.constant 0 : index
    %c0_0 = arith.constant 0 : index
    %0 = vector.load %arg1[%c0, %c0_0] : memref<8x72xbf16, #tpu.memory_space<vmem>>, vector<8x72xbf16>
    %c0_1 = arith.constant 0 : index
    %c0_2 = arith.constant 0 : index
    %1 = vector.load %arg3[%c0_1, %c0_2] : memref<72x256xbf16, #tpu.memory_space<vmem>>, vector<72x256xbf16>
    %cst = arith.constant dense<0.000000e+00> : vector<8x256xf32>
    %2 = tpu.matmul %0, %1, %cst {dimension_numbers = #tpu.dot_dimension_numbers<[1], [0], [0], [1], [0, 0, 1, 1], [], []>} : vector<8x72xbf16>, vector<72x256xbf16>, vector<8x256xf32> -> vector<8x256xf32>
    %c0_3 = arith.constant 0 : index
    %c0_4 = arith.constant 0 : index
    %3 = vector.load %arg2[%c0_3, %c0_4] : memref<8x1xf32, #tpu.memory_space<vmem>>, vector<8x1xf32>
    %4 = vector.broadcast %3 : vector<8x1xf32> to vector<8x256xf32>
    %5 = arith.addf %2, %4 : vector<8x256xf32>
    %c0_5 = arith.constant 0 : index
    %c0_6 = arith.constant 0 : index
    %6 = vector.load %arg4[%c0_5, %c0_6] : memref<8x256xf32, #tpu.memory_space<vmem>>, vector<8x256xf32>
    %7 = arith.addf %5, %6 : vector<8x256xf32>
    %8 = arith.negf %7 : vector<8x256xf32>
    %9 = math.exp %8 : vector<8x256xf32>
    %cst_7 = arith.constant 1.000000e+00 : f32
    %10 = vector.broadcast %cst_7 : f32 to vector<8x256xf32>
    %11 = arith.addf %10, %9 : vector<8x256xf32>
    %12 = arith.divf %10, %11 : vector<8x256xf32>
    %13 = arith.mulf %7, %12 : vector<8x256xf32>
    %c0_8 = arith.constant 0 : index
    %c0_9 = arith.constant 0 : index
    %14 = vector.load %arg5[%c0_8, %c0_9] : memref<8x256xf32, #tpu.memory_space<vmem>>, vector<8x256xf32>
    tpu.vector_store %arg5[%c0_8, %c0_9], %13 {strides = array<i32>} : memref<8x256xf32, #tpu.memory_space<vmem>>, vector<8x256xf32>,
    return
  }
  func.func @transform_0(%arg0: i32) -> (i32, i32) {
    %c0_i32 = arith.constant 0 : i32
    %c0_i32_0 = arith.constant 0 : i32
    %c0_i32_1 = arith.constant 0 : i32
    return %c0_i32, %c0_i32_0 : i32, i32
  }
  func.func @transform_1(%arg0: i32) -> (i32, i32) {
    %c0_i32 = arith.constant 0 : i32
    %c0_i32_0 = arith.constant 0 : i32
    %c0_i32_1 = arith.constant 0 : i32
    return %c0_i32, %c0_i32_0 : i32, i32
  }
  func.func @transform_2(%arg0: i32) -> (i32, i32) {
    %c0_i32 = arith.constant 0 : i32
    %c0_i32_0 = arith.constant 0 : i32
    return %c0_i32, %arg0 : i32, i32
  }
  func.func @transform_3(%arg0: i32) -> (i32, i32) {
    %c0_i32 = arith.constant 0 : i32
    %c0_i32_0 = arith.constant 0 : i32
    return %c0_i32, %arg0 : i32, i32
  }
  func.func @transform_4(%arg0: i32) -> (i32, i32) {
    %c0_i32 = arith.constant 0 : i32
    %c0_i32_0 = arith.constant 0 : i32
    return %c0_i32, %arg0 : i32, i32
  }
}

</mosaic_0001>

<bundles_post_ra>
// kernel: _lambda_.7
= control target key start
LH: loop header
LB: loop body
LE: loop exit
PB: predicated region body
PF: predicated region fallthrough
CT: control target
= control target key end

     0   :  { %s2350_s12 = smov 0   ;;  %s2352_s13 = smov 0   ;;  %s2936_s0 = inlined_call_operand.vmem [shape: bf16[4,48], index: 0, kind: input, shape index: {}]   ;;  %s2937_s1 = inlined_call_operand.vmem [shape: f32[4,1], index: 1, kind: input, shape index: {}]   ;;  %s2938_s2 = inlined_call_operand.vmem [shape: bf16[48,8192], index: 2, kind: input, shape index: {}]   ;;  %s2939_s3 = inlined_call_operand.vmem [shape: f32[4,8192], index: 3, kind: output, shape index: {}]  }
   0x1   :  { %s2354_s14 = smov 0  }
   0x2 LB: > { %s1993_s15 = sadd.s32 4294967295, %s2327_s14   ;;  %s2367_s16 = sadd.s32 1, %s2327_s14   ;;  %s2327_s14 = sphi %s2354_s14, %s2942_s14   ;;  %s2323_s13 = sphi %s2352_s13, %s2941_s13   ;;  %s2319_s12 = sphi %s2350_s12, %s2940_s12  }
   0x3   : > { %s59_s17 = ssub.s32 %s2327_s14, %s2367_s16  ;;  %s62_s18 = sadd.s32 1, %s2323_s13 }
   0x4   : > { %p60_p0 = scmp.eq.s32.totalorder %s59_s17, 0  ;;  %p69_p1 = scmp.ne.s32.totalorder %s2323_s13, %s2319_s12 }
   0x5   : > { %p70_p2 = scmp.eq.s32.totalorder %s2327_s14, 0  ;;  %p1996_p4 = scmp.ge.s32.totalorder %s2327_s14, 2 }
   0x6   : > { %s2376_s19 = scalar_select %p60_p0, %s2323_s13, %s62_s18  }
   0x7   : > { %p71_p3 = por %p70_p2, %p69_p1  ;;  %127 = sbr.rel (%p1996_p4) target bundleno = 67 (0x43), region = 24 }
   0xe   : > { %130 = sbr.rel (!%p71_p3) target bundleno = 67 (0x43), region = 28  ;;  %s132_s20 = sand.u32 (%p71_p3), 1, %s2323_s13  }
   0xf   : > { %s2148_s21 = sshll.u32 (%p71_p3), %s2327_s14, 7  ;;  %s2149_s22 = smul.u32 (%p71_p3), 768, %s132_s20 }
  0x10   : > { %s2384_s25 = scalar_lea.vmem (%p71_p3), %s2938_s2, %s2148_s21 }
  0x11   : > { %v150_v0 = vld [vmem:[%s2384_s25] sm:$0xff] (%p71_p3)  ;;  %v152_v1 = vld [vmem:[%s2384_s25 + $0x8] sm:$0xff] (%p71_p3)  ;;  %v154_v2 = vld [vmem:[%s2384_s25 + $0x10] sm:$0xff] (%p71_p3)  ;;  %s2392_s26 = scalar_lea.vmem (%p71_p3), [#allocation2], %s2149_s22 }
  0x12   : > { %v156_v3 = vld [vmem:[%s2384_s25 + $0x18] sm:$0xff] (%p71_p3)  ;;  %v158_v4 = vld [vmem:[%s2384_s25 + $0x20] sm:$0xff] (%p71_p3)  ;;  %v160_v5 = vld [vmem:[%s2384_s25 + $0x28] sm:$0xff] (%p71_p3)  ;;  %151 = vst [vmem:[%s2392_s26] sm:$0xff] (%p71_p3), %v150_v0 }
  0x13   : > { %153 = vst [vmem:[%s2392_s26 + $0x8] sm:$0xff] (%p71_p3), %v152_v1  ;;  %155 = vst [vmem:[%s2392_s26 + $0x10] sm:$0xff] (%p71_p3), %v154_v2  ;;  %v162_v6 = vld [vmem:[%s2384_s25 + $0x30] sm:$0xff] (%p71_p3)  ;;  %v164_v7 = vld [vmem:[%s2384_s25 + $0x38] sm:$0xff] (%p71_p3) }
  0x14   : > { %157 = vst [vmem:[%s2392_s26 + $0x18] sm:$0xff] (%p71_p3), %v156_v3  ;;  %159 = vst [vmem:[%s2392_s26 + $0x20] sm:$0xff] (%p71_p3), %v158_v4  ;;  %v166_v8 = vld [vmem:[%s2384_s25 + $0x40] sm:$0xff] (%p71_p3)  ;;  %v168_v9 = vld [vmem:[%s2384_s25 + $0x48] sm:$0xff] (%p71_p3) }
  0x15   : > { %161 = vst [vmem:[%s2392_s26 + $0x28] sm:$0xff] %v160_v5  ;;  %163 = vst [vmem:[%s2392_s26 + $0x30] sm:$0xff] %v162_v6  ;;  %v170_v10 = vld [vmem:[%s2384_s25 + $0x50] sm:$0xff]  ;;  %v172_v11 = vld [vmem:[%s2384_s25 + $0x58] sm:$0xff] }
  0x16   : > { %165 = vst [vmem:[%s2392_s26 + $0x38] sm:$0xff] %v164_v7  ;;  %167 = vst [vmem:[%s2392_s26 + $0x40] sm:$0xff] %v166_v8  ;;  %v174_v12 = vld [vmem:[%s2384_s25 + $0x60] sm:$0xff]  ;;  %v176_v13 = vld [vmem:[%s2384_s25 + $0x68] sm:$0xff] }
  0x17   : > { %169 = vst [vmem:[%s2392_s26 + $0x48] sm:$0xff] %v168_v9  ;;  %171 = vst [vmem:[%s2392_s26 + $0x50] sm:$0xff] %v170_v10  ;;  %v178_v14 = vld [vmem:[%s2384_s25 + $0x70] sm:$0xff]  ;;  %v180_v15 = vld [vmem:[%s2384_s25 + $0x78] sm:$0xff] }
  0x18   : > { %173 = vst [vmem:[%s2392_s26 + $0x58] sm:$0xff] %v172_v11  ;;  %175 = vst [vmem:[%s2392_s26 + $0x60] sm:$0xff] %v174_v12  ;;  %v182_v16 = vld [vmem:[%s2384_s25 + $0x100] sm:$0xff]  ;;  %v184_v17 = vld [vmem:[%s2384_s25 + $0x108] sm:$0xff] }
  0x19   : > { %177 = vst [vmem:[%s2392_s26 + $0x68] sm:$0xff] %v176_v13  ;;  %179 = vst [vmem:[%s2392_s26 + $0x70] sm:$0xff] %v178_v14  ;;  %v186_v18 = vld [vmem:[%s2384_s25 + $0x110] sm:$0xff]  ;;  %v188_v19 = vld [vmem:[%s2384_s25 + $0x118] sm:$0xff] }
  0x1a   : > { %181 = vst [vmem:[%s2392_s26 + $0x78] sm:$0xff] %v180_v15  ;;  %183 = vst [vmem:[%s2392_s26 + $0x80] sm:$0xff] %v182_v16  ;;  %v190_v20 = vld [vmem:[%s2384_s25 + $0x120] sm:$0xff]  ;;  %v192_v21 = vld [vmem:[%s2384_s25 + $0x128] sm:$0xff] }
  0x1b   : > { %185 = vst [vmem:[%s2392_s26 + $0x88] sm:$0xff] %v184_v17  ;;  %187 = vst [vmem:[%s2392_s26 + $0x90] sm:$0xff] %v186_v18  ;;  %v194_v22 = vld [vmem:[%s2384_s25 + $0x130] sm:$0xff]  ;;  %v196_v23 = vld [vmem:[%s2384_s25 + $0x138] sm:$0xff] }
  0x1c   : > { %189 = vst [vmem:[%s2392_s26 + $0x98] sm:$0xff] %v188_v19  ;;  %191 = vst [vmem:[%s2392_s26 + $0xa0] sm:$0xff] %v190_v20  ;;  %v198_v24 = vld [vmem:[%s2384_s25 + $0x140] sm:$0xff]  ;;  %v200_v25 = vld [vmem:[%s2384_s25 + $0x148] sm:$0xff] }
  0x1d   : > { %193 = vst [vmem:[%s2392_s26 + $0xa8] sm:$0xff] %v192_v21  ;;  %195 = vst [vmem:[%s2392_s26 + $0xb0] sm:$0xff] %v194_v22  ;;  %v202_v26 = vld [vmem:[%s2384_s25 + $0x150] sm:$0xff]  ;;  %v204_v27 = vld [vmem:[%s2384_s25 + $0x158] sm:$0xff] }
  0x1e   : > { %197 = vst [vmem:[%s2392_s26 + $0xb8] sm:$0xff] %v196_v23  ;;  %199 = vst [vmem:[%s2392_s26 + $0xc0] sm:$0xff] %v198_v24  ;;  %v206_v28 = vld [vmem:[%s2384_s25 + $0x160] sm:$0xff]  ;;  %v208_v29 = vld [vmem:[%s2384_s25 + $0x168] sm:$0xff] }
  0x1f   : > { %201 = vst [vmem:[%s2392_s26 + $0xc8] sm:$0xff] %v200_v25  ;;  %203 = vst [vmem:[%s2392_s26 + $0xd0] sm:$0xff] %v202_v26  ;;  %v210_v30 = vld [vmem:[%s2384_s25 + $0x170] sm:$0xff]  ;;  %v212_v31 = vld [vmem:[%s2384_s25 + $0x178] sm:$0xff] }
  0x20   : > { %205 = vst [vmem:[%s2392_s26 + $0xd8] sm:$0xff] %v204_v27  ;;  %207 = vst [vmem:[%s2392_s26 + $0xe0] sm:$0xff] %v206_v28  ;;  %v214_v32 = vld [vmem:[%s2384_s25 + $0x200] sm:$0xff]  ;;  %v216_v33 = vld [vmem:[%s2384_s25 + $0x208] sm:$0xff] }
  0x21   : > { %209 = vst [vmem:[%s2392_s26 + $0xe8] sm:$0xff] %v208_v29  ;;  %211 = vst [vmem:[%s2392_s26 + $0xf0] sm:$0xff] %v210_v30  ;;  %v218_v34 = vld [vmem:[%s2384_s25 + $0x210] sm:$0xff]  ;;  %v220_v35 = vld [vmem:[%s2384_s25 + $0x218] sm:$0xff] }
  0x22   : > { %213 = vst [vmem:[%s2392_s26 + $0xf8] sm:$0xff] %v212_v31  ;;  %215 = vst [vmem:[%s2392_s26 + $0x100] sm:$0xff] %v214_v32  ;;  %v222_v36 = vld [vmem:[%s2384_s25 + $0x220] sm:$0xff]  ;;  %v224_v37 = vld [vmem:[%s2384_s25 + $0x228] sm:$0xff] }
  0x23   : > { %217 = vst [vmem:[%s2392_s26 + $0x108] sm:$0xff] %v216_v33  ;;  %219 = vst [vmem:[%s2392_s26 + $0x110] sm:$0xff] %v218_v34  ;;  %v226_v38 = vld [vmem:[%s2384_s25 + $0x230] sm:$0xff]  ;;  %v228_v39 = vld [vmem:[%s2384_s25 + $0x238] sm:$0xff] }
  0x24   : > { %221 = vst [vmem:[%s2392_s26 + $0x118] sm:$0xff] %v220_v35  ;;  %223 = vst [vmem:[%s2392_s26 + $0x120] sm:$0xff] %v222_v36  ;;  %v230_v40 = vld [vmem:[%s2384_s25 + $0x240] sm:$0xff]  ;;  %v232_v41 = vld [vmem:[%s2384_s25 + $0x248] sm:$0xff] }
  0x25   : > { %225 = vst [vmem:[%s2392_s26 + $0x128] sm:$0xff] %v224_v37  ;;  %227 = vst [vmem:[%s2392_s26 + $0x130] sm:$0xff] %v226_v38  ;;  %v234_v42 = vld [vmem:[%s2384_s25 + $0x250] sm:$0xff]  ;;  %v236_v43 = vld [vmem:[%s2384_s25 + $0x258] sm:$0xff] }
  0x26   : > { %229 = vst [vmem:[%s2392_s26 + $0x138] sm:$0xff] %v228_v39  ;;  %231 = vst [vmem:[%s2392_s26 + $0x140] sm:$0xff] %v230_v40  ;;  %v238_v44 = vld [vmem:[%s2384_s25 + $0x260] sm:$0xff]  ;;  %v240_v45 = vld [vmem:[%s2384_s25 + $0x268] sm:$0xff] }
  0x27   : > { %233 = vst [vmem:[%s2392_s26 + $0x148] sm:$0xff] %v232_v41  ;;  %235 = vst [vmem:[%s2392_s26 + $0x150] sm:$0xff] %v234_v42  ;;  %v242_v46 = vld [vmem:[%s2384_s25 + $0x270] sm:$0xff]  ;;  %v244_v47 = vld [vmem:[%s2384_s25 + $0x278] sm:$0xff] }
  0x28   : > { %237 = vst [vmem:[%s2392_s26 + $0x158] sm:$0xff] %v236_v43  ;;  %239 = vst [vmem:[%s2392_s26 + $0x160] sm:$0xff] %v238_v44  ;;  %v246_v48 = vld [vmem:[%s2384_s25 + $0x300] sm:$0xff]  ;;  %v248_v49 = vld [vmem:[%s2384_s25 + $0x308] sm:$0xff] }
  0x29   : > { %241 = vst [vmem:[%s2392_s26 + $0x168] sm:$0xff] %v240_v45  ;;  %243 = vst [vmem:[%s2392_s26 + $0x170] sm:$0xff] %v242_v46  ;;  %v250_v50 = vld [vmem:[%s2384_s25 + $0x310] sm:$0xff]  ;;  %v252_v51 = vld [vmem:[%s2384_s25 + $0x318] sm:$0xff] }
  0x2a   : > { %245 = vst [vmem:[%s2392_s26 + $0x178] sm:$0xff] %v244_v47  ;;  %247 = vst [vmem:[%s2392_s26 + $0x180] sm:$0xff] %v246_v48  ;;  %v254_v52 = vld [vmem:[%s2384_s25 + $0x320] sm:$0xff]  ;;  %v256_v53 = vld [vmem:[%s2384_s25 + $0x328] sm:$0xff] }
  0x2b   : > { %249 = vst [vmem:[%s2392_s26 + $0x188] sm:$0xff] %v248_v49  ;;  %251 = vst [vmem:[%s2392_s26 + $0x190] sm:$0xff] %v250_v50  ;;  %v258_v54 = vld [vmem:[%s2384_s25 + $0x330] sm:$0xff]  ;;  %v260_v55 = vld [vmem:[%s2384_s25 + $0x338] sm:$0xff] }
  0x2c   : > { %253 = vst [vmem:[%s2392_s26 + $0x198] sm:$0xff] %v252_v51  ;;  %255 = vst [vmem:[%s2392_s26 + $0x1a0] sm:$0xff] %v254_v52  ;;  %v262_v56 = vld [vmem:[%s2384_s25 + $0x340] sm:$0xff]  ;;  %v264_v57 = vld [vmem:[%s2384_s25 + $0x348] sm:$0xff] }
  0x2d   : > { %257 = vst [vmem:[%s2392_s26 + $0x1a8] sm:$0xff] %v256_v53  ;;  %259 = vst [vmem:[%s2392_s26 + $0x1b0] sm:$0xff] %v258_v54  ;;  %v266_v58 = vld [vmem:[%s2384_s25 + $0x350] sm:$0xff]  ;;  %v268_v59 = vld [vmem:[%s2384_s25 + $0x358] sm:$0xff] }
  0x2e   : > { %261 = vst [vmem:[%s2392_s26 + $0x1b8] sm:$0xff] %v260_v55  ;;  %263 = vst [vmem:[%s2392_s26 + $0x1c0] sm:$0xff] %v262_v56  ;;  %v270_v60 = vld [vmem:[%s2384_s25 + $0x360] sm:$0xff]  ;;  %v272_v61 = vld [vmem:[%s2384_s25 + $0x368] sm:$0xff] }
  0x2f   : > { %265 = vst [vmem:[%s2392_s26 + $0x1c8] sm:$0xff] %v264_v57  ;;  %267 = vst [vmem:[%s2392_s26 + $0x1d0] sm:$0xff] %v266_v58  ;;  %v274_v62 = vld [vmem:[%s2384_s25 + $0x370] sm:$0xff]  ;;  %v276_v63 = vld [vmem:[%s2384_s25 + $0x378] sm:$0xff] }
  0x30   : > { %269 = vst [vmem:[%s2392_s26 + $0x1d8] sm:$0xff] %v268_v59  ;;  %271 = vst [vmem:[%s2392_s26 + $0x1e0] sm:$0xff] %v270_v60  ;;  %v278_v0 = vld [vmem:[%s2384_s25 + $0x400] sm:$0xff]  ;;  %v280_v1 = vld [vmem:[%s2384_s25 + $0x408] sm:$0xff] }
  0x31   : > { %273 = vst [vmem:[%s2392_s26 + $0x1e8] sm:$0xff] %v272_v61  ;;  %275 = vst [vmem:[%s2392_s26 + $0x1f0] sm:$0xff] %v274_v62  ;;  %v282_v2 = vld [vmem:[%s2384_s25 + $0x410] sm:$0xff]  ;;  %v284_v3 = vld [vmem:[%s2384_s25 + $0x418] sm:$0xff] }
  0x32   : > { %277 = vst [vmem:[%s2392_s26 + $0x1f8] sm:$0xff] %v276_v63  ;;  %279 = vst [vmem:[%s2392_s26 + $0x200] sm:$0xff] %v278_v0  ;;  %v286_v4 = vld [vmem:[%s2384_s25 + $0x420] sm:$0xff]  ;;  %v288_v5 = vld [vmem:[%s2384_s25 + $0x428] sm:$0xff] }
  0x33   : > { %281 = vst [vmem:[%s2392_s26 + $0x208] sm:$0xff] %v280_v1  ;;  %283 = vst [vmem:[%s2392_s26 + $0x210] sm:$0xff] %v282_v2  ;;  %v290_v6 = vld [vmem:[%s2384_s25 + $0x430] sm:$0xff]  ;;  %v292_v7 = vld [vmem:[%s2384_s25 + $0x438] sm:$0xff] }
  0x34   : > { %285 = vst [vmem:[%s2392_s26 + $0x218] sm:$0xff] %v284_v3  ;;  %287 = vst [vmem:[%s2392_s26 + $0x220] sm:$0xff] %v286_v4  ;;  %v294_v8 = vld [vmem:[%s2384_s25 + $0x440] sm:$0xff]  ;;  %v296_v9 = vld [vmem:[%s2384_s25 + $0x448] sm:$0xff] }
  0x35   : > { %289 = vst [vmem:[%s2392_s26 + $0x228] sm:$0xff] %v288_v5  ;;  %291 = vst [vmem:[%s2392_s26 + $0x230] sm:$0xff] %v290_v6  ;;  %v298_v10 = vld [vmem:[%s2384_s25 + $0x450] sm:$0xff]  ;;  %v300_v11 = vld [vmem:[%s2384_s25 + $0x458] sm:$0xff] }
  0x36   : > { %293 = vst [vmem:[%s2392_s26 + $0x238] sm:$0xff] %v292_v7  ;;  %295 = vst [vmem:[%s2392_s26 + $0x240] sm:$0xff] %v294_v8  ;;  %v302_v12 = vld [vmem:[%s2384_s25 + $0x460] sm:$0xff]  ;;  %v304_v13 = vld [vmem:[%s2384_s25 + $0x468] sm:$0xff] }
  0x37   : > { %297 = vst [vmem:[%s2392_s26 + $0x248] sm:$0xff] %v296_v9  ;;  %299 = vst [vmem:[%s2392_s26 + $0x250] sm:$0xff] %v298_v10  ;;  %v306_v14 = vld [vmem:[%s2384_s25 + $0x470] sm:$0xff]  ;;  %v308_v15 = vld [vmem:[%s2384_s25 + $0x478] sm:$0xff] }
  0x38   : > { %301 = vst [vmem:[%s2392_s26 + $0x258] sm:$0xff] %v300_v11  ;;  %303 = vst [vmem:[%s2392_s26 + $0x260] sm:$0xff] %v302_v12  ;;  %v310_v16 = vld [vmem:[%s2384_s25 + $0x500] sm:$0xff]  ;;  %v312_v17 = vld [vmem:[%s2384_s25 + $0x508] sm:$0xff] }
  0x39   : > { %305 = vst [vmem:[%s2392_s26 + $0x268] sm:$0xff] %v304_v13  ;;  %307 = vst [vmem:[%s2392_s26 + $0x270] sm:$0xff] %v306_v14  ;;  %v314_v18 = vld [vmem:[%s2384_s25 + $0x510] sm:$0xff]  ;;  %v316_v19 = vld [vmem:[%s2384_s25 + $0x518] sm:$0xff] }
  0x3a   : > { %309 = vst [vmem:[%s2392_s26 + $0x278] sm:$0xff] %v308_v15  ;;  %311 = vst [vmem:[%s2392_s26 + $0x280] sm:$0xff] %v310_v16  ;;  %v318_v20 = vld [vmem:[%s2384_s25 + $0x520] sm:$0xff]  ;;  %v320_v21 = vld [vmem:[%s2384_s25 + $0x528] sm:$0xff] }
  0x3b   : > { %313 = vst [vmem:[%s2392_s26 + $0x288] sm:$0xff] %v312_v17  ;;  %315 = vst [vmem:[%s2392_s26 + $0x290] sm:$0xff] %v314_v18  ;;  %v322_v22 = vld [vmem:[%s2384_s25 + $0x530] sm:$0xff]  ;;  %v324_v23 = vld [vmem:[%s2384_s25 + $0x538] sm:$0xff] }
  0x3c   : > { %317 = vst [vmem:[%s2392_s26 + $0x298] sm:$0xff] %v316_v19  ;;  %319 = vst [vmem:[%s2392_s26 + $0x2a0] sm:$0xff] %v318_v20  ;;  %v326_v24 = vld [vmem:[%s2384_s25 + $0x540] sm:$0xff]  ;;  %v328_v25 = vld [vmem:[%s2384_s25 + $0x548] sm:$0xff] }
  0x3d   : > { %321 = vst [vmem:[%s2392_s26 + $0x2a8] sm:$0xff] %v320_v21  ;;  %323 = vst [vmem:[%s2392_s26 + $0x2b0] sm:$0xff] %v322_v22  ;;  %v330_v26 = vld [vmem:[%s2384_s25 + $0x550] sm:$0xff]  ;;  %v332_v27 = vld [vmem:[%s2384_s25 + $0x558] sm:$0xff] }
  0x3e   : > { %325 = vst [vmem:[%s2392_s26 + $0x2b8] sm:$0xff] %v324_v23  ;;  %327 = vst [vmem:[%s2392_s26 + $0x2c0] sm:$0xff] %v326_v24  ;;  %v334_v28 = vld [vmem:[%s2384_s25 + $0x560] sm:$0xff]  ;;  %v336_v29 = vld [vmem:[%s2384_s25 + $0x568] sm:$0xff] }
  0x3f   : > { %329 = vst [vmem:[%s2392_s26 + $0x2c8] sm:$0xff] %v328_v25  ;;  %331 = vst [vmem:[%s2392_s26 + $0x2d0] sm:$0xff] %v330_v26  ;;  %v338_v30 = vld [vmem:[%s2384_s25 + $0x570] sm:$0xff]  ;;  %v340_v31 = vld [vmem:[%s2384_s25 + $0x578] sm:$0xff] }
  0x40   : > { %333 = vst [vmem:[%s2392_s26 + $0x2d8] sm:$0xff] %v332_v27  ;;  %335 = vst [vmem:[%s2392_s26 + $0x2e0] sm:$0xff] %v334_v28 }
  0x41   : > { %337 = vst [vmem:[%s2392_s26 + $0x2e8] sm:$0xff] %v336_v29  ;;  %339 = vst [vmem:[%s2392_s26 + $0x2f0] sm:$0xff] %v338_v30 }
  0x42   : > { %341 = vst [vmem:[%s2392_s26 + $0x2f8] sm:$0xff] %v340_v31 }
  0x43 PF: > { %p1999_p5 = scmp.ge.s32.totalorder %s2327_s14, 1  ;;  %p346_p6 = scmp.lt.s32.totalorder %s2327_s14, 3 }
  0x45   : > { %p347_p7 = pnand %p1999_p5, %p346_p6 }
  0x46   : > { %s353_s27 = sand.u32 (!%p347_p7), 1, %s2319_s12   ;;  %v2329_v32 = vmov (!%p347_p7), 0   ;;  %v481_v33 = vld [vmem:[%s2937_s1] sm:$0xf] (!%p347_p7)  ;;  %vm967_vm0 = vcmask (!%p347_p7), 392192   ;;  %s2000_s7 = sshll.u32 (!%p347_p7), %s1993_s15, 5 }
  0x47   : > { %350 = sbr.rel (%p347_p7) target bundleno = 426 (0x1aa), region = 51  ;;  %1003 = vmatprep.mubr.bf16.mxu0 (!%p347_p7), %v2329_v32  ;;  %1044 = vmatprep.mubr.bf16.mxu1 (!%p347_p7), %v2329_v32  ;;  %v2614_v4 = vld [vmem:[%s2936_s0] sm:$0x3] (!%p347_p7)  ;;  %p378_p8 = scmp.lt.s32.totalorder (!%p347_p7), %s2000_s7, 63 }
  0x48   : > { %s2150_s28 = smul.u32 (!%p347_p7), 768, %s353_s27  ;;  %2176 = vset.pattern.permute.xlu0 (!%p347_p7), %v2329_v32 }
  0x49   : > { %484 = vperm.xlu0 (!%p347_p7), %2176, %v481_v33  }
  0x4a   : > { %s2589_s4 = scalar_lea.vmem (!%p347_p7), [#allocation2], %s2150_s28 }
  0x4b   : > { %v385_v34 = vld [vmem:[%s2589_s4] sm:$0xff] (!%p347_p7)  ;;  %v386_v36 = vld [vmem:[%s2589_s4 + $0x8] sm:$0xff] (!%p347_p7)  ;;  %v387_v56 = vld [vmem:[%s2589_s4 + $0x10] sm:$0xff] (!%p347_p7) }
  0x4c   : > { %v401_v35 = vld [vmem:[%s2589_s4 + $0x80] sm:$0xff] (!%p347_p7)  ;;  %v402_v38 = vld [vmem:[%s2589_s4 + $0x88] sm:$0xff] (!%p347_p7)  ;;  %v403_v57 = vld [vmem:[%s2589_s4 + $0x90] sm:$0xff] (!%p347_p7) }
  0x4d   : > { %v2003_v37 = vcombine.high (!%p347_p7), %v385_v34, %v401_v35  ;;  %v2002_v39 = vcombine.low (!%p347_p7), %v385_v34, %v401_v35  ;;  %v417_v40 = vld [vmem:[%s2589_s4 + $0x100] sm:$0xff] (!%p347_p7)  ;;  %v2005_v42 = vcombine.high (!%p347_p7), %v386_v36, %v402_v38  ;;  %v2004_v43 = vcombine.low (!%p347_p7), %v386_v36, %v402_v38  ;;  %v418_v45 = vld [vmem:[%s2589_s4 + $0x108] sm:$0xff] (!%p347_p7)  ;;  %v388_v58 = vld [vmem:[%s2589_s4 + $0x18] sm:$0xff] (!%p347_p7) }
  0x4e   : > { %v433_v41 = vld [vmem:[%s2589_s4 + $0x180] sm:$0xff]  ;;  %v434_v46 = vld [vmem:[%s2589_s4 + $0x188] sm:$0xff]  ;;  %v404_v59 = vld [vmem:[%s2589_s4 + $0x98] sm:$0xff]  ;;  %v2007_v62 = vcombine.high %v387_v56, %v403_v57  ;;  %v2006_v5 = vcombine.low %v387_v56, %v403_v57  ;;  %s2944_s7 = smov (!%p378_p8, %s2000_s7), 63 }
  0x4f   : > { %v2035_v44 = vcombine.high %v417_v40, %v433_v41  ;;  %v449_v47 = vld [vmem:[%s2589_s4 + $0x200] sm:$0xff]  ;;  %971 = vmatprep.subr.bf16.mxu0 %v2003_v37  ;;  %v2037_v48 = vcombine.high %v418_v45, %v434_v46  ;;  %v450_v50 = vld [vmem:[%s2589_s4 + $0x208] sm:$0xff]  ;;  %1012 = vmatprep.subr.bf16.mxu1 %v2005_v42  ;;  %v2034_v52 = vcombine.low %v417_v40, %v433_v41  ;;  %v419_v0 = vld [vmem:[%s2589_s4 + $0x110] sm:$0xff]  ;;  %s2001_s8 = sshll.u32 %s2944_s7, 2 }
  0x50   : > { %v465_v49 = vld [vmem:[%s2589_s4 + $0x280] sm:$0xff]  ;;  %v466_v51 = vld [vmem:[%s2589_s4 + $0x288] sm:$0xff]  ;;  %972 = vmatpush1.bf16.msra.mxu0 %v2002_v39  ;;  %1013 = vmatpush1.bf16.msra.mxu1 %v2004_v43  ;;  %v2036_v53 = vcombine.low %v418_v45, %v434_v46  ;;  %v2009_v63 = vcombine.high %v388_v58, %v404_v59  ;;  %v435_v1 = vld [vmem:[%s2589_s4 + $0x190] sm:$0xff]  ;;  %v2008_v6 = vcombine.low %v388_v58, %v404_v59  ;;  %s2799_s11 = scalar_lea.vmem %s2939_s3, %s2001_s8 }
  0x51   : > { %973 = vmatprep.subr.bf16.mxu0 %v2035_v44  ;;  %v2067_v54 = vcombine.high %v449_v47, %v465_v49  ;;  %1014 = vmatprep.subr.bf16.mxu1 %v2037_v48  ;;  %v2069_v55 = vcombine.high %v450_v50, %v466_v51  ;;  %v2066_v60 = vcombine.low %v449_v47, %v465_v49  ;;  %v420_v2 = vld [vmem:[%s2589_s4 + $0x118] sm:$0xff]  ;;  %v451_v9 = vld [vmem:[%s2589_s4 + $0x210] sm:$0xff]  ;;  %v389_v17 = vld [vmem:[%s2589_s4 + $0x20] sm:$0xff] }
  0x52   : > { %v2068_v61 = vcombine.low %v450_v50, %v466_v51  ;;  %v436_v3 = vld [vmem:[%s2589_s4 + $0x198] sm:$0xff]  ;;  %v2039_v7 = vcombine.high %v419_v0, %v435_v1  ;;  %v467_v10 = vld [vmem:[%s2589_s4 + $0x290] sm:$0xff]  ;;  %v2038_v13 = vcombine.low %v419_v0, %v435_v1  ;;  %v405_v18 = vld [vmem:[%s2589_s4 + $0xa0] sm:$0xff] }
  0x53   : > { %v2041_v8 = vcombine.high %v420_v2, %v436_v3  ;;  %v452_v11 = vld [vmem:[%s2589_s4 + $0x218] sm:$0xff]  ;;  %v2040_v14 = vcombine.low %v420_v2, %v436_v3  ;;  %v2071_v15 = vcombine.high %v451_v9, %v467_v10  ;;  %v390_v19 = vld [vmem:[%s2589_s4 + $0x28] sm:$0xff]  ;;  %v2070_v21 = vcombine.low %v451_v9, %v467_v10  ;;  %v421_v25 = vld [vmem:[%s2589_s4 + $0x120] sm:$0xff] }
  0x54   : > { %974 = vmatpush1.bf16.msra.mxu0 %v2034_v52  ;;  %1015 = vmatpush1.bf16.msra.mxu1 %v2036_v53  ;;  %v468_v12 = vld [vmem:[%s2589_s4 + $0x298] sm:$0xff]  ;;  %v406_v20 = vld [vmem:[%s2589_s4 + $0xa8] sm:$0xff]  ;;  %v2011_v23 = vcombine.high %v389_v17, %v405_v18  ;;  %v437_v26 = vld [vmem:[%s2589_s4 + $0x1a0] sm:$0xff]  ;;  %v2010_v29 = vcombine.low %v389_v17, %v405_v18 }
  0x55   : > { %975 = vmatprep.subr.bf16.mxu0 %v2067_v54  ;;  %1016 = vmatprep.subr.bf16.mxu1 %v2069_v55  ;;  %v2073_v16 = vcombine.high %v452_v11, %v468_v12  ;;  %v2072_v22 = vcombine.low %v452_v11, %v468_v12  ;;  %v2013_v24 = vcombine.high %v390_v19, %v406_v20  ;;  %v422_v27 = vld [vmem:[%s2589_s4 + $0x128] sm:$0xff]  ;;  %v453_v34 = vld [vmem:[%s2589_s4 + $0x220] sm:$0xff]  ;;  %v391_v42 = vld [vmem:[%s2589_s4 + $0x30] sm:$0xff] }
  0x56   : > { %v438_v28 = vld [vmem:[%s2589_s4 + $0x1a8] sm:$0xff]  ;;  %v2012_v30 = vcombine.low %v390_v19, %v406_v20  ;;  %v2043_v31 = vcombine.high %v421_v25, %v437_v26  ;;  %v469_v35 = vld [vmem:[%s2589_s4 + $0x2a0] sm:$0xff]  ;;  %v2042_v38 = vcombine.low %v421_v25, %v437_v26  ;;  %v407_v43 = vld [vmem:[%s2589_s4 + $0xb0] sm:$0xff] }
  0x57   : > { %v2045_v33 = vcombine.high %v422_v27, %v438_v28  ;;  %v454_v36 = vld [vmem:[%s2589_s4 + $0x228] sm:$0xff]  ;;  %v2044_v39 = vcombine.low %v422_v27, %v438_v28  ;;  %v2075_v40 = vcombine.high %v453_v34, %v469_v35  ;;  %v392_v44 = vld [vmem:[%s2589_s4 + $0x38] sm:$0xff]  ;;  %v2074_v46 = vcombine.low %v453_v34, %v469_v35  ;;  %v423_v50 = vld [vmem:[%s2589_s4 + $0x130] sm:$0xff] }
  0x58   : > { %976 = vmatpush1.bf16.msra.mxu0 %v2066_v60  ;;  %1017 = vmatpush1.bf16.msra.mxu1 %v2068_v61  ;;  %v470_v37 = vld [vmem:[%s2589_s4 + $0x2a8] sm:$0xff]  ;;  %v408_v45 = vld [vmem:[%s2589_s4 + $0xb8] sm:$0xff]  ;;  %v2015_v48 = vcombine.high %v391_v42, %v407_v43  ;;  %v439_v51 = vld [vmem:[%s2589_s4 + $0x1b0] sm:$0xff]  ;;  %v2014_v54 = vcombine.low %v391_v42, %v407_v43 }
  0x59   : > { %1053 = vmatprep.subr.bf16.mxu0 %v2007_v62  ;;  %1094 = vmatprep.subr.bf16.mxu1 %v2009_v63  ;;  %v2077_v41 = vcombine.high %v454_v36, %v470_v37  ;;  %v2076_v47 = vcombine.low %v454_v36, %v470_v37  ;;  %v2017_v49 = vcombine.high %v392_v44, %v408_v45  ;;  %v424_v52 = vld [vmem:[%s2589_s4 + $0x138] sm:$0xff]  ;;  %v455_v58 = vld [vmem:[%s2589_s4 + $0x230] sm:$0xff]  ;;  %v393_v2 = vld [vmem:[%s2589_s4 + $0x40] sm:$0xff] }
  0x5a   : > { %v440_v53 = vld [vmem:[%s2589_s4 + $0x1b8] sm:$0xff]  ;;  %v2016_v55 = vcombine.low %v392_v44, %v408_v45  ;;  %v2047_v56 = vcombine.high %v423_v50, %v439_v51  ;;  %v471_v59 = vld [vmem:[%s2589_s4 + $0x2b0] sm:$0xff]  ;;  %v2046_v62 = vcombine.low %v423_v50, %v439_v51  ;;  %v409_v3 = vld [vmem:[%s2589_s4 + $0xc0] sm:$0xff] }
  0x5b   : > { %2098 = vmatmul.mubr.msk.bf16.vlgmr.msra.gmra.mrb[0].mxu0 %vm967_vm0, %v2614_v4  ;;  %2099 = vmatmul.mubr.msk.bf16.vlgmr.msra.gmra.mrb[0].mxu1 %vm967_vm0, %v2614_v4  ;;  %v2049_v57 = vcombine.high %v424_v52, %v440_v53  ;;  %v456_v60 = vld [vmem:[%s2589_s4 + $0x238] sm:$0xff]  ;;  %v2048_v63 = vcombine.low %v424_v52, %v440_v53  ;;  %v2079_v0 = vcombine.high %v455_v58, %v471_v59  ;;  %v425_v11 = vld [vmem:[%s2589_s4 + $0x140] sm:$0xff]  ;;  %v395_v27 = vld [vmem:[%s2589_s4 + $0x50] sm:$0xff] }
  0x5c   : > { %1054 = vmatpush1.bf16.msra.mxu0 %v2006_v5  ;;  %1095 = vmatpush1.bf16.msra.mxu1 %v2008_v6  ;;  %v472_v61 = vld [vmem:[%s2589_s4 + $0x2b8] sm:$0xff]  ;;  %v394_v5 = vld [vmem:[%s2589_s4 + $0x48] sm:$0xff]  ;;  %v2019_v9 = vcombine.high %v393_v2, %v409_v3  ;;  %v441_v12 = vld [vmem:[%s2589_s4 + $0x1c0] sm:$0xff] }
  0x5d   : > { %1055 = vmatprep.subr.bf16.mxu0 %v2039_v7  ;;  %1096 = vmatprep.subr.bf16.mxu1 %v2041_v8  ;;  %v2081_v1 = vcombine.high %v456_v60, %v472_v61  ;;  %v410_v6 = vld [vmem:[%s2589_s4 + $0xc8] sm:$0xff]  ;;  %v2078_v7 = vcombine.low %v455_v58, %v471_v59  ;;  %v2080_v8 = vcombine.low %v456_v60, %v472_v61  ;;  %v457_v19 = vld [vmem:[%s2589_s4 + $0x240] sm:$0xff]  ;;  %v411_v28 = vld [vmem:[%s2589_s4 + $0xd0] sm:$0xff] }
  0x5e   : > { %1085 = vmatprep.mubr.bf16.mxu0 %v2329_v32  ;;  %1126 = vmatprep.mubr.bf16.mxu1 %v2329_v32  ;;  %v2021_v10 = vcombine.high %v394_v5, %v410_v6  ;;  %v2051_v17 = vcombine.high %v425_v11, %v441_v12  ;;  %v473_v20 = vld [vmem:[%s2589_s4 + $0x2c0] sm:$0xff]  ;;  %v2023_v34 = vcombine.high %v395_v27, %v411_v28  ;;  %v427_v36 = vld [vmem:[%s2589_s4 + $0x150] sm:$0xff] }
  0x5f   : > { %v2083_v25 = vcombine.high %v457_v19, %v473_v20  ;;  %v443_v37 = vld [vmem:[%s2589_s4 + $0x1d0] sm:$0xff]  ;;  %v397_v52 = vld [vmem:[%s2589_s4 + $0x60] sm:$0xff] }
  0x60   : > { %1056 = vmatpush1.bf16.msra.mxu0 %v2038_v13  ;;  %1097 = vmatpush1.bf16.msra.mxu1 %v2040_v14  ;;  %v426_v13 = vld [vmem:[%s2589_s4 + $0x148] sm:$0xff]  ;;  %v2055_v42 = vcombine.high %v427_v36, %v443_v37  ;;  %v459_v44 = vld [vmem:[%s2589_s4 + $0x250] sm:$0xff]  ;;  %v413_v53 = vld [vmem:[%s2589_s4 + $0xe0] sm:$0xff] }
  0x61   : > { %1057 = vmatprep.subr.bf16.mxu0 %v2071_v15  ;;  %1098 = vmatprep.subr.bf16.mxu1 %v2073_v16  ;;  %v442_v14 = vld [vmem:[%s2589_s4 + $0x1c8] sm:$0xff]  ;;  %v2018_v15 = vcombine.low %v393_v2, %v409_v3  ;;  %v2020_v16 = vcombine.low %v394_v5, %v410_v6  ;;  %v475_v45 = vld [vmem:[%s2589_s4 + $0x2d0] sm:$0xff]  ;;  %v2027_v58 = vcombine.high %v397_v52, %v413_v53  ;;  %v429_v60 = vld [vmem:[%s2589_s4 + $0x160] sm:$0xff] }
  0x62   : > { %v2053_v18 = vcombine.high %v426_v13, %v442_v14  ;;  %v2087_v50 = vcombine.high %v459_v44, %v475_v45  ;;  %v445_v61 = vld [vmem:[%s2589_s4 + $0x1e0] sm:$0xff] }
  0x63   : > { %v2059_v2 = vcombine.high %v429_v60, %v445_v61  ;;  %v461_v5 = vld [vmem:[%s2589_s4 + $0x260] sm:$0xff] }
  0x64   : > { %1058 = vmatpush1.bf16.msra.mxu0 %v2070_v21  ;;  %1099 = vmatpush1.bf16.msra.mxu1 %v2072_v22  ;;  %v458_v21 = vld [vmem:[%s2589_s4 + $0x248] sm:$0xff]  ;;  %v477_v6 = vld [vmem:[%s2589_s4 + $0x2e0] sm:$0xff] }
  0x65   : > { %1135 = vmatprep.subr.bf16.mxu0 %v2011_v23  ;;  %1176 = vmatprep.subr.bf16.mxu1 %v2013_v24  ;;  %v474_v22 = vld [vmem:[%s2589_s4 + $0x2c8] sm:$0xff]  ;;  %v2050_v23 = vcombine.low %v425_v11, %v441_v12  ;;  %v2052_v24 = vcombine.low %v426_v13, %v442_v14  ;;  %v2091_v11 = vcombine.high %v461_v5, %v477_v6  ;;  %v399_v13 = vld [vmem:[%s2589_s4 + $0x70] sm:$0xff] }
  0x66   : > { %v2085_v26 = vcombine.high %v458_v21, %v474_v22  ;;  %v415_v14 = vld [vmem:[%s2589_s4 + $0xf0] sm:$0xff] }
  0x67   : > { %2100 = vmatmul.mubr.msk.bf16.vlgmr.msra.gmra.mrb[4].mxu0 %vm967_vm0, %v2614_v4  ;;  %2101 = vmatmul.mubr.msk.bf16.vlgmr.msra.gmra.mrb[4].mxu1 %vm967_vm0, %v2614_v4 }
  0x68   : > { %1136 = vmatpush1.bf16.msra.mxu0 %v2010_v29  ;;  %1177 = vmatpush1.bf16.msra.mxu1 %v2012_v30  ;;  %v396_v29 = vld [vmem:[%s2589_s4 + $0x58] sm:$0xff] }
  0x69   : > { %1137 = vmatprep.subr.bf16.mxu0 %v2043_v31  ;;  %1178 = vmatprep.subr.bf16.mxu1 %v2045_v33  ;;  %v412_v30 = vld [vmem:[%s2589_s4 + $0xd8] sm:$0xff]  ;;  %v2082_v31 = vcombine.low %v457_v19, %v473_v20  ;;  %v2084_v33 = vcombine.low %v458_v21, %v474_v22  ;;  %v2031_v19 = vcombine.high %v399_v13, %v415_v14  ;;  %v431_v21 = vld [vmem:[%s2589_s4 + $0x170] sm:$0xff] }
  0x6a   : > { %1167 = vmatprep.mubr.bf16.mxu0 %v2329_v32  ;;  %1208 = vmatprep.mubr.bf16.mxu1 %v2329_v32  ;;  %v2025_v35 = vcombine.high %v396_v29, %v412_v30  ;;  %v447_v22 = vld [vmem:[%s2589_s4 + $0x1f0] sm:$0xff] }
  0x6c   : > { %1138 = vmatpush1.bf16.msra.mxu0 %v2042_v38  ;;  %1179 = vmatpush1.bf16.msra.mxu1 %v2044_v39  ;;  %v428_v38 = vld [vmem:[%s2589_s4 + $0x158] sm:$0xff] }
  0x6d   : > { %1139 = vmatprep.subr.bf16.mxu0 %v2075_v40  ;;  %1180 = vmatprep.subr.bf16.mxu1 %v2077_v41  ;;  %v444_v39 = vld [vmem:[%s2589_s4 + $0x1d8] sm:$0xff]  ;;  %v2022_v40 = vcombine.low %v395_v27, %v411_v28  ;;  %v2024_v41 = vcombine.low %v396_v29, %v412_v30  ;;  %v2063_v27 = vcombine.high %v431_v21, %v447_v22  ;;  %v463_v29 = vld [vmem:[%s2589_s4 + $0x270] sm:$0xff] }
  0x6e   : > { %v2057_v43 = vcombine.high %v428_v38, %v444_v39  ;;  %v479_v30 = vld [vmem:[%s2589_s4 + $0x2f0] sm:$0xff] }
  0x70   : > { %1140 = vmatpush1.bf16.msra.mxu0 %v2074_v46  ;;  %1181 = vmatpush1.bf16.msra.mxu1 %v2076_v47  ;;  %v460_v46 = vld [vmem:[%s2589_s4 + $0x258] sm:$0xff] }
  0x71   : > { %1217 = vmatprep.subr.bf16.mxu0 %v2015_v48  ;;  %1258 = vmatprep.subr.bf16.mxu1 %v2017_v49  ;;  %v476_v47 = vld [vmem:[%s2589_s4 + $0x2d8] sm:$0xff]  ;;  %v2054_v48 = vcombine.low %v427_v36, %v443_v37  ;;  %v2056_v49 = vcombine.low %v428_v38, %v444_v39  ;;  %v2095_v36 = vcombine.high %v463_v29, %v479_v30 }
  0x72   : > { %v2089_v51 = vcombine.high %v460_v46, %v476_v47  ;;  %v2094_v38 = vcombine.low %v463_v29, %v479_v30 }
  0x73   : > { %2102 = vmatmul.mubr.msk.bf16.vlgmr.msra.gmra.mrb[8].mxu0 %vm967_vm0, %v2614_v4  ;;  %2103 = vmatmul.mubr.msk.bf16.vlgmr.msra.gmra.mrb[8].mxu1 %vm967_vm0, %v2614_v4 }
  0x74   : > { %1218 = vmatpush1.bf16.msra.mxu0 %v2014_v54  ;;  %1259 = vmatpush1.bf16.msra.mxu1 %v2016_v55  ;;  %v398_v54 = vld [vmem:[%s2589_s4 + $0x68] sm:$0xff] }
  0x75   : > { %1219 = vmatprep.subr.bf16.mxu0 %v2047_v56  ;;  %1260 = vmatprep.subr.bf16.mxu1 %v2049_v57  ;;  %v414_v55 = vld [vmem:[%s2589_s4 + $0xe8] sm:$0xff]  ;;  %v2086_v56 = vcombine.low %v459_v44, %v475_v45  ;;  %v2088_v57 = vcombine.low %v460_v46, %v476_v47 }
  0x76   : > { %1249 = vmatprep.mubr.bf16.mxu0 %v2329_v32  ;;  %1290 = vmatprep.mubr.bf16.mxu1 %v2329_v32  ;;  %v2029_v59 = vcombine.high %v398_v54, %v414_v55 }
  0x78   : > { %1220 = vmatpush1.bf16.msra.mxu0 %v2046_v62  ;;  %1261 = vmatpush1.bf16.msra.mxu1 %v2048_v63  ;;  %v430_v62 = vld [vmem:[%s2589_s4 + $0x168] sm:$0xff] }
  0x79   : > { %1221 = vmatprep.subr.bf16.mxu0 %v2079_v0  ;;  %1262 = vmatprep.subr.bf16.mxu1 %v2081_v1  ;;  %v446_v63 = vld [vmem:[%s2589_s4 + $0x1e8] sm:$0xff]  ;;  %v2026_v0 = vcombine.low %v397_v52, %v413_v53  ;;  %v2028_v1 = vcombine.low %v398_v54, %v414_v55 }
  0x7a   : > { %v2061_v3 = vcombine.high %v430_v62, %v446_v63 }
  0x7c   : > { %1222 = vmatpush1.bf16.msra.mxu0 %v2078_v7  ;;  %1263 = vmatpush1.bf16.msra.mxu1 %v2080_v8  ;;  %v462_v7 = vld [vmem:[%s2589_s4 + $0x268] sm:$0xff] }
  0x7d   : > { %1299 = vmatprep.subr.bf16.mxu0 %v2019_v9  ;;  %1340 = vmatprep.subr.bf16.mxu1 %v2021_v10  ;;  %v478_v8 = vld [vmem:[%s2589_s4 + $0x2e8] sm:$0xff]  ;;  %v2058_v9 = vcombine.low %v429_v60, %v445_v61  ;;  %v2060_v10 = vcombine.low %v430_v62, %v446_v63 }
  0x7e   : > { %v2093_v12 = vcombine.high %v462_v7, %v478_v8 }
  0x7f   : > { %2104 = vmatmul.mubr.msk.bf16.vlgmr.msra.gmra.mrb[12].mxu0 %vm967_vm0, %v2614_v4  ;;  %2105 = vmatmul.mubr.msk.bf16.vlgmr.msra.gmra.mrb[12].mxu1 %vm967_vm0, %v2614_v4 }
  0x80   : > { %1300 = vmatpush1.bf16.msra.mxu0 %v2018_v15  ;;  %1341 = vmatpush1.bf16.msra.mxu1 %v2020_v16  ;;  %v400_v15 = vld [vmem:[%s2589_s4 + $0x78] sm:$0xff] }
  0x81   : > { %1301 = vmatprep.subr.bf16.mxu0 %v2051_v17  ;;  %1342 = vmatprep.subr.bf16.mxu1 %v2053_v18  ;;  %v416_v16 = vld [vmem:[%s2589_s4 + $0xf8] sm:$0xff]  ;;  %v2090_v17 = vcombine.low %v461_v5, %v477_v6  ;;  %v2092_v18 = vcombine.low %v462_v7, %v478_v8 }
  0x82   : > { %1331 = vmatprep.mubr.bf16.mxu0 %v2329_v32  ;;  %1372 = vmatprep.mubr.bf16.mxu1 %v2329_v32  ;;  %v2033_v20 = vcombine.high %v400_v15, %v416_v16 }
  0x84   : > { %1302 = vmatpush1.bf16.msra.mxu0 %v2050_v23  ;;  %1343 = vmatpush1.bf16.msra.mxu1 %v2052_v24  ;;  %v432_v23 = vld [vmem:[%s2589_s4 + $0x178] sm:$0xff] }
  0x85   : > { %1303 = vmatprep.subr.bf16.mxu0 %v2083_v25  ;;  %1344 = vmatprep.subr.bf16.mxu1 %v2085_v26  ;;  %v448_v24 = vld [vmem:[%s2589_s4 + $0x1f8] sm:$0xff]  ;;  %v2030_v25 = vcombine.low %v399_v13, %v415_v14  ;;  %v2032_v26 = vcombine.low %v400_v15, %v416_v16 }
  0x86   : > { %v2065_v28 = vcombine.high %v432_v23, %v448_v24 }
  0x88   : > { %1304 = vmatpush1.bf16.msra.mxu0 %v2082_v31  ;;  %1345 = vmatpush1.bf16.msra.mxu1 %v2084_v33  ;;  %v464_v31 = vld [vmem:[%s2589_s4 + $0x278] sm:$0xff] }
  0x89   : > { %1381 = vmatprep.subr.bf16.mxu0 %v2023_v34  ;;  %1422 = vmatprep.subr.bf16.mxu1 %v2025_v35  ;;  %v480_v33 = vld [vmem:[%s2589_s4 + $0x2f8] sm:$0xff]  ;;  %v2062_v34 = vcombine.low %v431_v21, %v447_v22  ;;  %v2064_v35 = vcombine.low %v432_v23, %v448_v24 }
  0x8a   : > { %v2097_v37 = vcombine.high %v464_v31, %v480_v33  ;;  %v2096_v39 = vcombine.low %v464_v31, %v480_v33 }
  0x8b   : > { %2106 = vmatmul.mubr.msk.bf16.vlgmr.msra.gmra.mrb[16].mxu0 %vm967_vm0, %v2614_v4  ;;  %2107 = vmatmul.mubr.msk.bf16.vlgmr.msra.gmra.mrb[16].mxu1 %vm967_vm0, %v2614_v4 }
  0x8c   : > { %1382 = vmatpush1.bf16.msra.mxu0 %v2022_v40  ;;  %1423 = vmatpush1.bf16.msra.mxu1 %v2024_v41 }
  0x8d   : > { %1383 = vmatprep.subr.bf16.mxu0 %v2055_v42  ;;  %1424 = vmatprep.subr.bf16.mxu1 %v2057_v43 }
  0x8e   : > { %1413 = vmatprep.mubr.bf16.mxu0 %v2329_v32  ;;  %1454 = vmatprep.mubr.bf16.mxu1 %v2329_v32 }
  0x90   : > { %1384 = vmatpush1.bf16.msra.mxu0 %v2054_v48  ;;  %1425 = vmatpush1.bf16.msra.mxu1 %v2056_v49 }
  0x91   : > { %1385 = vmatprep.subr.bf16.mxu0 %v2087_v50  ;;  %1426 = vmatprep.subr.bf16.mxu1 %v2089_v51 }
  0x94   : > { %1386 = vmatpush1.bf16.msra.mxu0 %v2086_v56  ;;  %1427 = vmatpush1.bf16.msra.mxu1 %v2088_v57 }
  0x95   : > { %1463 = vmatprep.subr.bf16.mxu0 %v2027_v58  ;;  %1504 = vmatprep.subr.bf16.mxu1 %v2029_v59 }
  0x97   : > { %2108 = vmatmul.mubr.msk.bf16.vlgmr.msra.gmra.mrb[20].mxu0 %vm967_vm0, %v2614_v4  ;;  %2109 = vmatmul.mubr.msk.bf16.vlgmr.msra.gmra.mrb[20].mxu1 %vm967_vm0, %v2614_v4 }
  0x98   : > { %1464 = vmatpush1.bf16.msra.mxu0 %v2026_v0  ;;  %1505 = vmatpush1.bf16.msra.mxu1 %v2028_v1 }
  0x99   : > { %1465 = vmatprep.subr.bf16.mxu0 %v2059_v2  ;;  %1506 = vmatprep.subr.bf16.mxu1 %v2061_v3 }
  0x9a   : > { %1495 = vmatprep.mubr.bf16.mxu0 %v2329_v32  ;;  %1536 = vmatprep.mubr.bf16.mxu1 %v2329_v32 }
  0x9c   : > { %1466 = vmatpush1.bf16.msra.mxu0 %v2058_v9  ;;  %1507 = vmatpush1.bf16.msra.mxu1 %v2060_v10 }
  0x9d   : > { %1467 = vmatprep.subr.bf16.mxu0 %v2091_v11  ;;  %1508 = vmatprep.subr.bf16.mxu1 %v2093_v12 }
  0xa0   : > { %1468 = vmatpush1.bf16.msra.mxu0 %v2090_v17  ;;  %1509 = vmatpush1.bf16.msra.mxu1 %v2092_v18 }
  0xa1   : > { %1545 = vmatprep.subr.bf16.mxu0 %v2031_v19  ;;  %1586 = vmatprep.subr.bf16.mxu1 %v2033_v20 }
  0xa3   : > { %2110 = vmatmul.mubr.msk.bf16.vlgmr.msra.gmra.mrb[24].mxu0 %vm967_vm0, %v2614_v4  ;;  %2111 = vmatmul.mubr.msk.bf16.vlgmr.msra.gmra.mrb[24].mxu1 %vm967_vm0, %v2614_v4 }
  0xa4   : > { %1546 = vmatpush1.bf16.msra.mxu0 %v2030_v25  ;;  %1587 = vmatpush1.bf16.msra.mxu1 %v2032_v26 }
  0xa5   : > { %1547 = vmatprep.subr.bf16.mxu0 %v2063_v27  ;;  %1588 = vmatprep.subr.bf16.mxu1 %v2065_v28 }
  0xa6   : > { %1577 = vmatprep.mubr.bf16.mxu0 %v2329_v32  ;;  %1618 = vmatprep.mubr.bf16.mxu1 %v2329_v32 }
  0xa8   : > { %1548 = vmatpush1.bf16.msra.mxu0 %v2062_v34  ;;  %1589 = vmatpush1.bf16.msra.mxu1 %v2064_v35 }
  0xa9   : > { %1549 = vmatprep.subr.bf16.mxu0 %v2095_v36  ;;  %1590 = vmatprep.subr.bf16.mxu1 %v2097_v37 }
  0xac   : > { %1550 = vmatpush1.bf16.msra.mxu0 %v2094_v38  ;;  %1591 = vmatpush1.bf16.msra.mxu1 %v2096_v39 }
  0xaf   : > { %2112 = vmatmul.mubr.msk.bf16.vlgmr.msra.gmra.mrb[28].mxu0 %vm967_vm0, %v2614_v4  ;;  %2113 = vmatmul.mubr.msk.bf16.vlgmr.msra.gmra.mrb[28].mxu1 %vm967_vm0, %v2614_v4 }
  0xc8   : > { %v2738_v40 = vpop.permute.xlu0 %484 }
 0x12e   : > { %v1005_v41 = vpop.f32.mrb[0].mxu0  ;;  %v1046_v32 = vpop.f32.mrb[0].mxu1 }
 0x12f   : > { %v2741_v42 = vadd.f32 %v1005_v41, %v2738_v40  ;;  %v1007_v43 = vpop.f32.mrb[1].mxu0  ;;  %v2744_v44 = vadd.f32 %v1046_v32, %v2738_v40  ;;  %v1048_v46 = vpop.f32.mrb[1].mxu1 }
 0x130   : > { %v2747_v45 = vadd.f32 %v1007_v43, %v2738_v40  ;;  %v1009_v47 = vpop.f32.mrb[2].mxu0  ;;  %v2751_v4 = vadd.f32 %v1048_v46, %v2738_v40  ;;  %v1050_v49 = vpop.f32.mrb[2].mxu1 }
 0x131   : > { %v2114_v48 = vmul.f32 -1.442695, %v2741_v42  ;;  %v1010_v50 = vpop.f32.mrb[3].mxu0  ;;  %v2116_v51 = vmul.f32 -1.442695, %v2744_v44  ;;  %v1051_v53 = vpop.f32.mrb[3].mxu1 }
 0x132   : > { %v2115_v52 = vmul.f32 -1.442695, %v2747_v45  ;;  %v2117_v54 = vmul.f32 -1.442695, %v2751_v4 }
 0x133   : > { %2177 = vpow2.f32 %v2114_v48 }
 0x134   : > { %2179 = vpow2.f32 %v2116_v51 }
 0x135   : > { %2181 = vpow2.f32 %v2115_v52 }
 0x136   : > { %2183 = vpow2.f32 %v2117_v54 }
 0x13a   : > { %v1087_v55 = vpop.f32.mrb[4].mxu0  ;;  %v1128_v57 = vpop.f32.mrb[4].mxu1 }
 0x13b   : > { %v2757_v56 = vadd.f32 %v1087_v55, %v2738_v40  ;;  %v1089_v58 = vpop.f32.mrb[5].mxu0  ;;  %v2760_v59 = vadd.f32 %v1128_v57, %v2738_v40  ;;  %v1130_v60 = vpop.f32.mrb[5].mxu1 }
 0x13c   : > { %v1091_v61 = vpop.f32.mrb[6].mxu0  ;;  %v2764_v0 = vadd.f32 %v1089_v58, %v2738_v40  ;;  %v1132_v1 = vpop.f32.mrb[6].mxu1  ;;  %v2767_v6 = vadd.f32 %v1130_v60, %v2738_v40 }
 0x13d   : > { %v2178_v62 = vpop.eup %2177  ;;  %v2118_v63 = vmul.f32 -1.442695, %v2757_v56  ;;  %v1092_v2 = vpop.f32.mrb[7].mxu0  ;;  %v2120_v12 = vmul.f32 -1.442695, %v2760_v59 }
 0x13e   : > { %v2180_v3 = vpop.eup %2179  ;;  %v1723_v5 = vadd.f32 1.0, %v2178_v62  ;;  %v1133_v7 = vpop.f32.mrb[7].mxu1  ;;  %v2119_v14 = vmul.f32 -1.442695, %v2764_v0  ;;  %v2121_v15 = vmul.f32 -1.442695, %v2767_v6 }
 0x13f   : > { %v2182_v8 = vpop.eup %2181  ;;  %v1725_v9 = vadd.f32 1.0, %v2180_v3  ;;  %2185 = vpow2.f32 %v2118_v63 }
 0x140   : > { %v2184_v10 = vpop.eup %2183  ;;  %2187 = vrcp.f32 %v1723_v5  ;;  %v1724_v11 = vadd.f32 1.0, %v2182_v8 }
 0x141   : > { %2189 = vrcp.f32 %v1725_v9  ;;  %v1726_v13 = vadd.f32 1.0, %v2184_v10 }
 0x142   : > { %2191 = vrcp.f32 %v1724_v11 }
 0x143   : > { %2193 = vrcp.f32 %v1726_v13 }
 0x144   : > { %2195 = vpow2.f32 %v2120_v12 }
 0x145   : > { %2197 = vpow2.f32 %v2119_v14 }
 0x146   : > { %2199 = vpow2.f32 %v2121_v15  ;;  %v1169_v16 = vpop.f32.mrb[8].mxu0  ;;  %v1210_v18 = vpop.f32.mrb[8].mxu1 }
 0x147   : > { %v2777_v17 = vadd.f32 %v1169_v16, %v2738_v40  ;;  %v1171_v19 = vpop.f32.mrb[9].mxu0  ;;  %v2780_v20 = vadd.f32 %v1210_v18, %v2738_v40  ;;  %v1212_v22 = vpop.f32.mrb[9].mxu1 }
 0x148   : > { %v2783_v21 = vadd.f32 %v1171_v19, %v2738_v40  ;;  %v1173_v23 = vpop.f32.mrb[10].mxu0  ;;  %v2787_v26 = vadd.f32 %v1212_v22, %v2738_v40  ;;  %v1214_v27 = vpop.f32.mrb[10].mxu1 }
 0x149   : > { %v2186_v24 = vpop.eup %2185  ;;  %v2122_v25 = vmul.f32 -1.442695, %v2777_v17  ;;  %v1174_v28 = vpop.f32.mrb[11].mxu0  ;;  %v2124_v31 = vmul.f32 -1.442695, %v2780_v20 }
 0x14a   : > { %v2188_v29 = vpop.eup %2187  ;;  %v1727_v30 = vadd.f32 1.0, %v2186_v24  ;;  %v2123_v33 = vmul.f32 -1.442695, %v2783_v21  ;;  %v1215_v34 = vpop.f32.mrb[11].mxu1  ;;  %v2125_v37 = vmul.f32 -1.442695, %v2787_v26 }
 0x14b   : > { %v2190_v35 = vpop.eup %2189  ;;  %v1819_v36 = vmul.f32 %v2188_v29, %v2741_v42  ;;  %2201 = vpow2.f32 %v2122_v25 }
 0x14c   : > { %v2192_v38 = vpop.eup %2191  ;;  %v1821_v39 = vmul.f32 %v2190_v35, %v2744_v44  ;;  %2203 = vrcp.f32 %v1727_v30 }
 0x14d   : > { %v2194_v41 = vpop.eup %2193  ;;  %v1820_v32 = vmul.f32 %v2192_v38, %v2747_v45  ;;  %2205 = vpow2.f32 %v2124_v31 }
 0x14e   : > { %v2196_v43 = vpop.eup %2195  ;;  %v1822_v42 = vmul.f32 %v2194_v41, %v2751_v4  ;;  %2207 = vpow2.f32 %v2123_v33 }
 0x14f   : > { %v2198_v46 = vpop.eup %2197  ;;  %v1883_v47 = vcombine.low %v1819_v36, %v1820_v32  ;;  %v1729_v48 = vadd.f32 1.0, %v2196_v43  ;;  %2209 = vpow2.f32 %v2125_v37 }
 0x150   : > { %v2200_v44 = vpop.eup %2199  ;;  %v1884_v49 = vcombine.low %v1821_v39, %v1822_v42  ;;  %v1728_v50 = vadd.f32 1.0, %v2198_v46 }
 0x151   : > { %1915 = vst [vmem:[%s2799_s11] sm:$0xff] %v1883_v47  ;;  %2211 = vrcp.f32 %v1729_v48  ;;  %v1730_v45 = vadd.f32 1.0, %v2200_v44 }
 0x152   : > { %1916 = vst [vmem:[%s2799_s11 + $0x8] sm:$0xff] %v1884_v49  ;;  %2213 = vrcp.f32 %v1728_v50  ;;  %v1251_v51 = vpop.f32.mrb[12].mxu0  ;;  %v1292_v53 = vpop.f32.mrb[12].mxu1 }
 0x153   : > { %2215 = vrcp.f32 %v1730_v45  ;;  %v2805_v52 = vadd.f32 %v1251_v51, %v2738_v40  ;;  %v1253_v4 = vpop.f32.mrb[13].mxu0  ;;  %v2808_v54 = vadd.f32 %v1292_v53, %v2738_v40  ;;  %v1294_v55 = vpop.f32.mrb[13].mxu1 }
 0x154   : > { %v1255_v57 = vpop.f32.mrb[14].mxu0  ;;  %v2812_v61 = vadd.f32 %v1253_v4, %v2738_v40  ;;  %v1296_v62 = vpop.f32.mrb[14].mxu1  ;;  %v2816_v5 = vadd.f32 %v1294_v55, %v2738_v40 }
 0x155   : > { %v2202_v58 = vpop.eup %2201  ;;  %v2126_v60 = vmul.f32 -1.442695, %v2805_v52  ;;  %v1256_v63 = vpop.f32.mrb[15].mxu0  ;;  %v2128_v3 = vmul.f32 -1.442695, %v2808_v54 }
 0x156   : > { %v2204_v1 = vpop.eup %2203  ;;  %v1731_v2 = vadd.f32 1.0, %v2202_v58  ;;  %v1297_v7 = vpop.f32.mrb[15].mxu1  ;;  %v2127_v13 = vmul.f32 -1.442695, %v2812_v61  ;;  %v2129_v15 = vmul.f32 -1.442695, %v2816_v5 }
 0x157   : > { %v2206_v8 = vpop.eup %2205  ;;  %2217 = vpow2.f32 %v2126_v60  ;;  %v1823_v18 = vmul.f32 %v2204_v1, %v2757_v56 }
 0x158   : > { %v2208_v9 = vpop.eup %2207  ;;  %2219 = vrcp.f32 %v1731_v2  ;;  %v1733_v10 = vadd.f32 1.0, %v2206_v8 }
 0x159   : > { %v2210_v11 = vpop.eup %2209  ;;  %v1732_v12 = vadd.f32 1.0, %v2208_v9  ;;  %2221 = vpow2.f32 %v2128_v3 }
 0x15a   : > { %2223 = vrcp.f32 %v1733_v10  ;;  %v1734_v14 = vadd.f32 1.0, %v2210_v11 }
 0x15b   : > { %v2212_v16 = vpop.eup %2211  ;;  %2225 = vrcp.f32 %v1732_v12 }
 0x15c   : > { %v2214_v19 = vpop.eup %2213  ;;  %v1825_v22 = vmul.f32 %v2212_v16, %v2760_v59  ;;  %2227 = vrcp.f32 %v1734_v14 }
 0x15d   : > { %v2216_v23 = vpop.eup %2215  ;;  %v1824_v24 = vmul.f32 %v2214_v19, %v2764_v0  ;;  %2229 = vpow2.f32 %v2127_v13 }
 0x15e   : > { %v1826_v25 = vmul.f32 %v2216_v23, %v2767_v6  ;;  %2231 = vpow2.f32 %v2129_v15  ;;  %v1333_v27 = vpop.f32.mrb[16].mxu0  ;;  %v1374_v56 = vpop.f32.mrb[16].mxu1 }
 0x15f   : > { %v1885_v28 = vcombine.low %v1823_v18, %v1824_v24  ;;  %v2825_v29 = vadd.f32 %v1333_v27, %v2738_v40  ;;  %v1335_v30 = vpop.f32.mrb[17].mxu0  ;;  %v2828_v59 = vadd.f32 %v1374_v56, %v2738_v40  ;;  %v1376_v0 = vpop.f32.mrb[17].mxu1 }
 0x160   : > { %v1886_v31 = vcombine.low %v1825_v22, %v1826_v25  ;;  %v2831_v33 = vadd.f32 %v1335_v30, %v2738_v40  ;;  %v1337_v34 = vpop.f32.mrb[18].mxu0  ;;  %v2836_v36 = vadd.f32 %v1376_v0, %v2738_v40  ;;  %v1378_v37 = vpop.f32.mrb[18].mxu1 }
 0x161   : > { %v2218_v35 = vpop.eup %2217  ;;  %1917 = vst [vmem:[%s2799_s11 + $0x10] sm:$0xff] %v1885_v28  ;;  %v2130_v6 = vmul.f32 -1.442695, %v2825_v29  ;;  %v1338_v38 = vpop.f32.mrb[19].mxu0  ;;  %v2132_v32 = vmul.f32 -1.442695, %v2828_v59 }
 0x162   : > { %v2220_v39 = vpop.eup %2219  ;;  %1918 = vst [vmem:[%s2799_s11 + $0x18] sm:$0xff] %v1886_v31  ;;  %v1735_v41 = vadd.f32 1.0, %v2218_v35  ;;  %v1379_v43 = vpop.f32.mrb[19].mxu1  ;;  %v2131_v46 = vmul.f32 -1.442695, %v2831_v33 }
 0x163   : > { %v2222_v42 = vpop.eup %2221  ;;  %2233 = vpow2.f32 %v2130_v6  ;;  %v1827_v48 = vmul.f32 %v2220_v39, %v2777_v17  ;;  %v2133_v49 = vmul.f32 -1.442695, %v2836_v36 }
 0x164   : > { %v2224_v47 = vpop.eup %2223  ;;  %2235 = vrcp.f32 %v1735_v41  ;;  %v1737_v44 = vadd.f32 1.0, %v2222_v42 }
 0x165   : > { %v2226_v50 = vpop.eup %2225  ;;  %v1829_v45 = vmul.f32 %v2224_v47, %v2780_v20  ;;  %2237 = vpow2.f32 %v2132_v32 }
 0x166   : > { %v2228_v51 = vpop.eup %2227  ;;  %v1828_v53 = vmul.f32 %v2226_v50, %v2783_v21  ;;  %2239 = vrcp.f32 %v1737_v44 }
 0x167   : > { %v2230_v4 = vpop.eup %2229  ;;  %v1830_v55 = vmul.f32 %v2228_v51, %v2787_v26  ;;  %2241 = vpow2.f32 %v2131_v46 }
 0x168   : > { %v2232_v57 = vpop.eup %2231  ;;  %v1887_v17 = vcombine.low %v1827_v48, %v1828_v53  ;;  %v1736_v58 = vadd.f32 1.0, %v2230_v4  ;;  %2243 = vpow2.f32 %v2133_v49 }
 0x169   : > { %v1888_v60 = vcombine.low %v1829_v45, %v1830_v55  ;;  %v1738_v62 = vadd.f32 1.0, %v2232_v57 }
 0x16a   : > { %1919 = vst [vmem:[%s2799_s11 + $0x20] sm:$0xff] %v1887_v17  ;;  %2245 = vrcp.f32 %v1736_v58  ;;  %v1415_v63 = vpop.f32.mrb[20].mxu0  ;;  %v1456_v21 = vpop.f32.mrb[20].mxu1 }
 0x16b   : > { %1920 = vst [vmem:[%s2799_s11 + $0x28] sm:$0xff] %v1888_v60  ;;  %2247 = vrcp.f32 %v1738_v62  ;;  %v2849_v20 = vadd.f32 %v1415_v63, %v2738_v40  ;;  %v1417_v1 = vpop.f32.mrb[21].mxu0  ;;  %v2852_v2 = vadd.f32 %v1456_v21, %v2738_v40  ;;  %v1458_v3 = vpop.f32.mrb[21].mxu1 }
 0x16c   : > { %v2855_v26 = vadd.f32 %v1417_v1, %v2738_v40  ;;  %v1419_v7 = vpop.f32.mrb[22].mxu0  ;;  %v1460_v10 = vpop.f32.mrb[22].mxu1  ;;  %v2860_v15 = vadd.f32 %v1458_v3, %v2738_v40 }
 0x16d   : > { %v2234_v8 = vpop.eup %2233  ;;  %v2134_v9 = vmul.f32 -1.442695, %v2849_v20  ;;  %v1420_v11 = vpop.f32.mrb[23].mxu0  ;;  %v2136_v14 = vmul.f32 -1.442695, %v2852_v2 }
 0x16e   : > { %v2236_v12 = vpop.eup %2235  ;;  %v1739_v13 = vadd.f32 1.0, %v2234_v8  ;;  %v1461_v16 = vpop.f32.mrb[23].mxu1  ;;  %v2135_v19 = vmul.f32 -1.442695, %v2855_v26  ;;  %v2137_v28 = vmul.f32 -1.442695, %v2860_v15 }
 0x16f   : > { %v2238_v18 = vpop.eup %2237  ;;  %2249 = vpow2.f32 %v2134_v9  ;;  %v1831_v56 = vmul.f32 %v2236_v12, %v2805_v52 }
 0x170   : > { %v2240_v22 = vpop.eup %2239  ;;  %2251 = vrcp.f32 %v1739_v13  ;;  %v1741_v23 = vadd.f32 1.0, %v2238_v18 }
 0x171   : > { %v2242_v24 = vpop.eup %2241  ;;  %2253 = vpow2.f32 %v2136_v14  ;;  %v1833_v0 = vmul.f32 %v2240_v22, %v2808_v54 }
 0x172   : > { %v2244_v25 = vpop.eup %2243  ;;  %2255 = vrcp.f32 %v1741_v23  ;;  %v1740_v27 = vadd.f32 1.0, %v2242_v24 }
 0x173   : > { %v1742_v30 = vadd.f32 1.0, %v2244_v25  ;;  %2257 = vpow2.f32 %v2135_v19 }
 0x174   : > { %v2246_v31 = vpop.eup %2245  ;;  %2259 = vrcp.f32 %v1740_v27 }
 0x175   : > { %v2248_v34 = vpop.eup %2247  ;;  %v1832_v35 = vmul.f32 %v2246_v31, %v2812_v61  ;;  %2261 = vrcp.f32 %v1742_v30 }
 0x176   : > { %v1834_v6 = vmul.f32 %v2248_v34, %v2816_v5  ;;  %2263 = vpow2.f32 %v2137_v28  ;;  %v1497_v37 = vpop.f32.mrb[24].mxu0  ;;  %v1538_v52 = vpop.f32.mrb[24].mxu1 }
 0x177   : > { %v1889_v38 = vcombine.low %v1831_v56, %v1832_v35  ;;  %v2869_v39 = vadd.f32 %v1497_v37, %v2738_v40  ;;  %v1499_v41 = vpop.f32.mrb[25].mxu0  ;;  %v2872_v54 = vadd.f32 %v1538_v52, %v2738_v40  ;;  %v1540_v61 = vpop.f32.mrb[25].mxu1 }
 0x178   : > { %v1890_v32 = vcombine.low %v1833_v0, %v1834_v6  ;;  %v2875_v43 = vadd.f32 %v1499_v41, %v2738_v40  ;;  %v1501_v42 = vpop.f32.mrb[26].mxu0  ;;  %v2880_v47 = vadd.f32 %v1540_v61, %v2738_v40  ;;  %v1542_v48 = vpop.f32.mrb[26].mxu1 }
 0x179   : > { %v2250_v46 = vpop.eup %2249  ;;  %1921 = vst [vmem:[%s2799_s11 + $0x30] sm:$0xff] %v1889_v38  ;;  %v2138_v5 = vmul.f32 -1.442695, %v2869_v39  ;;  %v1502_v44 = vpop.f32.mrb[27].mxu0  ;;  %v2140_v45 = vmul.f32 -1.442695, %v2872_v54 }
 0x17a   : > { %v2252_v49 = vpop.eup %2251  ;;  %1922 = vst [vmem:[%s2799_s11 + $0x38] sm:$0xff] %v1890_v32  ;;  %v1743_v50 = vadd.f32 1.0, %v2250_v46  ;;  %v1543_v51 = vpop.f32.mrb[27].mxu1  ;;  %v2139_v4 = vmul.f32 -1.442695, %v2875_v43 }
 0x17b   : > { %v2254_v53 = vpop.eup %2253  ;;  %2265 = vpow2.f32 %v2138_v5  ;;  %v1835_v58 = vmul.f32 %v2252_v49, %v2825_v29  ;;  %v2141_v60 = vmul.f32 -1.442695, %v2880_v47 }
 0x17c   : > { %v2256_v55 = vpop.eup %2255  ;;  %2267 = vrcp.f32 %v1743_v50  ;;  %v1745_v57 = vadd.f32 1.0, %v2254_v53 }
 0x17d   : > { %v2258_v17 = vpop.eup %2257  ;;  %2269 = vpow2.f32 %v2140_v45  ;;  %v1837_v63 = vmul.f32 %v2256_v55, %v2828_v59 }
 0x17e   : > { %v2260_v62 = vpop.eup %2259  ;;  %2271 = vrcp.f32 %v1745_v57  ;;  %v1744_v21 = vadd.f32 1.0, %v2258_v17 }
 0x17f   : > { %v2262_v1 = vpop.eup %2261  ;;  %v1836_v3 = vmul.f32 %v2260_v62, %v2831_v33  ;;  %2273 = vpow2.f32 %v2139_v4 }
 0x180   : > { %v2264_v7 = vpop.eup %2263  ;;  %v1838_v8 = vmul.f32 %v2262_v1, %v2836_v36  ;;  %2275 = vrcp.f32 %v1744_v21 }
 0x181   : > { %v1891_v9 = vcombine.low %v1835_v58, %v1836_v3  ;;  %v1746_v29 = vadd.f32 1.0, %v2264_v7  ;;  %2277 = vpow2.f32 %v2141_v60 }
 0x182   : > { %v1892_v10 = vcombine.low %v1837_v63, %v1838_v8  ;;  %v1579_v11 = vpop.f32.mrb[28].mxu0  ;;  %v1620_v12 = vpop.f32.mrb[28].mxu1 }
 0x183   : > { %1923 = vst [vmem:[%s2799_s11 + $0x40] sm:$0xff] %v1891_v9  ;;  %2279 = vrcp.f32 %v1746_v29  ;;  %v2892_v59 = vadd.f32 %v1579_v11, %v2738_v40  ;;  %v1581_v13 = vpop.f32.mrb[29].mxu0  ;;  %v2896_v33 = vadd.f32 %v1620_v12, %v2738_v40  ;;  %v1622_v36 = vpop.f32.mrb[29].mxu1 }
 0x184   : > { %1924 = vst [vmem:[%s2799_s11 + $0x48] sm:$0xff] %v1892_v10  ;;  %v2899_v14 = vadd.f32 %v1581_v13, %v2738_v40  ;;  %v1583_v16 = vpop.f32.mrb[30].mxu0  ;;  %v2903_v22 = vadd.f32 %v1622_v36, %v2738_v40  ;;  %v1624_v23 = vpop.f32.mrb[30].mxu1 }
 0x185   : > { %v2266_v18 = vpop.eup %2265  ;;  %v2142_v19 = vmul.f32 -1.442695, %v2892_v59  ;;  %v1584_v24 = vpop.f32.mrb[31].mxu0  ;;  %v2144_v28 = vmul.f32 -1.442695, %v2896_v33 }
 0x186   : > { %v2268_v25 = vpop.eup %2267  ;;  %v1747_v27 = vadd.f32 1.0, %v2266_v18  ;;  %v1625_v56 = vpop.f32.mrb[31].mxu1  ;;  %v2143_v31 = vmul.f32 -1.442695, %v2899_v14  ;;  %v2145_v40 = vmul.f32 -1.442695, %v2903_v22 }
 0x187   : > { %v2270_v30 = vpop.eup %2269  ;;  %2281 = vpow2.f32 %v2142_v19  ;;  %v1839_v6 = vmul.f32 %v2268_v25, %v2849_v20 }
 0x188   : > { %v2272_v0 = vpop.eup %2271  ;;  %2283 = vrcp.f32 %v1747_v27  ;;  %v1749_v34 = vadd.f32 1.0, %v2270_v30 }
 0x189   : > { %v2274_v35 = vpop.eup %2273  ;;  %2285 = vpow2.f32 %v2144_v28  ;;  %v1841_v32 = vmul.f32 %v2272_v0, %v2852_v2 }
 0x18a   : > { %v2276_v37 = vpop.eup %2275  ;;  %2287 = vrcp.f32 %v1749_v34  ;;  %v1748_v38 = vadd.f32 1.0, %v2274_v35 }
 0x18b   : > { %v2278_v52 = vpop.eup %2277  ;;  %v1840_v41 = vmul.f32 %v2276_v37, %v2855_v26  ;;  %2289 = vpow2.f32 %v2143_v31 }
 0x18c   : > { %2291 = vrcp.f32 %v1748_v38  ;;  %v1750_v61 = vadd.f32 1.0, %v2278_v52 }
 0x18d   : > { %v2280_v42 = vpop.eup %2279  ;;  %v1893_v46 = vcombine.low %v1839_v6, %v1840_v41  ;;  %2293 = vpow2.f32 %v2145_v40 }
 0x18e   : > { %v1842_v20 = vmul.f32 %v2280_v42, %v2860_v15  ;;  %2295 = vrcp.f32 %v1750_v61 }
 0x18f   : > { %1925 = vst [vmem:[%s2799_s11 + $0x50] sm:$0xff] %v1893_v46 }
 0x190   : > { %v1894_v5 = vcombine.low %v1841_v32, %v1842_v20 }
 0x191   : > { %v2282_v48 = vpop.eup %2281 }
 0x192   : > { %v2284_v44 = vpop.eup %2283  ;;  %1926 = vst [vmem:[%s2799_s11 + $0x58] sm:$0xff] %v1894_v5  ;;  %v1751_v49 = vadd.f32 1.0, %v2282_v48 }
 0x193   : > { %v2286_v50 = vpop.eup %2285  ;;  %v1843_v51 = vmul.f32 %v2284_v44, %v2869_v39 }
 0x194   : > { %v2288_v45 = vpop.eup %2287  ;;  %2297 = vrcp.f32 %v1751_v49  ;;  %v1753_v26 = vadd.f32 1.0, %v2286_v50 }
 0x195   : > { %v2290_v2 = vpop.eup %2289  ;;  %v1845_v55 = vmul.f32 %v2288_v45, %v2872_v54 }
 0x196   : > { %v2292_v53 = vpop.eup %2291  ;;  %2299 = vrcp.f32 %v1753_v26  ;;  %v1752_v4 = vadd.f32 1.0, %v2290_v2 }
 0x197   : > { %v2294_v15 = vpop.eup %2293  ;;  %v1844_v57 = vmul.f32 %v2292_v53, %v2875_v43 }
 0x198   : > { %v2296_v17 = vpop.eup %2295  ;;  %2301 = vrcp.f32 %v1752_v4  ;;  %v1754_v58 = vadd.f32 1.0, %v2294_v15 }
 0x199   : > { %v1895_v60 = vcombine.low %v1843_v51, %v1844_v57  ;;  %v1846_v62 = vmul.f32 %v2296_v17, %v2880_v47 }
 0x19a   : > { %2303 = vrcp.f32 %v1754_v58 }
 0x19b   : > { %1927 = vst [vmem:[%s2799_s11 + $0x60] sm:$0xff] %v1895_v60  ;;  %v1896_v63 = vcombine.low %v1845_v55, %v1846_v62 }
 0x19d   : > { %1928 = vst [vmem:[%s2799_s11 + $0x68] sm:$0xff] %v1896_v63 }
 0x19e   : > { %v2298_v39 = vpop.eup %2297 }
 0x19f   : > { %v1847_v1 = vmul.f32 %v2298_v39, %v2892_v59 }
 0x1a0   : > { %v2300_v21 = vpop.eup %2299 }
 0x1a1   : > { %v1849_v54 = vmul.f32 %v2300_v21, %v2896_v33 }
 0x1a2   : > { %v2302_v3 = vpop.eup %2301 }
 0x1a3   : > { %v1848_v43 = vmul.f32 %v2302_v3, %v2899_v14 }
 0x1a4   : > { %v2304_v7 = vpop.eup %2303 }
 0x1a5   : > { %v1897_v8 = vcombine.low %v1847_v1, %v1848_v43  ;;  %v1850_v9 = vmul.f32 %v2304_v7, %v2903_v22 }
 0x1a7   : > { %1929 = vst [vmem:[%s2799_s11 + $0x70] sm:$0xff] %v1897_v8  ;;  %v1898_v47 = vcombine.low %v1849_v54, %v1850_v9 }
 0x1a9   : > { %1930 = vst [vmem:[%s2799_s11 + $0x78] sm:$0xff] %v1898_v47 }
 0x1aa PF: > { %p10_p9 = scmp.ge.s32.totalorder %s2367_s16, 4   ;;  %s2940_s12 = smov %s2323_s13 }
 0x1ab   : > { %s2941_s13 = smov %s2376_s19  ;;  %s2942_s14 = smov %s2367_s16 }
 0x1ac   :  { %12 = sbr.rel (!%p10_p9) target bundleno = 2 (0x2), region = 90 }

// kernel: _lambda_.8
= control target key start
LH: loop header
LB: loop body
LE: loop exit
PB: predicated region body
PF: predicated region fallthrough
CT: control target
= control target key end

     0   :  { %s2367_s12 = smov 0   ;;  %s2369_s13 = smov 0   ;;  %s2937_s0 = inlined_call_operand.vmem [shape: bf16[4,36], index: 0, kind: input, shape index: {}]   ;;  %s2938_s1 = inlined_call_operand.vmem [shape: f32[4,1], index: 1, kind: input, shape index: {}]   ;;  %s2939_s2 = inlined_call_operand.vmem [shape: bf16[36,8192], index: 2, kind: input, shape index: {}]   ;;  %s2940_s3 = inlined_call_operand.vmem [shape: f32[4,8192], index: 3, kind: output, shape index: {}]  }
   0x1   :  { %s2371_s14 = smov 0  }
   0x2 LB: > { %s1962_s15 = sadd.s32 4294967295, %s2344_s14   ;;  %s2384_s16 = sadd.s32 1, %s2344_s14   ;;  %s2344_s14 = sphi %s2371_s14, %s2943_s14   ;;  %s2340_s13 = sphi %s2369_s13, %s2942_s13   ;;  %s2336_s12 = sphi %s2367_s12, %s2941_s12  }
   0x3   : > { %s59_s17 = ssub.s32 %s2344_s14, %s2384_s16  ;;  %s62_s18 = sadd.s32 1, %s2340_s13 }
   0x4   : > { %p60_p0 = scmp.eq.s32.totalorder %s59_s17, 0  ;;  %p69_p1 = scmp.ne.s32.totalorder %s2340_s13, %s2336_s12 }
   0x5   : > { %p70_p2 = scmp.eq.s32.totalorder %s2344_s14, 0  ;;  %p1965_p4 = scmp.ge.s32.totalorder %s2344_s14, 2 }
   0x6   : > { %s2393_s19 = scalar_select %p60_p0, %s2340_s13, %s62_s18  }
   0x7   : > { %p71_p3 = por %p70_p2, %p69_p1  ;;  %127 = sbr.rel (%p1965_p4) target bundleno = 59 (0x3b), region = 24 }
   0xe   : > { %130 = sbr.rel (!%p71_p3) target bundleno = 59 (0x3b), region = 28  ;;  %s132_s20 = sand.u32 (%p71_p3), 1, %s2340_s13  }
   0xf   : > { %s2133_s21 = sshll.u32 (%p71_p3), %s2344_s14, 7  ;;  %s2134_s22 = smul.u32 (%p71_p3), 640, %s132_s20 }
  0x10   : > { %s2401_s25 = scalar_lea.vmem (%p71_p3), %s2939_s2, %s2133_s21 }
  0x11   : > { %v150_v0 = vld [vmem:[%s2401_s25] sm:$0xff] (%p71_p3)  ;;  %v152_v1 = vld [vmem:[%s2401_s25 + $0x8] sm:$0xff] (%p71_p3)  ;;  %v154_v2 = vld [vmem:[%s2401_s25 + $0x10] sm:$0xff] (%p71_p3)  ;;  %s2409_s26 = scalar_lea.vmem (%p71_p3), [#allocation2], %s2134_s22 }
  0x12   : > { %v156_v3 = vld [vmem:[%s2401_s25 + $0x18] sm:$0xff] (%p71_p3)  ;;  %v158_v4 = vld [vmem:[%s2401_s25 + $0x20] sm:$0xff] (%p71_p3)  ;;  %v160_v5 = vld [vmem:[%s2401_s25 + $0x28] sm:$0xff] (%p71_p3)  ;;  %151 = vst [vmem:[%s2409_s26] sm:$0xff] (%p71_p3), %v150_v0 }
  0x13   : > { %153 = vst [vmem:[%s2409_s26 + $0x8] sm:$0xff] (%p71_p3), %v152_v1  ;;  %155 = vst [vmem:[%s2409_s26 + $0x10] sm:$0xff] (%p71_p3), %v154_v2  ;;  %v162_v6 = vld [vmem:[%s2401_s25 + $0x30] sm:$0xff] (%p71_p3)  ;;  %v164_v7 = vld [vmem:[%s2401_s25 + $0x38] sm:$0xff] (%p71_p3) }
  0x14   : > { %157 = vst [vmem:[%s2409_s26 + $0x18] sm:$0xff] (%p71_p3), %v156_v3  ;;  %159 = vst [vmem:[%s2409_s26 + $0x20] sm:$0xff] (%p71_p3), %v158_v4  ;;  %v166_v8 = vld [vmem:[%s2401_s25 + $0x40] sm:$0xff] (%p71_p3)  ;;  %v168_v9 = vld [vmem:[%s2401_s25 + $0x48] sm:$0xff] (%p71_p3) }
  0x15   : > { %161 = vst [vmem:[%s2409_s26 + $0x28] sm:$0xff] %v160_v5  ;;  %163 = vst [vmem:[%s2409_s26 + $0x30] sm:$0xff] %v162_v6  ;;  %v170_v10 = vld [vmem:[%s2401_s25 + $0x50] sm:$0xff]  ;;  %v172_v11 = vld [vmem:[%s2401_s25 + $0x58] sm:$0xff] }
  0x16   : > { %165 = vst [vmem:[%s2409_s26 + $0x38] sm:$0xff] %v164_v7  ;;  %167 = vst [vmem:[%s2409_s26 + $0x40] sm:$0xff] %v166_v8  ;;  %v174_v12 = vld [vmem:[%s2401_s25 + $0x60] sm:$0xff]  ;;  %v176_v13 = vld [vmem:[%s2401_s25 + $0x68] sm:$0xff] }
  0x17   : > { %169 = vst [vmem:[%s2409_s26 + $0x48] sm:$0xff] %v168_v9  ;;  %171 = vst [vmem:[%s2409_s26 + $0x50] sm:$0xff] %v170_v10  ;;  %v178_v14 = vld [vmem:[%s2401_s25 + $0x70] sm:$0xff]  ;;  %v180_v15 = vld [vmem:[%s2401_s25 + $0x78] sm:$0xff] }
  0x18   : > { %173 = vst [vmem:[%s2409_s26 + $0x58] sm:$0xff] %v172_v11  ;;  %175 = vst [vmem:[%s2409_s26 + $0x60] sm:$0xff] %v174_v12  ;;  %v182_v16 = vld [vmem:[%s2401_s25 + $0x100] sm:$0xff]  ;;  %v184_v17 = vld [vmem:[%s2401_s25 + $0x108] sm:$0xff] }
  0x19   : > { %177 = vst [vmem:[%s2409_s26 + $0x68] sm:$0xff] %v176_v13  ;;  %179 = vst [vmem:[%s2409_s26 + $0x70] sm:$0xff] %v178_v14  ;;  %v186_v18 = vld [vmem:[%s2401_s25 + $0x110] sm:$0xff]  ;;  %v188_v19 = vld [vmem:[%s2401_s25 + $0x118] sm:$0xff] }
  0x1a   : > { %181 = vst [vmem:[%s2409_s26 + $0x78] sm:$0xff] %v180_v15  ;;  %183 = vst [vmem:[%s2409_s26 + $0x80] sm:$0xff] %v182_v16  ;;  %v190_v20 = vld [vmem:[%s2401_s25 + $0x120] sm:$0xff]  ;;  %v192_v21 = vld [vmem:[%s2401_s25 + $0x128] sm:$0xff] }
  0x1b   : > { %185 = vst [vmem:[%s2409_s26 + $0x88] sm:$0xff] %v184_v17  ;;  %187 = vst [vmem:[%s2409_s26 + $0x90] sm:$0xff] %v186_v18  ;;  %v194_v22 = vld [vmem:[%s2401_s25 + $0x130] sm:$0xff]  ;;  %v196_v23 = vld [vmem:[%s2401_s25 + $0x138] sm:$0xff] }
  0x1c   : > { %189 = vst [vmem:[%s2409_s26 + $0x98] sm:$0xff] %v188_v19  ;;  %191 = vst [vmem:[%s2409_s26 + $0xa0] sm:$0xff] %v190_v20  ;;  %v198_v24 = vld [vmem:[%s2401_s25 + $0x140] sm:$0xff]  ;;  %v200_v25 = vld [vmem:[%s2401_s25 + $0x148] sm:$0xff] }
  0x1d   : > { %193 = vst [vmem:[%s2409_s26 + $0xa8] sm:$0xff] %v192_v21  ;;  %195 = vst [vmem:[%s2409_s26 + $0xb0] sm:$0xff] %v194_v22  ;;  %v202_v26 = vld [vmem:[%s2401_s25 + $0x150] sm:$0xff]  ;;  %v204_v27 = vld [vmem:[%s2401_s25 + $0x158] sm:$0xff] }
  0x1e   : > { %197 = vst [vmem:[%s2409_s26 + $0xb8] sm:$0xff] %v196_v23  ;;  %199 = vst [vmem:[%s2409_s26 + $0xc0] sm:$0xff] %v198_v24  ;;  %v206_v28 = vld [vmem:[%s2401_s25 + $0x160] sm:$0xff]  ;;  %v208_v29 = vld [vmem:[%s2401_s25 + $0x168] sm:$0xff] }
  0x1f   : > { %201 = vst [vmem:[%s2409_s26 + $0xc8] sm:$0xff] %v200_v25  ;;  %203 = vst [vmem:[%s2409_s26 + $0xd0] sm:$0xff] %v202_v26  ;;  %v210_v30 = vld [vmem:[%s2401_s25 + $0x170] sm:$0xff]  ;;  %v212_v31 = vld [vmem:[%s2401_s25 + $0x178] sm:$0xff] }
  0x20   : > { %205 = vst [vmem:[%s2409_s26 + $0xd8] sm:$0xff] %v204_v27  ;;  %207 = vst [vmem:[%s2409_s26 + $0xe0] sm:$0xff] %v206_v28  ;;  %v214_v32 = vld [vmem:[%s2401_s25 + $0x200] sm:$0xff]  ;;  %v216_v33 = vld [vmem:[%s2401_s25 + $0x208] sm:$0xff] }
  0x21   : > { %209 = vst [vmem:[%s2409_s26 + $0xe8] sm:$0xff] %v208_v29  ;;  %211 = vst [vmem:[%s2409_s26 + $0xf0] sm:$0xff] %v210_v30  ;;  %v218_v34 = vld [vmem:[%s2401_s25 + $0x210] sm:$0xff]  ;;  %v220_v35 = vld [vmem:[%s2401_s25 + $0x218] sm:$0xff] }
  0x22   : > { %213 = vst [vmem:[%s2409_s26 + $0xf8] sm:$0xff] %v212_v31  ;;  %215 = vst [vmem:[%s2409_s26 + $0x100] sm:$0xff] %v214_v32  ;;  %v222_v36 = vld [vmem:[%s2401_s25 + $0x220] sm:$0xff]  ;;  %v224_v37 = vld [vmem:[%s2401_s25 + $0x228] sm:$0xff] }
  0x23   : > { %217 = vst [vmem:[%s2409_s26 + $0x108] sm:$0xff] %v216_v33  ;;  %219 = vst [vmem:[%s2409_s26 + $0x110] sm:$0xff] %v218_v34  ;;  %v226_v38 = vld [vmem:[%s2401_s25 + $0x230] sm:$0xff]  ;;  %v228_v39 = vld [vmem:[%s2401_s25 + $0x238] sm:$0xff] }
  0x24   : > { %221 = vst [vmem:[%s2409_s26 + $0x118] sm:$0xff] %v220_v35  ;;  %223 = vst [vmem:[%s2409_s26 + $0x120] sm:$0xff] %v222_v36  ;;  %v230_v40 = vld [vmem:[%s2401_s25 + $0x240] sm:$0xff]  ;;  %v232_v41 = vld [vmem:[%s2401_s25 + $0x248] sm:$0xff] }
  0x25   : > { %225 = vst [vmem:[%s2409_s26 + $0x128] sm:$0xff] %v224_v37  ;;  %227 = vst [vmem:[%s2409_s26 + $0x130] sm:$0xff] %v226_v38  ;;  %v234_v42 = vld [vmem:[%s2401_s25 + $0x250] sm:$0xff]  ;;  %v236_v43 = vld [vmem:[%s2401_s25 + $0x258] sm:$0xff] }
  0x26   : > { %229 = vst [vmem:[%s2409_s26 + $0x138] sm:$0xff] %v228_v39  ;;  %231 = vst [vmem:[%s2409_s26 + $0x140] sm:$0xff] %v230_v40  ;;  %v238_v44 = vld [vmem:[%s2401_s25 + $0x260] sm:$0xff]  ;;  %v240_v45 = vld [vmem:[%s2401_s25 + $0x268] sm:$0xff] }
  0x27   : > { %233 = vst [vmem:[%s2409_s26 + $0x148] sm:$0xff] %v232_v41  ;;  %235 = vst [vmem:[%s2409_s26 + $0x150] sm:$0xff] %v234_v42  ;;  %v242_v46 = vld [vmem:[%s2401_s25 + $0x270] sm:$0xff]  ;;  %v244_v47 = vld [vmem:[%s2401_s25 + $0x278] sm:$0xff] }
  0x28   : > { %237 = vst [vmem:[%s2409_s26 + $0x158] sm:$0xff] %v236_v43  ;;  %239 = vst [vmem:[%s2409_s26 + $0x160] sm:$0xff] %v238_v44  ;;  %v246_v48 = vld [vmem:[%s2401_s25 + $0x300] sm:$0xff]  ;;  %v248_v49 = vld [vmem:[%s2401_s25 + $0x308] sm:$0xff] }
  0x29   : > { %241 = vst [vmem:[%s2409_s26 + $0x168] sm:$0xff] %v240_v45  ;;  %243 = vst [vmem:[%s2409_s26 + $0x170] sm:$0xff] %v242_v46  ;;  %v250_v50 = vld [vmem:[%s2401_s25 + $0x310] sm:$0xff]  ;;  %v252_v51 = vld [vmem:[%s2401_s25 + $0x318] sm:$0xff] }
  0x2a   : > { %245 = vst [vmem:[%s2409_s26 + $0x178] sm:$0xff] %v244_v47  ;;  %247 = vst [vmem:[%s2409_s26 + $0x180] sm:$0xff] %v246_v48  ;;  %v254_v52 = vld [vmem:[%s2401_s25 + $0x320] sm:$0xff]  ;;  %v256_v53 = vld [vmem:[%s2401_s25 + $0x328] sm:$0xff] }
  0x2b   : > { %249 = vst [vmem:[%s2409_s26 + $0x188] sm:$0xff] %v248_v49  ;;  %251 = vst [vmem:[%s2409_s26 + $0x190] sm:$0xff] %v250_v50  ;;  %v258_v54 = vld [vmem:[%s2401_s25 + $0x330] sm:$0xff]  ;;  %v260_v55 = vld [vmem:[%s2401_s25 + $0x338] sm:$0xff] }
  0x2c   : > { %253 = vst [vmem:[%s2409_s26 + $0x198] sm:$0xff] %v252_v51  ;;  %255 = vst [vmem:[%s2409_s26 + $0x1a0] sm:$0xff] %v254_v52  ;;  %v262_v56 = vld [vmem:[%s2401_s25 + $0x340] sm:$0xff]  ;;  %v264_v57 = vld [vmem:[%s2401_s25 + $0x348] sm:$0xff] }
  0x2d   : > { %257 = vst [vmem:[%s2409_s26 + $0x1a8] sm:$0xff] %v256_v53  ;;  %259 = vst [vmem:[%s2409_s26 + $0x1b0] sm:$0xff] %v258_v54  ;;  %v266_v58 = vld [vmem:[%s2401_s25 + $0x350] sm:$0xff]  ;;  %v268_v59 = vld [vmem:[%s2401_s25 + $0x358] sm:$0xff] }
  0x2e   : > { %261 = vst [vmem:[%s2409_s26 + $0x1b8] sm:$0xff] %v260_v55  ;;  %263 = vst [vmem:[%s2409_s26 + $0x1c0] sm:$0xff] %v262_v56  ;;  %v270_v60 = vld [vmem:[%s2401_s25 + $0x360] sm:$0xff]  ;;  %v272_v61 = vld [vmem:[%s2401_s25 + $0x368] sm:$0xff] }
  0x2f   : > { %265 = vst [vmem:[%s2409_s26 + $0x1c8] sm:$0xff] %v264_v57  ;;  %267 = vst [vmem:[%s2409_s26 + $0x1d0] sm:$0xff] %v266_v58  ;;  %v274_v62 = vld [vmem:[%s2401_s25 + $0x370] sm:$0xff]  ;;  %v276_v63 = vld [vmem:[%s2401_s25 + $0x378] sm:$0xff] }
  0x30   : > { %269 = vst [vmem:[%s2409_s26 + $0x1d8] sm:$0xff] %v268_v59  ;;  %271 = vst [vmem:[%s2409_s26 + $0x1e0] sm:$0xff] %v270_v60  ;;  %v278_v0 = vld [vmem:[%s2401_s25 + $0x400] sm:$0xff]  ;;  %v280_v1 = vld [vmem:[%s2401_s25 + $0x408] sm:$0xff] }
  0x31   : > { %273 = vst [vmem:[%s2409_s26 + $0x1e8] sm:$0xff] %v272_v61  ;;  %275 = vst [vmem:[%s2409_s26 + $0x1f0] sm:$0xff] %v274_v62  ;;  %v282_v2 = vld [vmem:[%s2401_s25 + $0x410] sm:$0xff]  ;;  %v284_v3 = vld [vmem:[%s2401_s25 + $0x418] sm:$0xff] }
  0x32   : > { %277 = vst [vmem:[%s2409_s26 + $0x1f8] sm:$0xff] %v276_v63  ;;  %279 = vst [vmem:[%s2409_s26 + $0x200] sm:$0xff] %v278_v0  ;;  %v286_v4 = vld [vmem:[%s2401_s25 + $0x420] sm:$0xff]  ;;  %v288_v5 = vld [vmem:[%s2401_s25 + $0x428] sm:$0xff] }
  0x33   : > { %281 = vst [vmem:[%s2409_s26 + $0x208] sm:$0xff] %v280_v1  ;;  %283 = vst [vmem:[%s2409_s26 + $0x210] sm:$0xff] %v282_v2  ;;  %v290_v6 = vld [vmem:[%s2401_s25 + $0x430] sm:$0xff]  ;;  %v292_v7 = vld [vmem:[%s2401_s25 + $0x438] sm:$0xff] }
  0x34   : > { %285 = vst [vmem:[%s2409_s26 + $0x218] sm:$0xff] %v284_v3  ;;  %287 = vst [vmem:[%s2409_s26 + $0x220] sm:$0xff] %v286_v4  ;;  %v294_v8 = vld [vmem:[%s2401_s25 + $0x440] sm:$0xff]  ;;  %v296_v9 = vld [vmem:[%s2401_s25 + $0x448] sm:$0xff] }
  0x35   : > { %289 = vst [vmem:[%s2409_s26 + $0x228] sm:$0xff] %v288_v5  ;;  %291 = vst [vmem:[%s2409_s26 + $0x230] sm:$0xff] %v290_v6  ;;  %v298_v10 = vld [vmem:[%s2401_s25 + $0x450] sm:$0xff]  ;;  %v300_v11 = vld [vmem:[%s2401_s25 + $0x458] sm:$0xff] }
  0x36   : > { %293 = vst [vmem:[%s2409_s26 + $0x238] sm:$0xff] %v292_v7  ;;  %295 = vst [vmem:[%s2409_s26 + $0x240] sm:$0xff] %v294_v8  ;;  %v302_v12 = vld [vmem:[%s2401_s25 + $0x460] sm:$0xff]  ;;  %v304_v13 = vld [vmem:[%s2401_s25 + $0x468] sm:$0xff] }
  0x37   : > { %297 = vst [vmem:[%s2409_s26 + $0x248] sm:$0xff] %v296_v9  ;;  %299 = vst [vmem:[%s2409_s26 + $0x250] sm:$0xff] %v298_v10  ;;  %v306_v14 = vld [vmem:[%s2401_s25 + $0x470] sm:$0xff]  ;;  %v308_v15 = vld [vmem:[%s2401_s25 + $0x478] sm:$0xff] }
  0x38   : > { %301 = vst [vmem:[%s2409_s26 + $0x258] sm:$0xff] %v300_v11  ;;  %303 = vst [vmem:[%s2409_s26 + $0x260] sm:$0xff] %v302_v12 }
  0x39   : > { %305 = vst [vmem:[%s2409_s26 + $0x268] sm:$0xff] %v304_v13  ;;  %307 = vst [vmem:[%s2409_s26 + $0x270] sm:$0xff] %v306_v14 }
  0x3a   : > { %309 = vst [vmem:[%s2409_s26 + $0x278] sm:$0xff] %v308_v15 }
  0x3b PF: > { %p1968_p5 = scmp.ge.s32.totalorder %s2344_s14, 1  ;;  %p314_p6 = scmp.lt.s32.totalorder %s2344_s14, 3 }
  0x3d   : > { %p315_p7 = pnand %p1968_p5, %p314_p6 }
  0x3e   : > { %s321_s27 = sand.u32 (!%p315_p7), 1, %s2336_s12   ;;  %v2346_v16 = vmov (!%p315_p7), 0   ;;  %v433_v17 = vld [vmem:[%s2938_s1] sm:$0xf] (!%p315_p7)  ;;  %vm843_vm0 = vcmask (!%p315_p7), 1041408   ;;  %vm839_vm1 = vcmask (!%p315_p7), 293888  }
  0x3f   : > { %318 = sbr.rel (%p315_p7) target bundleno = 418 (0x1a2), region = 51  ;;  %972 = vmatprep.mubr.bf16.mxu0 (!%p315_p7), %v2346_v16  ;;  %1013 = vmatprep.mubr.bf16.mxu1 (!%p315_p7), %v2346_v16  ;;  %v2601_v52 = vld [vmem:[%s2937_s0] sm:$0x3] (!%p315_p7)  ;;  %s1969_s7 = sshll.u32 (!%p315_p7), %s1962_s15, 5 }
  0x40   : > { %s2135_s28 = smul.u32 (!%p315_p7), 640, %s321_s27  ;;  %2161 = vset.pattern.permute.xlu0 (!%p315_p7), %v2346_v16  ;;  %p346_p8 = scmp.lt.s32.totalorder (!%p315_p7), %s1969_s7, 63 }
  0x41   : > { %436 = vperm.xlu0 (!%p315_p7), %2161, %v433_v17  }
  0x42   : > { %s2574_s4 = scalar_lea.vmem (!%p315_p7), [#allocation2], %s2135_s28 }
  0x43   : > { %v353_v18 = vld [vmem:[%s2574_s4] sm:$0xff] (!%p315_p7)  ;;  %v354_v20 = vld [vmem:[%s2574_s4 + $0x8] sm:$0xff] (!%p315_p7)  ;;  %v355_v40 = vld [vmem:[%s2574_s4 + $0x10] sm:$0xff] (!%p315_p7) }
  0x44   : > { %v369_v19 = vld [vmem:[%s2574_s4 + $0x80] sm:$0xff] (!%p315_p7)  ;;  %v370_v22 = vld [vmem:[%s2574_s4 + $0x88] sm:$0xff] (!%p315_p7)  ;;  %v371_v41 = vld [vmem:[%s2574_s4 + $0x90] sm:$0xff] (!%p315_p7) }
  0x45   : > { %v1972_v21 = vcombine.high (!%p315_p7), %v353_v18, %v369_v19  ;;  %v1971_v23 = vcombine.low (!%p315_p7), %v353_v18, %v369_v19  ;;  %v385_v24 = vld [vmem:[%s2574_s4 + $0x100] sm:$0xff] (!%p315_p7)  ;;  %v1974_v26 = vcombine.high (!%p315_p7), %v354_v20, %v370_v22  ;;  %v1973_v27 = vcombine.low (!%p315_p7), %v354_v20, %v370_v22  ;;  %v386_v29 = vld [vmem:[%s2574_s4 + $0x108] sm:$0xff] (!%p315_p7)  ;;  %v356_v42 = vld [vmem:[%s2574_s4 + $0x18] sm:$0xff] (!%p315_p7) }
  0x46   : > { %v401_v25 = vld [vmem:[%s2574_s4 + $0x180] sm:$0xff]  ;;  %v402_v30 = vld [vmem:[%s2574_s4 + $0x188] sm:$0xff]  ;;  %v372_v43 = vld [vmem:[%s2574_s4 + $0x98] sm:$0xff]  ;;  %v1976_v45 = vcombine.high %v355_v40, %v371_v41  ;;  %v1975_v53 = vcombine.low %v355_v40, %v371_v41  ;;  %s2945_s7 = smov (!%p346_p8, %s1969_s7), 63 }
  0x47   : > { %v2004_v28 = vcombine.high %v385_v24, %v401_v25  ;;  %v417_v31 = vld [vmem:[%s2574_s4 + $0x200] sm:$0x33]  ;;  %940 = vmatprep.subr.bf16.mxu0 %v1972_v21  ;;  %v2006_v32 = vcombine.high %v386_v29, %v402_v30  ;;  %v418_v33 = vld [vmem:[%s2574_s4 + $0x208] sm:$0x33]  ;;  %981 = vmatprep.subr.bf16.mxu1 %v1974_v26  ;;  %v2003_v34 = vcombine.low %v385_v24, %v401_v25  ;;  %v387_v48 = vld [vmem:[%s2574_s4 + $0x110] sm:$0xff]  ;;  %s1970_s8 = sshll.u32 %s2945_s7, 2 }
  0x48   : > { %941 = vmatpush1.bf16.msra.mxu0 %v1971_v23  ;;  %982 = vmatpush1.bf16.msra.mxu1 %v1973_v27  ;;  %v2005_v35 = vcombine.low %v386_v29, %v402_v30  ;;  %v2036_v36 = vcombine.high %v417_v31, %v417_v31  ;;  %v2035_v37 = vcombine.low %v417_v31, %v417_v31  ;;  %v403_v49 = vld [vmem:[%s2574_s4 + $0x190] sm:$0xff]  ;;  %v388_v50 = vld [vmem:[%s2574_s4 + $0x118] sm:$0xff]  ;;  %v357_v1 = vld [vmem:[%s2574_s4 + $0x20] sm:$0xff]  ;;  %s2800_s11 = scalar_lea.vmem %s2940_s3, %s1970_s8 }
  0x49   : > { %942 = vmatprep.subr.bf16.mxu0 %v2004_v28  ;;  %983 = vmatprep.subr.bf16.mxu1 %v2006_v32  ;;  %v2038_v38 = vcombine.high %v418_v33, %v418_v33  ;;  %v2037_v39 = vcombine.low %v418_v33, %v418_v33  ;;  %v1978_v47 = vcombine.high %v356_v42, %v372_v43  ;;  %v404_v51 = vld [vmem:[%s2574_s4 + $0x198] sm:$0xff]  ;;  %v419_v57 = vld [vmem:[%s2574_s4 + $0x210] sm:$0x33]  ;;  %v373_v2 = vld [vmem:[%s2574_s4 + $0xa0] sm:$0xff] }
  0x4a   : > { %v845_v44 = vsel %vm843_vm0, %v2035_v37, 0  ;;  %v1977_v54 = vcombine.low %v356_v42, %v372_v43  ;;  %v2008_v55 = vcombine.high %v387_v48, %v403_v49  ;;  %v2010_v56 = vcombine.high %v388_v50, %v404_v51  ;;  %v420_v58 = vld [vmem:[%s2574_s4 + $0x218] sm:$0x33]  ;;  %v358_v3 = vld [vmem:[%s2574_s4 + $0x28] sm:$0xff]  ;;  %v389_v9 = vld [vmem:[%s2574_s4 + $0x120] sm:$0xff] }
  0x4b   : > { %v851_v46 = vsel %vm843_vm0, %v2037_v39, 0  ;;  %v2007_v59 = vcombine.low %v387_v48, %v403_v49  ;;  %v2009_v60 = vcombine.low %v388_v50, %v404_v51  ;;  %v2040_v61 = vcombine.high %v419_v57, %v419_v57  ;;  %v374_v4 = vld [vmem:[%s2574_s4 + $0xa8] sm:$0xff]  ;;  %v405_v10 = vld [vmem:[%s2574_s4 + $0x1a0] sm:$0xff]  ;;  %v359_v26 = vld [vmem:[%s2574_s4 + $0x30] sm:$0xff] }
  0x4c   : > { %943 = vmatpush1.bf16.msra.mxu0 %v2003_v34  ;;  %984 = vmatpush1.bf16.msra.mxu1 %v2005_v35  ;;  %v2039_v62 = vcombine.low %v419_v57, %v419_v57  ;;  %v2042_v63 = vcombine.high %v420_v58, %v420_v58  ;;  %v2041_v0 = vcombine.low %v420_v58, %v420_v58  ;;  %v390_v11 = vld [vmem:[%s2574_s4 + $0x128] sm:$0xff]  ;;  %v421_v18 = vld [vmem:[%s2574_s4 + $0x220] sm:$0x33]  ;;  %v375_v27 = vld [vmem:[%s2574_s4 + $0xb0] sm:$0xff] }
  0x4d   : > { %2067 = vmatprep.subr.msk.bf16.mxu0 %vm843_vm0, %v2036_v36  ;;  %2069 = vmatprep.subr.msk.bf16.mxu1 %vm843_vm0, %v2038_v38  ;;  %v1980_v6 = vcombine.high %v357_v1, %v373_v2  ;;  %v1982_v8 = vcombine.high %v358_v3, %v374_v4  ;;  %v406_v12 = vld [vmem:[%s2574_s4 + $0x1a8] sm:$0xff]  ;;  %v1979_v13 = vcombine.low %v357_v1, %v373_v2  ;;  %v360_v28 = vld [vmem:[%s2574_s4 + $0x38] sm:$0xff]  ;;  %v391_v34 = vld [vmem:[%s2574_s4 + $0x130] sm:$0xff] }
  0x4e   : > { %v857_v5 = vsel %vm843_vm0, %v2039_v62, 0  ;;  %v863_v7 = vsel %vm843_vm0, %v2041_v0, 0  ;;  %v1981_v14 = vcombine.low %v358_v3, %v374_v4  ;;  %v2012_v15 = vcombine.high %v389_v9, %v405_v10  ;;  %v422_v19 = vld [vmem:[%s2574_s4 + $0x228] sm:$0x33]  ;;  %v376_v29 = vld [vmem:[%s2574_s4 + $0xb8] sm:$0xff]  ;;  %v407_v35 = vld [vmem:[%s2574_s4 + $0x1b0] sm:$0xff] }
  0x4f   : > { %v2014_v17 = vcombine.high %v390_v11, %v406_v12  ;;  %v2011_v20 = vcombine.low %v389_v9, %v405_v10  ;;  %v2013_v21 = vcombine.low %v390_v11, %v406_v12  ;;  %v2044_v22 = vcombine.high %v421_v18, %v421_v18  ;;  %v392_v36 = vld [vmem:[%s2574_s4 + $0x138] sm:$0xff]  ;;  %v423_v42 = vld [vmem:[%s2574_s4 + $0x230] sm:$0x33]  ;;  %v361_v50 = vld [vmem:[%s2574_s4 + $0x40] sm:$0xff] }
  0x50   : > { %945 = vmatpush1.bf16.msra.mxu0 %v845_v44  ;;  %986 = vmatpush1.bf16.msra.mxu1 %v851_v46  ;;  %v2043_v23 = vcombine.low %v421_v18, %v421_v18  ;;  %v2046_v24 = vcombine.high %v422_v19, %v422_v19  ;;  %v2045_v25 = vcombine.low %v422_v19, %v422_v19  ;;  %v408_v37 = vld [vmem:[%s2574_s4 + $0x1b8] sm:$0xff]  ;;  %v377_v51 = vld [vmem:[%s2574_s4 + $0xc0] sm:$0xff]  ;;  %v410_v62 = vld [vmem:[%s2574_s4 + $0x1c8] sm:$0xff] }
  0x51   : > { %1022 = vmatprep.subr.bf16.mxu0 %v1976_v45  ;;  %1063 = vmatprep.subr.bf16.mxu1 %v1978_v47  ;;  %v1984_v31 = vcombine.high %v359_v26, %v375_v27  ;;  %v1986_v33 = vcombine.high %v360_v28, %v376_v29  ;;  %v1983_v38 = vcombine.low %v359_v26, %v375_v27  ;;  %v424_v43 = vld [vmem:[%s2574_s4 + $0x238] sm:$0x33]  ;;  %v425_v3 = vld [vmem:[%s2574_s4 + $0x240] sm:$0x33]  ;;  %v426_v4 = vld [vmem:[%s2574_s4 + $0x248] sm:$0x33] }
  0x52   : > { %v869_v30 = vsel %vm843_vm0, %v2043_v23, 0  ;;  %v875_v32 = vsel %vm843_vm0, %v2045_v25, 0  ;;  %v1985_v39 = vcombine.low %v360_v28, %v376_v29  ;;  %v2016_v40 = vcombine.high %v391_v34, %v407_v35  ;;  %v363_v11 = vld [vmem:[%s2574_s4 + $0x50] sm:$0xff]  ;;  %v412_v23 = vld [vmem:[%s2574_s4 + $0x1d8] sm:$0xff] }
  0x53   : > { %2068 = vmatmul.mubr.msk.bf16.vlgmr.msra.gmra.mrb[0].mxu0 %vm839_vm1, %v2601_v52  ;;  %2070 = vmatmul.mubr.msk.bf16.vlgmr.msra.gmra.mrb[0].mxu1 %vm839_vm1, %v2601_v52  ;;  %v2018_v41 = vcombine.high %v392_v36, %v408_v37  ;;  %v2015_v44 = vcombine.low %v391_v34, %v407_v35  ;;  %v2017_v45 = vcombine.low %v392_v36, %v408_v37  ;;  %v379_v12 = vld [vmem:[%s2574_s4 + $0xd0] sm:$0xff]  ;;  %v428_v29 = vld [vmem:[%s2574_s4 + $0x258] sm:$0x33]  ;;  %v365_v36 = vld [vmem:[%s2574_s4 + $0x60] sm:$0xff] }
  0x54   : > { %1023 = vmatpush1.bf16.msra.mxu0 %v1975_v53  ;;  %1064 = vmatpush1.bf16.msra.mxu1 %v1977_v54  ;;  %v2048_v46 = vcombine.high %v423_v42, %v423_v42  ;;  %v2047_v47 = vcombine.low %v423_v42, %v423_v42  ;;  %v2050_v48 = vcombine.high %v424_v43, %v424_v43  ;;  %v362_v53 = vld [vmem:[%s2574_s4 + $0x48] sm:$0xff]  ;;  %v427_v28 = vld [vmem:[%s2574_s4 + $0x250] sm:$0x33]  ;;  %v381_v37 = vld [vmem:[%s2574_s4 + $0xe0] sm:$0xff] }
  0x55   : > { %1024 = vmatprep.subr.bf16.mxu0 %v2008_v55  ;;  %1065 = vmatprep.subr.bf16.mxu1 %v2010_v56  ;;  %v2049_v49 = vcombine.low %v424_v43, %v424_v43  ;;  %v378_v54 = vld [vmem:[%s2574_s4 + $0xc8] sm:$0xff]  ;;  %v1988_v56 = vcombine.high %v361_v50, %v377_v51  ;;  %v2054_v9 = vcombine.high %v426_v4, %v426_v4 }
  0x56   : > { %1054 = vmatprep.mubr.bf16.mxu0 %v2346_v16  ;;  %1095 = vmatprep.mubr.bf16.mxu1 %v2346_v16  ;;  %v881_v55 = vsel %vm843_vm0, %v2047_v47, 0  ;;  %v1990_v58 = vcombine.high %v362_v53, %v378_v54  ;;  %v1989_v0 = vcombine.low %v362_v53, %v378_v54  ;;  %v2053_v10 = vcombine.low %v426_v4, %v426_v4  ;;  %v414_v47 = vld [vmem:[%s2574_s4 + $0x1e8] sm:$0xff]  ;;  %v429_v53 = vld [vmem:[%s2574_s4 + $0x260] sm:$0x33] }
  0x57   : > { %v887_v57 = vsel %vm843_vm0, %v2049_v49, 0  ;;  %v2058_v34 = vcombine.high %v428_v29, %v428_v29  ;;  %v2057_v35 = vcombine.low %v428_v29, %v428_v29  ;;  %v430_v54 = vld [vmem:[%s2574_s4 + $0x268] sm:$0x33] }
  0x58   : > { %1025 = vmatpush1.bf16.msra.mxu0 %v2007_v59  ;;  %1066 = vmatpush1.bf16.msra.mxu1 %v2009_v60  ;;  %v393_v59 = vld [vmem:[%s2574_s4 + $0x140] sm:$0xff]  ;;  %v899_v18 = vsel %vm843_vm0, %v2053_v10, 0 }
  0x59   : > { %2071 = vmatprep.subr.msk.bf16.mxu0 %vm843_vm0, %v2040_v61  ;;  %2073 = vmatprep.subr.msk.bf16.mxu1 %vm843_vm0, %v2042_v63  ;;  %v409_v60 = vld [vmem:[%s2574_s4 + $0x1c0] sm:$0xff]  ;;  %v394_v61 = vld [vmem:[%s2574_s4 + $0x148] sm:$0xff]  ;;  %v1987_v63 = vcombine.low %v361_v50, %v377_v51  ;;  %v911_v42 = vsel %vm843_vm0, %v2057_v35, 0 }
  0x5a   : > { %v2020_v1 = vcombine.high %v393_v59, %v409_v60  ;;  %v2022_v2 = vcombine.high %v394_v61, %v410_v62 }
  0x5c   : > { %1027 = vmatpush1.bf16.msra.mxu0 %v857_v5  ;;  %1068 = vmatpush1.bf16.msra.mxu1 %v863_v7  ;;  %v2019_v5 = vcombine.low %v393_v59, %v409_v60  ;;  %v2052_v7 = vcombine.high %v425_v3, %v425_v3  ;;  %v2062_v59 = vcombine.high %v430_v54, %v430_v54 }
  0x5d   : > { %1104 = vmatprep.subr.bf16.mxu0 %v1980_v6  ;;  %1145 = vmatprep.subr.bf16.mxu1 %v1982_v8  ;;  %v2021_v6 = vcombine.low %v394_v61, %v410_v62  ;;  %v2051_v8 = vcombine.low %v425_v3, %v425_v3  ;;  %v2061_v60 = vcombine.low %v430_v54, %v430_v54  ;;  %v367_v61 = vld [vmem:[%s2574_s4 + $0x70] sm:$0xff] }
  0x5e   : > { %v383_v62 = vld [vmem:[%s2574_s4 + $0xf0] sm:$0xff] }
  0x5f   : > { %2072 = vmatmul.mubr.msk.bf16.vlgmr.msra.gmra.mrb[4].mxu0 %vm839_vm1, %v2601_v52  ;;  %2074 = vmatmul.mubr.msk.bf16.vlgmr.msra.gmra.mrb[4].mxu1 %vm839_vm1, %v2601_v52  ;;  %v923_v3 = vsel %vm843_vm0, %v2061_v60, 0 }
  0x60   : > { %1105 = vmatpush1.bf16.msra.mxu0 %v1979_v13  ;;  %1146 = vmatpush1.bf16.msra.mxu1 %v1981_v14  ;;  %v364_v13 = vld [vmem:[%s2574_s4 + $0x58] sm:$0xff] }
  0x61   : > { %1106 = vmatprep.subr.bf16.mxu0 %v2012_v15  ;;  %1147 = vmatprep.subr.bf16.mxu1 %v2014_v17  ;;  %v380_v14 = vld [vmem:[%s2574_s4 + $0xd8] sm:$0xff]  ;;  %v893_v15 = vsel %vm843_vm0, %v2051_v8, 0  ;;  %v1992_v17 = vcombine.high %v363_v11, %v379_v12 }
  0x62   : > { %1136 = vmatprep.mubr.bf16.mxu0 %v2346_v16  ;;  %1177 = vmatprep.mubr.bf16.mxu1 %v2346_v16  ;;  %v1994_v19 = vcombine.high %v364_v13, %v380_v14  ;;  %v1993_v25 = vcombine.low %v364_v13, %v380_v14  ;;  %v416_v8 = vld [vmem:[%s2574_s4 + $0x1f8] sm:$0xff]  ;;  %v431_v13 = vld [vmem:[%s2574_s4 + $0x270] sm:$0x33] }
  0x63   : > { %v432_v14 = vld [vmem:[%s2574_s4 + $0x278] sm:$0x33] }
  0x64   : > { %1107 = vmatpush1.bf16.msra.mxu0 %v2011_v20  ;;  %1148 = vmatpush1.bf16.msra.mxu1 %v2013_v21  ;;  %v395_v20 = vld [vmem:[%s2574_s4 + $0x150] sm:$0xff] }
  0x65   : > { %2075 = vmatprep.subr.msk.bf16.mxu0 %vm843_vm0, %v2044_v22  ;;  %2077 = vmatprep.subr.msk.bf16.mxu1 %vm843_vm0, %v2046_v24  ;;  %v411_v21 = vld [vmem:[%s2574_s4 + $0x1d0] sm:$0xff]  ;;  %v396_v22 = vld [vmem:[%s2574_s4 + $0x158] sm:$0xff]  ;;  %v1991_v24 = vcombine.low %v363_v11, %v379_v12 }
  0x66   : > { %v2024_v26 = vcombine.high %v395_v20, %v411_v21  ;;  %v2026_v27 = vcombine.high %v396_v22, %v412_v23 }
  0x68   : > { %1109 = vmatpush1.bf16.msra.mxu0 %v869_v30  ;;  %1150 = vmatpush1.bf16.msra.mxu1 %v875_v32  ;;  %v2023_v30 = vcombine.low %v395_v20, %v411_v21  ;;  %v2056_v32 = vcombine.high %v427_v28, %v427_v28  ;;  %v2066_v20 = vcombine.high %v432_v14, %v432_v14 }
  0x69   : > { %1186 = vmatprep.subr.bf16.mxu0 %v1984_v31  ;;  %1227 = vmatprep.subr.bf16.mxu1 %v1986_v33  ;;  %v2025_v31 = vcombine.low %v396_v22, %v412_v23  ;;  %v2055_v33 = vcombine.low %v427_v28, %v427_v28  ;;  %v2065_v21 = vcombine.low %v432_v14, %v432_v14 }
  0x6b   : > { %2076 = vmatmul.mubr.msk.bf16.vlgmr.msra.gmra.mrb[8].mxu0 %vm839_vm1, %v2601_v52  ;;  %2078 = vmatmul.mubr.msk.bf16.vlgmr.msra.gmra.mrb[8].mxu1 %vm839_vm1, %v2601_v52  ;;  %v935_v23 = vsel %vm843_vm0, %v2065_v21, 0 }
  0x6c   : > { %1187 = vmatpush1.bf16.msra.mxu0 %v1983_v38  ;;  %1228 = vmatpush1.bf16.msra.mxu1 %v1985_v39  ;;  %v366_v38 = vld [vmem:[%s2574_s4 + $0x68] sm:$0xff] }
  0x6d   : > { %1188 = vmatprep.subr.bf16.mxu0 %v2016_v40  ;;  %1229 = vmatprep.subr.bf16.mxu1 %v2018_v41  ;;  %v382_v39 = vld [vmem:[%s2574_s4 + $0xe8] sm:$0xff]  ;;  %v905_v40 = vsel %vm843_vm0, %v2055_v33, 0  ;;  %v1996_v41 = vcombine.high %v365_v36, %v381_v37 }
  0x6e   : > { %1218 = vmatprep.mubr.bf16.mxu0 %v2346_v16  ;;  %1259 = vmatprep.mubr.bf16.mxu1 %v2346_v16  ;;  %v1998_v43 = vcombine.high %v366_v38, %v382_v39  ;;  %v1997_v49 = vcombine.low %v366_v38, %v382_v39 }
  0x70   : > { %1189 = vmatpush1.bf16.msra.mxu0 %v2015_v44  ;;  %1230 = vmatpush1.bf16.msra.mxu1 %v2017_v45  ;;  %v397_v44 = vld [vmem:[%s2574_s4 + $0x160] sm:$0xff] }
  0x71   : > { %2079 = vmatprep.subr.msk.bf16.mxu0 %vm843_vm0, %v2048_v46  ;;  %2081 = vmatprep.subr.msk.bf16.mxu1 %vm843_vm0, %v2050_v48  ;;  %v413_v45 = vld [vmem:[%s2574_s4 + $0x1e0] sm:$0xff]  ;;  %v398_v46 = vld [vmem:[%s2574_s4 + $0x168] sm:$0xff]  ;;  %v1995_v48 = vcombine.low %v365_v36, %v381_v37 }
  0x72   : > { %v2028_v50 = vcombine.high %v397_v44, %v413_v45  ;;  %v2030_v51 = vcombine.high %v398_v46, %v414_v47 }
  0x74   : > { %1191 = vmatpush1.bf16.msra.mxu0 %v881_v55  ;;  %1232 = vmatpush1.bf16.msra.mxu1 %v887_v57  ;;  %v2027_v55 = vcombine.low %v397_v44, %v413_v45  ;;  %v2060_v57 = vcombine.high %v429_v53, %v429_v53 }
  0x75   : > { %1268 = vmatprep.subr.bf16.mxu0 %v1988_v56  ;;  %1309 = vmatprep.subr.bf16.mxu1 %v1990_v58  ;;  %v2029_v56 = vcombine.low %v398_v46, %v414_v47  ;;  %v2059_v58 = vcombine.low %v429_v53, %v429_v53 }
  0x77   : > { %2080 = vmatmul.mubr.msk.bf16.vlgmr.msra.gmra.mrb[12].mxu0 %vm839_vm1, %v2601_v52  ;;  %2082 = vmatmul.mubr.msk.bf16.vlgmr.msra.gmra.mrb[12].mxu1 %vm839_vm1, %v2601_v52 }
  0x78   : > { %1269 = vmatpush1.bf16.msra.mxu0 %v1987_v63  ;;  %1310 = vmatpush1.bf16.msra.mxu1 %v1989_v0  ;;  %v368_v63 = vld [vmem:[%s2574_s4 + $0x78] sm:$0xff] }
  0x79   : > { %1270 = vmatprep.subr.bf16.mxu0 %v2020_v1  ;;  %1311 = vmatprep.subr.bf16.mxu1 %v2022_v2  ;;  %v384_v0 = vld [vmem:[%s2574_s4 + $0xf8] sm:$0xff]  ;;  %v917_v1 = vsel %vm843_vm0, %v2059_v58, 0  ;;  %v2000_v2 = vcombine.high %v367_v61, %v383_v62 }
  0x7a   : > { %1300 = vmatprep.mubr.bf16.mxu0 %v2346_v16  ;;  %1341 = vmatprep.mubr.bf16.mxu1 %v2346_v16  ;;  %v2002_v4 = vcombine.high %v368_v63, %v384_v0  ;;  %v2001_v10 = vcombine.low %v368_v63, %v384_v0 }
  0x7c   : > { %1271 = vmatpush1.bf16.msra.mxu0 %v2019_v5  ;;  %1312 = vmatpush1.bf16.msra.mxu1 %v2021_v6  ;;  %v399_v5 = vld [vmem:[%s2574_s4 + $0x170] sm:$0xff] }
  0x7d   : > { %2083 = vmatprep.subr.msk.bf16.mxu0 %vm843_vm0, %v2052_v7  ;;  %2085 = vmatprep.subr.msk.bf16.mxu1 %vm843_vm0, %v2054_v9  ;;  %v415_v6 = vld [vmem:[%s2574_s4 + $0x1f0] sm:$0xff]  ;;  %v400_v7 = vld [vmem:[%s2574_s4 + $0x178] sm:$0xff]  ;;  %v1999_v9 = vcombine.low %v367_v61, %v383_v62 }
  0x7e   : > { %v2032_v11 = vcombine.high %v399_v5, %v415_v6  ;;  %v2034_v12 = vcombine.high %v400_v7, %v416_v8 }
  0x80   : > { %1273 = vmatpush1.bf16.msra.mxu0 %v893_v15  ;;  %1314 = vmatpush1.bf16.msra.mxu1 %v899_v18  ;;  %v2031_v15 = vcombine.low %v399_v5, %v415_v6  ;;  %v2064_v18 = vcombine.high %v431_v13, %v431_v13 }
  0x81   : > { %1350 = vmatprep.subr.bf16.mxu0 %v1992_v17  ;;  %1391 = vmatprep.subr.bf16.mxu1 %v1994_v19  ;;  %v2033_v17 = vcombine.low %v400_v7, %v416_v8  ;;  %v2063_v19 = vcombine.low %v431_v13, %v431_v13 }
  0x83   : > { %2084 = vmatmul.mubr.msk.bf16.vlgmr.msra.gmra.mrb[16].mxu0 %vm839_vm1, %v2601_v52  ;;  %2086 = vmatmul.mubr.msk.bf16.vlgmr.msra.gmra.mrb[16].mxu1 %vm839_vm1, %v2601_v52  ;;  %v929_v22 = vsel %vm843_vm0, %v2063_v19, 0 }
  0x84   : > { %1351 = vmatpush1.bf16.msra.mxu0 %v1991_v24  ;;  %1392 = vmatpush1.bf16.msra.mxu1 %v1993_v25 }
  0x85   : > { %1352 = vmatprep.subr.bf16.mxu0 %v2024_v26  ;;  %1393 = vmatprep.subr.bf16.mxu1 %v2026_v27 }
  0x86   : > { %1382 = vmatprep.mubr.bf16.mxu0 %v2346_v16  ;;  %1423 = vmatprep.mubr.bf16.mxu1 %v2346_v16 }
  0x88   : > { %1353 = vmatpush1.bf16.msra.mxu0 %v2023_v30  ;;  %1394 = vmatpush1.bf16.msra.mxu1 %v2025_v31 }
  0x89   : > { %2087 = vmatprep.subr.msk.bf16.mxu0 %vm843_vm0, %v2056_v32  ;;  %2089 = vmatprep.subr.msk.bf16.mxu1 %vm843_vm0, %v2058_v34 }
  0x8c   : > { %1355 = vmatpush1.bf16.msra.mxu0 %v905_v40  ;;  %1396 = vmatpush1.bf16.msra.mxu1 %v911_v42 }
  0x8d   : > { %1432 = vmatprep.subr.bf16.mxu0 %v1996_v41  ;;  %1473 = vmatprep.subr.bf16.mxu1 %v1998_v43 }
  0x8f   : > { %2088 = vmatmul.mubr.msk.bf16.vlgmr.msra.gmra.mrb[20].mxu0 %vm839_vm1, %v2601_v52  ;;  %2090 = vmatmul.mubr.msk.bf16.vlgmr.msra.gmra.mrb[20].mxu1 %vm839_vm1, %v2601_v52 }
  0x90   : > { %1433 = vmatpush1.bf16.msra.mxu0 %v1995_v48  ;;  %1474 = vmatpush1.bf16.msra.mxu1 %v1997_v49 }
  0x91   : > { %1434 = vmatprep.subr.bf16.mxu0 %v2028_v50  ;;  %1475 = vmatprep.subr.bf16.mxu1 %v2030_v51 }
  0x92   : > { %1464 = vmatprep.mubr.bf16.mxu0 %v2346_v16  ;;  %1505 = vmatprep.mubr.bf16.mxu1 %v2346_v16 }
  0x94   : > { %1435 = vmatpush1.bf16.msra.mxu0 %v2027_v55  ;;  %1476 = vmatpush1.bf16.msra.mxu1 %v2029_v56 }
  0x95   : > { %2091 = vmatprep.subr.msk.bf16.mxu0 %vm843_vm0, %v2060_v57  ;;  %2093 = vmatprep.subr.msk.bf16.mxu1 %vm843_vm0, %v2062_v59 }
  0x98   : > { %1437 = vmatpush1.bf16.msra.mxu0 %v917_v1  ;;  %1478 = vmatpush1.bf16.msra.mxu1 %v923_v3 }
  0x99   : > { %1514 = vmatprep.subr.bf16.mxu0 %v2000_v2  ;;  %1555 = vmatprep.subr.bf16.mxu1 %v2002_v4 }
  0x9b   : > { %2092 = vmatmul.mubr.msk.bf16.vlgmr.msra.gmra.mrb[24].mxu0 %vm839_vm1, %v2601_v52  ;;  %2094 = vmatmul.mubr.msk.bf16.vlgmr.msra.gmra.mrb[24].mxu1 %vm839_vm1, %v2601_v52 }
  0x9c   : > { %1515 = vmatpush1.bf16.msra.mxu0 %v1999_v9  ;;  %1556 = vmatpush1.bf16.msra.mxu1 %v2001_v10 }
  0x9d   : > { %1516 = vmatprep.subr.bf16.mxu0 %v2032_v11  ;;  %1557 = vmatprep.subr.bf16.mxu1 %v2034_v12 }
  0x9e   : > { %1546 = vmatprep.mubr.bf16.mxu0 %v2346_v16  ;;  %1587 = vmatprep.mubr.bf16.mxu1 %v2346_v16 }
  0xa0   : > { %1517 = vmatpush1.bf16.msra.mxu0 %v2031_v15  ;;  %1558 = vmatpush1.bf16.msra.mxu1 %v2033_v17 }
  0xa1   : > { %2095 = vmatprep.subr.msk.bf16.mxu0 %vm843_vm0, %v2064_v18  ;;  %2097 = vmatprep.subr.msk.bf16.mxu1 %vm843_vm0, %v2066_v20 }
  0xa4   : > { %1519 = vmatpush1.bf16.msra.mxu0 %v929_v22  ;;  %1560 = vmatpush1.bf16.msra.mxu1 %v935_v23 }
  0xa7   : > { %2096 = vmatmul.mubr.msk.bf16.vlgmr.msra.gmra.mrb[28].mxu0 %vm839_vm1, %v2601_v52  ;;  %2098 = vmatmul.mubr.msk.bf16.vlgmr.msra.gmra.mrb[28].mxu1 %vm839_vm1, %v2601_v52 }
  0xc0   : > { %v2739_v24 = vpop.permute.xlu0 %436 }
 0x126   : > { %v974_v16 = vpop.f32.mrb[0].mxu0  ;;  %v1015_v26 = vpop.f32.mrb[0].mxu1 }
 0x127   : > { %v2742_v25 = vadd.f32 %v974_v16, %v2739_v24  ;;  %v976_v27 = vpop.f32.mrb[1].mxu0  ;;  %v2745_v28 = vadd.f32 %v1015_v26, %v2739_v24  ;;  %v1017_v30 = vpop.f32.mrb[1].mxu1 }
 0x128   : > { %v2748_v29 = vadd.f32 %v976_v27, %v2739_v24  ;;  %v978_v31 = vpop.f32.mrb[2].mxu0  ;;  %v2752_v52 = vadd.f32 %v1017_v30, %v2739_v24  ;;  %v1019_v33 = vpop.f32.mrb[2].mxu1 }
 0x129   : > { %v2099_v32 = vmul.f32 -1.442695, %v2742_v25  ;;  %v979_v34 = vpop.f32.mrb[3].mxu0  ;;  %v2101_v35 = vmul.f32 -1.442695, %v2745_v28  ;;  %v1020_v37 = vpop.f32.mrb[3].mxu1 }
 0x12a   : > { %v2100_v36 = vmul.f32 -1.442695, %v2748_v29  ;;  %v2102_v38 = vmul.f32 -1.442695, %v2752_v52 }
 0x12b   : > { %2194 = vpow2.f32 %v2099_v32 }
 0x12c   : > { %2196 = vpow2.f32 %v2101_v35 }
 0x12d   : > { %2198 = vpow2.f32 %v2100_v36 }
 0x12e   : > { %2200 = vpow2.f32 %v2102_v38 }
 0x132   : > { %v1056_v39 = vpop.f32.mrb[4].mxu0  ;;  %v1097_v41 = vpop.f32.mrb[4].mxu1 }
 0x133   : > { %v2758_v40 = vadd.f32 %v1056_v39, %v2739_v24  ;;  %v1058_v42 = vpop.f32.mrb[5].mxu0  ;;  %v2761_v43 = vadd.f32 %v1097_v41, %v2739_v24  ;;  %v1099_v44 = vpop.f32.mrb[5].mxu1 }
 0x134   : > { %v1060_v45 = vpop.f32.mrb[6].mxu0  ;;  %v2765_v48 = vadd.f32 %v1058_v42, %v2739_v24  ;;  %v1101_v49 = vpop.f32.mrb[6].mxu1  ;;  %v2768_v54 = vadd.f32 %v1099_v44, %v2739_v24 }
 0x135   : > { %v2195_v46 = vpop.eup %2194  ;;  %v2103_v47 = vmul.f32 -1.442695, %v2758_v40  ;;  %v1061_v50 = vpop.f32.mrb[7].mxu0  ;;  %v2105_v60 = vmul.f32 -1.442695, %v2761_v43 }
 0x136   : > { %v2197_v51 = vpop.eup %2196  ;;  %v1692_v53 = vadd.f32 1.0, %v2195_v46  ;;  %v1102_v55 = vpop.f32.mrb[7].mxu1  ;;  %v2104_v62 = vmul.f32 -1.442695, %v2765_v48  ;;  %v2106_v63 = vmul.f32 -1.442695, %v2768_v54 }
 0x137   : > { %v2199_v56 = vpop.eup %2198  ;;  %v1694_v57 = vadd.f32 1.0, %v2197_v51  ;;  %2202 = vpow2.f32 %v2103_v47 }
 0x138   : > { %v2201_v58 = vpop.eup %2200  ;;  %2204 = vrcp.f32 %v1692_v53  ;;  %v1693_v59 = vadd.f32 1.0, %v2199_v56 }
 0x139   : > { %2206 = vrcp.f32 %v1694_v57  ;;  %v1695_v61 = vadd.f32 1.0, %v2201_v58 }
 0x13a   : > { %2208 = vrcp.f32 %v1693_v59 }
 0x13b   : > { %2210 = vrcp.f32 %v1695_v61 }
 0x13c   : > { %2212 = vpow2.f32 %v2105_v60 }
 0x13d   : > { %2214 = vpow2.f32 %v2104_v62 }
 0x13e   : > { %2216 = vpow2.f32 %v2106_v63  ;;  %v1138_v0 = vpop.f32.mrb[8].mxu0  ;;  %v1179_v2 = vpop.f32.mrb[8].mxu1 }
 0x13f   : > { %v2778_v1 = vadd.f32 %v1138_v0, %v2739_v24  ;;  %v1140_v3 = vpop.f32.mrb[9].mxu0  ;;  %v2781_v4 = vadd.f32 %v1179_v2, %v2739_v24  ;;  %v1181_v6 = vpop.f32.mrb[9].mxu1 }
 0x140   : > { %v2784_v5 = vadd.f32 %v1140_v3, %v2739_v24  ;;  %v1142_v7 = vpop.f32.mrb[10].mxu0  ;;  %v2788_v10 = vadd.f32 %v1181_v6, %v2739_v24  ;;  %v1183_v11 = vpop.f32.mrb[10].mxu1 }
 0x141   : > { %v2203_v8 = vpop.eup %2202  ;;  %v2107_v9 = vmul.f32 -1.442695, %v2778_v1  ;;  %v1143_v12 = vpop.f32.mrb[11].mxu0  ;;  %v2109_v15 = vmul.f32 -1.442695, %v2781_v4 }
 0x142   : > { %v2205_v13 = vpop.eup %2204  ;;  %v1696_v14 = vadd.f32 1.0, %v2203_v8  ;;  %v2108_v17 = vmul.f32 -1.442695, %v2784_v5  ;;  %v1184_v18 = vpop.f32.mrb[11].mxu1  ;;  %v2110_v21 = vmul.f32 -1.442695, %v2788_v10 }
 0x143   : > { %v2207_v19 = vpop.eup %2206  ;;  %v1788_v20 = vmul.f32 %v2205_v13, %v2742_v25  ;;  %2218 = vpow2.f32 %v2107_v9 }
 0x144   : > { %v2209_v22 = vpop.eup %2208  ;;  %v1790_v23 = vmul.f32 %v2207_v19, %v2745_v28  ;;  %2220 = vrcp.f32 %v1696_v14 }
 0x145   : > { %v2211_v16 = vpop.eup %2210  ;;  %v1789_v26 = vmul.f32 %v2209_v22, %v2748_v29  ;;  %2222 = vpow2.f32 %v2109_v15 }
 0x146   : > { %v2213_v27 = vpop.eup %2212  ;;  %v1791_v25 = vmul.f32 %v2211_v16, %v2752_v52  ;;  %2224 = vpow2.f32 %v2108_v17 }
 0x147   : > { %v2215_v30 = vpop.eup %2214  ;;  %v1852_v31 = vcombine.low %v1788_v20, %v1789_v26  ;;  %v1698_v32 = vadd.f32 1.0, %v2213_v27  ;;  %2226 = vpow2.f32 %v2110_v21 }
 0x148   : > { %v2217_v28 = vpop.eup %2216  ;;  %v1853_v33 = vcombine.low %v1790_v23, %v1791_v25  ;;  %v1697_v34 = vadd.f32 1.0, %v2215_v30 }
 0x149   : > { %1884 = vst [vmem:[%s2800_s11] sm:$0xff] %v1852_v31  ;;  %2228 = vrcp.f32 %v1698_v32  ;;  %v1699_v29 = vadd.f32 1.0, %v2217_v28 }
 0x14a   : > { %1885 = vst [vmem:[%s2800_s11 + $0x8] sm:$0xff] %v1853_v33  ;;  %2230 = vrcp.f32 %v1697_v34  ;;  %v1220_v35 = vpop.f32.mrb[12].mxu0  ;;  %v1261_v37 = vpop.f32.mrb[12].mxu1 }
 0x14b   : > { %2232 = vrcp.f32 %v1699_v29  ;;  %v2806_v36 = vadd.f32 %v1220_v35, %v2739_v24  ;;  %v1222_v52 = vpop.f32.mrb[13].mxu0  ;;  %v2809_v38 = vadd.f32 %v1261_v37, %v2739_v24  ;;  %v1263_v39 = vpop.f32.mrb[13].mxu1 }
 0x14c   : > { %v1224_v41 = vpop.f32.mrb[14].mxu0  ;;  %v2813_v45 = vadd.f32 %v1222_v52, %v2739_v24  ;;  %v1265_v46 = vpop.f32.mrb[14].mxu1  ;;  %v2817_v53 = vadd.f32 %v1263_v39, %v2739_v24 }
 0x14d   : > { %v2219_v42 = vpop.eup %2218  ;;  %v2111_v44 = vmul.f32 -1.442695, %v2806_v36  ;;  %v1225_v47 = vpop.f32.mrb[15].mxu0  ;;  %v2113_v51 = vmul.f32 -1.442695, %v2809_v38 }
 0x14e   : > { %v2221_v49 = vpop.eup %2220  ;;  %v1700_v50 = vadd.f32 1.0, %v2219_v42  ;;  %v1266_v55 = vpop.f32.mrb[15].mxu1  ;;  %v2112_v61 = vmul.f32 -1.442695, %v2813_v45  ;;  %v2114_v63 = vmul.f32 -1.442695, %v2817_v53 }
 0x14f   : > { %v2223_v56 = vpop.eup %2222  ;;  %2234 = vpow2.f32 %v2111_v44  ;;  %v1792_v2 = vmul.f32 %v2221_v49, %v2758_v40 }
 0x150   : > { %v2225_v57 = vpop.eup %2224  ;;  %2236 = vrcp.f32 %v1700_v50  ;;  %v1702_v58 = vadd.f32 1.0, %v2223_v56 }
 0x151   : > { %v2227_v59 = vpop.eup %2226  ;;  %v1701_v60 = vadd.f32 1.0, %v2225_v57  ;;  %2238 = vpow2.f32 %v2113_v51 }
 0x152   : > { %2240 = vrcp.f32 %v1702_v58  ;;  %v1703_v62 = vadd.f32 1.0, %v2227_v59 }
 0x153   : > { %v2229_v0 = vpop.eup %2228  ;;  %2242 = vrcp.f32 %v1701_v60 }
 0x154   : > { %v2231_v3 = vpop.eup %2230  ;;  %v1794_v6 = vmul.f32 %v2229_v0, %v2761_v43  ;;  %2244 = vrcp.f32 %v1703_v62 }
 0x155   : > { %v2233_v7 = vpop.eup %2232  ;;  %v1793_v8 = vmul.f32 %v2231_v3, %v2765_v48  ;;  %2246 = vpow2.f32 %v2112_v61 }
 0x156   : > { %v1795_v9 = vmul.f32 %v2233_v7, %v2768_v54  ;;  %2248 = vpow2.f32 %v2114_v63  ;;  %v1302_v11 = vpop.f32.mrb[16].mxu0  ;;  %v1343_v40 = vpop.f32.mrb[16].mxu1 }
 0x157   : > { %v1854_v12 = vcombine.low %v1792_v2, %v1793_v8  ;;  %v2826_v13 = vadd.f32 %v1302_v11, %v2739_v24  ;;  %v1304_v14 = vpop.f32.mrb[17].mxu0  ;;  %v2829_v43 = vadd.f32 %v1343_v40, %v2739_v24  ;;  %v1345_v48 = vpop.f32.mrb[17].mxu1 }
 0x158   : > { %v1855_v15 = vcombine.low %v1794_v6, %v1795_v9  ;;  %v2832_v17 = vadd.f32 %v1304_v14, %v2739_v24  ;;  %v1306_v18 = vpop.f32.mrb[18].mxu0  ;;  %v2837_v20 = vadd.f32 %v1345_v48, %v2739_v24  ;;  %v1347_v21 = vpop.f32.mrb[18].mxu1 }
 0x159   : > { %v2235_v19 = vpop.eup %2234  ;;  %1886 = vst [vmem:[%s2800_s11 + $0x10] sm:$0xff] %v1854_v12  ;;  %v2115_v54 = vmul.f32 -1.442695, %v2826_v13  ;;  %v1307_v22 = vpop.f32.mrb[19].mxu0  ;;  %v2117_v26 = vmul.f32 -1.442695, %v2829_v43 }
 0x15a   : > { %v2237_v23 = vpop.eup %2236  ;;  %1887 = vst [vmem:[%s2800_s11 + $0x18] sm:$0xff] %v1855_v15  ;;  %v1704_v16 = vadd.f32 1.0, %v2235_v19  ;;  %v1348_v27 = vpop.f32.mrb[19].mxu1  ;;  %v2116_v30 = vmul.f32 -1.442695, %v2832_v17 }
 0x15b   : > { %v2239_v25 = vpop.eup %2238  ;;  %2250 = vpow2.f32 %v2115_v54  ;;  %v1796_v32 = vmul.f32 %v2237_v23, %v2778_v1  ;;  %v2118_v33 = vmul.f32 -1.442695, %v2837_v20 }
 0x15c   : > { %v2241_v31 = vpop.eup %2240  ;;  %2252 = vrcp.f32 %v1704_v16  ;;  %v1706_v28 = vadd.f32 1.0, %v2239_v25 }
 0x15d   : > { %v2243_v34 = vpop.eup %2242  ;;  %v1798_v29 = vmul.f32 %v2241_v31, %v2781_v4  ;;  %2254 = vpow2.f32 %v2117_v26 }
 0x15e   : > { %v2245_v35 = vpop.eup %2244  ;;  %v1797_v37 = vmul.f32 %v2243_v34, %v2784_v5  ;;  %2256 = vrcp.f32 %v1706_v28 }
 0x15f   : > { %v2247_v52 = vpop.eup %2246  ;;  %v1799_v39 = vmul.f32 %v2245_v35, %v2788_v10  ;;  %2258 = vpow2.f32 %v2116_v30 }
 0x160   : > { %v2249_v41 = vpop.eup %2248  ;;  %v1856_v1 = vcombine.low %v1796_v32, %v1797_v37  ;;  %v1705_v42 = vadd.f32 1.0, %v2247_v52  ;;  %2260 = vpow2.f32 %v2118_v33 }
 0x161   : > { %v1857_v44 = vcombine.low %v1798_v29, %v1799_v39  ;;  %v1707_v46 = vadd.f32 1.0, %v2249_v41 }
 0x162   : > { %1888 = vst [vmem:[%s2800_s11 + $0x20] sm:$0xff] %v1856_v1  ;;  %2262 = vrcp.f32 %v1705_v42  ;;  %v1384_v47 = vpop.f32.mrb[20].mxu0  ;;  %v1425_v5 = vpop.f32.mrb[20].mxu1 }
 0x163   : > { %1889 = vst [vmem:[%s2800_s11 + $0x28] sm:$0xff] %v1857_v44  ;;  %2264 = vrcp.f32 %v1707_v46  ;;  %v2850_v4 = vadd.f32 %v1384_v47, %v2739_v24  ;;  %v1386_v49 = vpop.f32.mrb[21].mxu0  ;;  %v2853_v50 = vadd.f32 %v1425_v5, %v2739_v24  ;;  %v1427_v51 = vpop.f32.mrb[21].mxu1 }
 0x164   : > { %v2856_v10 = vadd.f32 %v1386_v49, %v2739_v24  ;;  %v1388_v55 = vpop.f32.mrb[22].mxu0  ;;  %v1429_v58 = vpop.f32.mrb[22].mxu1  ;;  %v2861_v63 = vadd.f32 %v1427_v51, %v2739_v24 }
 0x165   : > { %v2251_v56 = vpop.eup %2250  ;;  %v2119_v57 = vmul.f32 -1.442695, %v2850_v4  ;;  %v1389_v59 = vpop.f32.mrb[23].mxu0  ;;  %v2121_v62 = vmul.f32 -1.442695, %v2853_v50 }
 0x166   : > { %v2253_v60 = vpop.eup %2252  ;;  %v1708_v61 = vadd.f32 1.0, %v2251_v56  ;;  %v1430_v0 = vpop.f32.mrb[23].mxu1  ;;  %v2120_v3 = vmul.f32 -1.442695, %v2856_v10  ;;  %v2122_v12 = vmul.f32 -1.442695, %v2861_v63 }
 0x167   : > { %v2255_v2 = vpop.eup %2254  ;;  %2266 = vpow2.f32 %v2119_v57  ;;  %v1800_v40 = vmul.f32 %v2253_v60, %v2806_v36 }
 0x168   : > { %v2257_v6 = vpop.eup %2256  ;;  %2268 = vrcp.f32 %v1708_v61  ;;  %v1710_v7 = vadd.f32 1.0, %v2255_v2 }
 0x169   : > { %v2259_v8 = vpop.eup %2258  ;;  %2270 = vpow2.f32 %v2121_v62  ;;  %v1802_v48 = vmul.f32 %v2257_v6, %v2809_v38 }
 0x16a   : > { %v2261_v9 = vpop.eup %2260  ;;  %2272 = vrcp.f32 %v1710_v7  ;;  %v1709_v11 = vadd.f32 1.0, %v2259_v8 }
 0x16b   : > { %v1711_v14 = vadd.f32 1.0, %v2261_v9  ;;  %2274 = vpow2.f32 %v2120_v3 }
 0x16c   : > { %v2263_v15 = vpop.eup %2262  ;;  %2276 = vrcp.f32 %v1709_v11 }
 0x16d   : > { %v2265_v18 = vpop.eup %2264  ;;  %v1801_v19 = vmul.f32 %v2263_v15, %v2813_v45  ;;  %2278 = vrcp.f32 %v1711_v14 }
 0x16e   : > { %v1803_v54 = vmul.f32 %v2265_v18, %v2817_v53  ;;  %2280 = vpow2.f32 %v2122_v12  ;;  %v1466_v21 = vpop.f32.mrb[24].mxu0  ;;  %v1507_v36 = vpop.f32.mrb[24].mxu1 }
 0x16f   : > { %v1858_v22 = vcombine.low %v1800_v40, %v1801_v19  ;;  %v2870_v23 = vadd.f32 %v1466_v21, %v2739_v24  ;;  %v1468_v16 = vpop.f32.mrb[25].mxu0  ;;  %v2873_v38 = vadd.f32 %v1507_v36, %v2739_v24  ;;  %v1509_v45 = vpop.f32.mrb[25].mxu1 }
 0x170   : > { %v1859_v26 = vcombine.low %v1802_v48, %v1803_v54  ;;  %v2876_v27 = vadd.f32 %v1468_v16, %v2739_v24  ;;  %v1470_v25 = vpop.f32.mrb[26].mxu0  ;;  %v2881_v31 = vadd.f32 %v1509_v45, %v2739_v24  ;;  %v1511_v32 = vpop.f32.mrb[26].mxu1 }
 0x171   : > { %v2267_v30 = vpop.eup %2266  ;;  %1890 = vst [vmem:[%s2800_s11 + $0x30] sm:$0xff] %v1858_v22  ;;  %v2123_v53 = vmul.f32 -1.442695, %v2870_v23  ;;  %v1471_v28 = vpop.f32.mrb[27].mxu0  ;;  %v2125_v29 = vmul.f32 -1.442695, %v2873_v38 }
 0x172   : > { %v2269_v33 = vpop.eup %2268  ;;  %1891 = vst [vmem:[%s2800_s11 + $0x38] sm:$0xff] %v1859_v26  ;;  %v1712_v34 = vadd.f32 1.0, %v2267_v30  ;;  %v1512_v35 = vpop.f32.mrb[27].mxu1  ;;  %v2124_v52 = vmul.f32 -1.442695, %v2876_v27 }
 0x173   : > { %v2271_v37 = vpop.eup %2270  ;;  %2282 = vpow2.f32 %v2123_v53  ;;  %v1804_v42 = vmul.f32 %v2269_v33, %v2826_v13  ;;  %v2126_v44 = vmul.f32 -1.442695, %v2881_v31 }
 0x174   : > { %v2273_v39 = vpop.eup %2272  ;;  %2284 = vrcp.f32 %v1712_v34  ;;  %v1714_v41 = vadd.f32 1.0, %v2271_v37 }
 0x175   : > { %v2275_v1 = vpop.eup %2274  ;;  %2286 = vpow2.f32 %v2125_v29  ;;  %v1806_v47 = vmul.f32 %v2273_v39, %v2829_v43 }
 0x176   : > { %v2277_v46 = vpop.eup %2276  ;;  %2288 = vrcp.f32 %v1714_v41  ;;  %v1713_v5 = vadd.f32 1.0, %v2275_v1 }
 0x177   : > { %v2279_v49 = vpop.eup %2278  ;;  %v1805_v51 = vmul.f32 %v2277_v46, %v2832_v17  ;;  %2290 = vpow2.f32 %v2124_v52 }
 0x178   : > { %v2281_v55 = vpop.eup %2280  ;;  %v1807_v56 = vmul.f32 %v2279_v49, %v2837_v20  ;;  %2292 = vrcp.f32 %v1713_v5 }
 0x179   : > { %v1860_v57 = vcombine.low %v1804_v42, %v1805_v51  ;;  %v1715_v13 = vadd.f32 1.0, %v2281_v55  ;;  %2294 = vpow2.f32 %v2126_v44 }
 0x17a   : > { %v1861_v58 = vcombine.low %v1806_v47, %v1807_v56  ;;  %v1548_v59 = vpop.f32.mrb[28].mxu0  ;;  %v1589_v60 = vpop.f32.mrb[28].mxu1 }
 0x17b   : > { %1892 = vst [vmem:[%s2800_s11 + $0x40] sm:$0xff] %v1860_v57  ;;  %2296 = vrcp.f32 %v1715_v13  ;;  %v2893_v43 = vadd.f32 %v1548_v59, %v2739_v24  ;;  %v1550_v61 = vpop.f32.mrb[29].mxu0  ;;  %v2897_v17 = vadd.f32 %v1589_v60, %v2739_v24  ;;  %v1591_v20 = vpop.f32.mrb[29].mxu1 }
 0x17c   : > { %1893 = vst [vmem:[%s2800_s11 + $0x48] sm:$0xff] %v1861_v58  ;;  %v2900_v62 = vadd.f32 %v1550_v61, %v2739_v24  ;;  %v1552_v0 = vpop.f32.mrb[30].mxu0  ;;  %v2904_v6 = vadd.f32 %v1591_v20, %v2739_v24  ;;  %v1593_v7 = vpop.f32.mrb[30].mxu1 }
 0x17d   : > { %v2283_v2 = vpop.eup %2282  ;;  %v2127_v3 = vmul.f32 -1.442695, %v2893_v43  ;;  %v1553_v8 = vpop.f32.mrb[31].mxu0  ;;  %v2129_v12 = vmul.f32 -1.442695, %v2897_v17 }
 0x17e   : > { %v2285_v9 = vpop.eup %2284  ;;  %v1716_v11 = vadd.f32 1.0, %v2283_v2  ;;  %v1594_v40 = vpop.f32.mrb[31].mxu1  ;;  %v2128_v15 = vmul.f32 -1.442695, %v2900_v62  ;;  %v2130_v24 = vmul.f32 -1.442695, %v2904_v6 }
 0x17f   : > { %v2287_v14 = vpop.eup %2286  ;;  %2298 = vpow2.f32 %v2127_v3  ;;  %v1808_v54 = vmul.f32 %v2285_v9, %v2850_v4 }
 0x180   : > { %v2289_v48 = vpop.eup %2288  ;;  %2300 = vrcp.f32 %v1716_v11  ;;  %v1718_v18 = vadd.f32 1.0, %v2287_v14 }
 0x181   : > { %v2291_v19 = vpop.eup %2290  ;;  %2302 = vpow2.f32 %v2129_v12  ;;  %v1810_v26 = vmul.f32 %v2289_v48, %v2853_v50 }
 0x182   : > { %v2293_v21 = vpop.eup %2292  ;;  %2304 = vrcp.f32 %v1718_v18  ;;  %v1717_v22 = vadd.f32 1.0, %v2291_v19 }
 0x183   : > { %v2295_v36 = vpop.eup %2294  ;;  %v1809_v16 = vmul.f32 %v2293_v21, %v2856_v10  ;;  %2306 = vpow2.f32 %v2128_v15 }
 0x184   : > { %2308 = vrcp.f32 %v1717_v22  ;;  %v1719_v45 = vadd.f32 1.0, %v2295_v36 }
 0x185   : > { %v2297_v25 = vpop.eup %2296  ;;  %v1862_v30 = vcombine.low %v1808_v54, %v1809_v16  ;;  %2310 = vpow2.f32 %v2130_v24 }
 0x186   : > { %v1811_v4 = vmul.f32 %v2297_v25, %v2861_v63  ;;  %2312 = vrcp.f32 %v1719_v45 }
 0x187   : > { %1894 = vst [vmem:[%s2800_s11 + $0x50] sm:$0xff] %v1862_v30 }
 0x188   : > { %v1863_v53 = vcombine.low %v1810_v26, %v1811_v4 }
 0x189   : > { %v2299_v32 = vpop.eup %2298 }
 0x18a   : > { %v2301_v28 = vpop.eup %2300  ;;  %1895 = vst [vmem:[%s2800_s11 + $0x58] sm:$0xff] %v1863_v53  ;;  %v1720_v33 = vadd.f32 1.0, %v2299_v32 }
 0x18b   : > { %v2303_v34 = vpop.eup %2302  ;;  %v1812_v35 = vmul.f32 %v2301_v28, %v2870_v23 }
 0x18c   : > { %v2305_v29 = vpop.eup %2304  ;;  %2314 = vrcp.f32 %v1720_v33  ;;  %v1722_v10 = vadd.f32 1.0, %v2303_v34 }
 0x18d   : > { %v2307_v50 = vpop.eup %2306  ;;  %v1814_v39 = vmul.f32 %v2305_v29, %v2873_v38 }
 0x18e   : > { %v2309_v37 = vpop.eup %2308  ;;  %2316 = vrcp.f32 %v1722_v10  ;;  %v1721_v52 = vadd.f32 1.0, %v2307_v50 }
 0x18f   : > { %v2311_v63 = vpop.eup %2310  ;;  %v1813_v41 = vmul.f32 %v2309_v37, %v2876_v27 }
 0x190   : > { %v2313_v1 = vpop.eup %2312  ;;  %2318 = vrcp.f32 %v1721_v52  ;;  %v1723_v42 = vadd.f32 1.0, %v2311_v63 }
 0x191   : > { %v1864_v44 = vcombine.low %v1812_v35, %v1813_v41  ;;  %v1815_v46 = vmul.f32 %v2313_v1, %v2881_v31 }
 0x192   : > { %2320 = vrcp.f32 %v1723_v42 }
 0x193   : > { %1896 = vst [vmem:[%s2800_s11 + $0x60] sm:$0xff] %v1864_v44  ;;  %v1865_v47 = vcombine.low %v1814_v39, %v1815_v46 }
 0x195   : > { %1897 = vst [vmem:[%s2800_s11 + $0x68] sm:$0xff] %v1865_v47 }
 0x196   : > { %v2315_v23 = vpop.eup %2314 }
 0x197   : > { %v1816_v49 = vmul.f32 %v2315_v23, %v2893_v43 }
 0x198   : > { %v2317_v5 = vpop.eup %2316 }
 0x199   : > { %v1818_v38 = vmul.f32 %v2317_v5, %v2897_v17 }
 0x19a   : > { %v2319_v51 = vpop.eup %2318 }
 0x19b   : > { %v1817_v27 = vmul.f32 %v2319_v51, %v2900_v62 }
 0x19c   : > { %v2321_v55 = vpop.eup %2320 }
 0x19d   : > { %v1866_v56 = vcombine.low %v1816_v49, %v1817_v27  ;;  %v1819_v57 = vmul.f32 %v2321_v55, %v2904_v6 }
 0x19f   : > { %1898 = vst [vmem:[%s2800_s11 + $0x70] sm:$0xff] %v1866_v56  ;;  %v1867_v31 = vcombine.low %v1818_v38, %v1819_v57 }
 0x1a1   : > { %1899 = vst [vmem:[%s2800_s11 + $0x78] sm:$0xff] %v1867_v31 }
 0x1a2 PF: > { %p10_p9 = scmp.ge.s32.totalorder %s2384_s16, 4   ;;  %s2941_s12 = smov %s2340_s13 }
 0x1a3   : > { %s2942_s13 = smov %s2393_s19  ;;  %s2943_s14 = smov %s2384_s16 }
 0x1a4   :  { %12 = sbr.rel (!%p10_p9) target bundleno = 2 (0x2), region = 90 }

// kernel: _lambda_.9
= control target key start
LH: loop header
LB: loop body
LE: loop exit
PB: predicated region body
PF: predicated region fallthrough
CT: control target
= control target key end

     0   :  { %s2547_s15 = smov 0   ;;  %s2549_s16 = smov 0   ;;  %s3142_s0 = inlined_call_operand.vmem [shape: bf16[4,36], index: 0, kind: input, shape index: {}]   ;;  %s3143_s1 = inlined_call_operand.vmem [shape: f32[4,1], index: 1, kind: input, shape index: {}]   ;;  %s3144_s2 = inlined_call_operand.vmem [shape: bf16[36,8192], index: 2, kind: input, shape index: {}]   ;;  %s3145_s3 = inlined_call_operand.vmem [shape: f32[4,8192], index: 3, kind: input, shape index: {}]   ;;  %s3146_s4 = inlined_call_operand.vmem [shape: f32[4,8192], index: 4, kind: output, shape index: {}]  }
   0x1   :  { %s2551_s17 = smov 0  }
   0x2 LB: > { %s2119_s18 = sadd.s32 4294967295, %s2519_s17   ;;  %s2564_s19 = sadd.s32 1, %s2519_s17   ;;  %s2519_s17 = sphi %s2551_s17, %s3149_s17   ;;  %s2515_s16 = sphi %s2549_s16, %s3148_s16   ;;  %s2511_s15 = sphi %s2547_s15, %s3147_s15  }
   0x3   : > { %s60_s20 = ssub.s32 %s2519_s17, %s2564_s19  ;;  %s63_s21 = sadd.s32 1, %s2515_s16 }
   0x4   : > { %p61_p0 = scmp.eq.s32.totalorder %s60_s20, 0  ;;  %p70_p1 = scmp.ne.s32.totalorder %s2515_s16, %s2511_s15 }
   0x5   : > { %p71_p2 = scmp.eq.s32.totalorder %s2519_s17, 0  ;;  %p2122_p4 = scmp.ge.s32.totalorder %s2519_s17, 2 }
   0x6   : > { %s2573_s22 = scalar_select %p61_p0, %s2515_s16, %s63_s21  }
   0x7   : > { %p72_p3 = por %p71_p2, %p70_p1  ;;  %154 = sbr.rel (%p2122_p4) target bundleno = 59 (0x3b), region = 24 }
   0xe   : > { %157 = sbr.rel (!%p72_p3) target bundleno = 59 (0x3b), region = 28  ;;  %s159_s23 = sand.u32 (%p72_p3), 1, %s2515_s16  }
   0xf   : > { %s2292_s24 = sshll.u32 (%p72_p3), %s2519_s17, 7  ;;  %s2293_s25 = smul.u32 (%p72_p3), 640, %s159_s23 }
  0x10   : > { %s2581_s28 = scalar_lea.vmem (%p72_p3), %s3144_s2, %s2292_s24 }
  0x11   : > { %v177_v0 = vld [vmem:[%s2581_s28] sm:$0xff] (%p72_p3)  ;;  %v179_v1 = vld [vmem:[%s2581_s28 + $0x8] sm:$0xff] (%p72_p3)  ;;  %v181_v2 = vld [vmem:[%s2581_s28 + $0x10] sm:$0xff] (%p72_p3)  ;;  %s2589_s29 = scalar_lea.vmem (%p72_p3), [#allocation2], %s2293_s25 }
  0x12   : > { %v183_v3 = vld [vmem:[%s2581_s28 + $0x18] sm:$0xff] (%p72_p3)  ;;  %v185_v4 = vld [vmem:[%s2581_s28 + $0x20] sm:$0xff] (%p72_p3)  ;;  %v187_v5 = vld [vmem:[%s2581_s28 + $0x28] sm:$0xff] (%p72_p3)  ;;  %178 = vst [vmem:[%s2589_s29] sm:$0xff] (%p72_p3), %v177_v0 }
  0x13   : > { %180 = vst [vmem:[%s2589_s29 + $0x8] sm:$0xff] (%p72_p3), %v179_v1  ;;  %182 = vst [vmem:[%s2589_s29 + $0x10] sm:$0xff] (%p72_p3), %v181_v2  ;;  %v189_v6 = vld [vmem:[%s2581_s28 + $0x30] sm:$0xff] (%p72_p3)  ;;  %v191_v7 = vld [vmem:[%s2581_s28 + $0x38] sm:$0xff] (%p72_p3) }
  0x14   : > { %184 = vst [vmem:[%s2589_s29 + $0x18] sm:$0xff] (%p72_p3), %v183_v3  ;;  %186 = vst [vmem:[%s2589_s29 + $0x20] sm:$0xff] (%p72_p3), %v185_v4  ;;  %v193_v8 = vld [vmem:[%s2581_s28 + $0x40] sm:$0xff] (%p72_p3)  ;;  %v195_v9 = vld [vmem:[%s2581_s28 + $0x48] sm:$0xff] (%p72_p3) }
  0x15   : > { %188 = vst [vmem:[%s2589_s29 + $0x28] sm:$0xff] %v187_v5  ;;  %190 = vst [vmem:[%s2589_s29 + $0x30] sm:$0xff] %v189_v6  ;;  %v197_v10 = vld [vmem:[%s2581_s28 + $0x50] sm:$0xff]  ;;  %v199_v11 = vld [vmem:[%s2581_s28 + $0x58] sm:$0xff] }
  0x16   : > { %192 = vst [vmem:[%s2589_s29 + $0x38] sm:$0xff] %v191_v7  ;;  %194 = vst [vmem:[%s2589_s29 + $0x40] sm:$0xff] %v193_v8  ;;  %v201_v12 = vld [vmem:[%s2581_s28 + $0x60] sm:$0xff]  ;;  %v203_v13 = vld [vmem:[%s2581_s28 + $0x68] sm:$0xff] }
  0x17   : > { %196 = vst [vmem:[%s2589_s29 + $0x48] sm:$0xff] %v195_v9  ;;  %198 = vst [vmem:[%s2589_s29 + $0x50] sm:$0xff] %v197_v10  ;;  %v205_v14 = vld [vmem:[%s2581_s28 + $0x70] sm:$0xff]  ;;  %v207_v15 = vld [vmem:[%s2581_s28 + $0x78] sm:$0xff] }
  0x18   : > { %200 = vst [vmem:[%s2589_s29 + $0x58] sm:$0xff] %v199_v11  ;;  %202 = vst [vmem:[%s2589_s29 + $0x60] sm:$0xff] %v201_v12  ;;  %v209_v16 = vld [vmem:[%s2581_s28 + $0x100] sm:$0xff]  ;;  %v211_v17 = vld [vmem:[%s2581_s28 + $0x108] sm:$0xff] }
  0x19   : > { %204 = vst [vmem:[%s2589_s29 + $0x68] sm:$0xff] %v203_v13  ;;  %206 = vst [vmem:[%s2589_s29 + $0x70] sm:$0xff] %v205_v14  ;;  %v213_v18 = vld [vmem:[%s2581_s28 + $0x110] sm:$0xff]  ;;  %v215_v19 = vld [vmem:[%s2581_s28 + $0x118] sm:$0xff] }
  0x1a   : > { %208 = vst [vmem:[%s2589_s29 + $0x78] sm:$0xff] %v207_v15  ;;  %210 = vst [vmem:[%s2589_s29 + $0x80] sm:$0xff] %v209_v16  ;;  %v217_v20 = vld [vmem:[%s2581_s28 + $0x120] sm:$0xff]  ;;  %v219_v21 = vld [vmem:[%s2581_s28 + $0x128] sm:$0xff] }
  0x1b   : > { %212 = vst [vmem:[%s2589_s29 + $0x88] sm:$0xff] %v211_v17  ;;  %214 = vst [vmem:[%s2589_s29 + $0x90] sm:$0xff] %v213_v18  ;;  %v221_v22 = vld [vmem:[%s2581_s28 + $0x130] sm:$0xff]  ;;  %v223_v23 = vld [vmem:[%s2581_s28 + $0x138] sm:$0xff] }
  0x1c   : > { %216 = vst [vmem:[%s2589_s29 + $0x98] sm:$0xff] %v215_v19  ;;  %218 = vst [vmem:[%s2589_s29 + $0xa0] sm:$0xff] %v217_v20  ;;  %v225_v24 = vld [vmem:[%s2581_s28 + $0x140] sm:$0xff]  ;;  %v227_v25 = vld [vmem:[%s2581_s28 + $0x148] sm:$0xff] }
  0x1d   : > { %220 = vst [vmem:[%s2589_s29 + $0xa8] sm:$0xff] %v219_v21  ;;  %222 = vst [vmem:[%s2589_s29 + $0xb0] sm:$0xff] %v221_v22  ;;  %v229_v26 = vld [vmem:[%s2581_s28 + $0x150] sm:$0xff]  ;;  %v231_v27 = vld [vmem:[%s2581_s28 + $0x158] sm:$0xff] }
  0x1e   : > { %224 = vst [vmem:[%s2589_s29 + $0xb8] sm:$0xff] %v223_v23  ;;  %226 = vst [vmem:[%s2589_s29 + $0xc0] sm:$0xff] %v225_v24  ;;  %v233_v28 = vld [vmem:[%s2581_s28 + $0x160] sm:$0xff]  ;;  %v235_v29 = vld [vmem:[%s2581_s28 + $0x168] sm:$0xff] }
  0x1f   : > { %228 = vst [vmem:[%s2589_s29 + $0xc8] sm:$0xff] %v227_v25  ;;  %230 = vst [vmem:[%s2589_s29 + $0xd0] sm:$0xff] %v229_v26  ;;  %v237_v30 = vld [vmem:[%s2581_s28 + $0x170] sm:$0xff]  ;;  %v239_v31 = vld [vmem:[%s2581_s28 + $0x178] sm:$0xff] }
  0x20   : > { %232 = vst [vmem:[%s2589_s29 + $0xd8] sm:$0xff] %v231_v27  ;;  %234 = vst [vmem:[%s2589_s29 + $0xe0] sm:$0xff] %v233_v28  ;;  %v241_v32 = vld [vmem:[%s2581_s28 + $0x200] sm:$0xff]  ;;  %v243_v33 = vld [vmem:[%s2581_s28 + $0x208] sm:$0xff] }
  0x21   : > { %236 = vst [vmem:[%s2589_s29 + $0xe8] sm:$0xff] %v235_v29  ;;  %238 = vst [vmem:[%s2589_s29 + $0xf0] sm:$0xff] %v237_v30  ;;  %v245_v34 = vld [vmem:[%s2581_s28 + $0x210] sm:$0xff]  ;;  %v247_v35 = vld [vmem:[%s2581_s28 + $0x218] sm:$0xff] }
  0x22   : > { %240 = vst [vmem:[%s2589_s29 + $0xf8] sm:$0xff] %v239_v31  ;;  %242 = vst [vmem:[%s2589_s29 + $0x100] sm:$0xff] %v241_v32  ;;  %v249_v36 = vld [vmem:[%s2581_s28 + $0x220] sm:$0xff]  ;;  %v251_v37 = vld [vmem:[%s2581_s28 + $0x228] sm:$0xff] }
  0x23   : > { %244 = vst [vmem:[%s2589_s29 + $0x108] sm:$0xff] %v243_v33  ;;  %246 = vst [vmem:[%s2589_s29 + $0x110] sm:$0xff] %v245_v34  ;;  %v253_v38 = vld [vmem:[%s2581_s28 + $0x230] sm:$0xff]  ;;  %v255_v39 = vld [vmem:[%s2581_s28 + $0x238] sm:$0xff] }
  0x24   : > { %248 = vst [vmem:[%s2589_s29 + $0x118] sm:$0xff] %v247_v35  ;;  %250 = vst [vmem:[%s2589_s29 + $0x120] sm:$0xff] %v249_v36  ;;  %v257_v40 = vld [vmem:[%s2581_s28 + $0x240] sm:$0xff]  ;;  %v259_v41 = vld [vmem:[%s2581_s28 + $0x248] sm:$0xff] }
  0x25   : > { %252 = vst [vmem:[%s2589_s29 + $0x128] sm:$0xff] %v251_v37  ;;  %254 = vst [vmem:[%s2589_s29 + $0x130] sm:$0xff] %v253_v38  ;;  %v261_v42 = vld [vmem:[%s2581_s28 + $0x250] sm:$0xff]  ;;  %v263_v43 = vld [vmem:[%s2581_s28 + $0x258] sm:$0xff] }
  0x26   : > { %256 = vst [vmem:[%s2589_s29 + $0x138] sm:$0xff] %v255_v39  ;;  %258 = vst [vmem:[%s2589_s29 + $0x140] sm:$0xff] %v257_v40  ;;  %v265_v44 = vld [vmem:[%s2581_s28 + $0x260] sm:$0xff]  ;;  %v267_v45 = vld [vmem:[%s2581_s28 + $0x268] sm:$0xff] }
  0x27   : > { %260 = vst [vmem:[%s2589_s29 + $0x148] sm:$0xff] %v259_v41  ;;  %262 = vst [vmem:[%s2589_s29 + $0x150] sm:$0xff] %v261_v42  ;;  %v269_v46 = vld [vmem:[%s2581_s28 + $0x270] sm:$0xff]  ;;  %v271_v47 = vld [vmem:[%s2581_s28 + $0x278] sm:$0xff] }
  0x28   : > { %264 = vst [vmem:[%s2589_s29 + $0x158] sm:$0xff] %v263_v43  ;;  %266 = vst [vmem:[%s2589_s29 + $0x160] sm:$0xff] %v265_v44  ;;  %v273_v48 = vld [vmem:[%s2581_s28 + $0x300] sm:$0xff]  ;;  %v275_v49 = vld [vmem:[%s2581_s28 + $0x308] sm:$0xff] }
  0x29   : > { %268 = vst [vmem:[%s2589_s29 + $0x168] sm:$0xff] %v267_v45  ;;  %270 = vst [vmem:[%s2589_s29 + $0x170] sm:$0xff] %v269_v46  ;;  %v277_v50 = vld [vmem:[%s2581_s28 + $0x310] sm:$0xff]  ;;  %v279_v51 = vld [vmem:[%s2581_s28 + $0x318] sm:$0xff] }
  0x2a   : > { %272 = vst [vmem:[%s2589_s29 + $0x178] sm:$0xff] %v271_v47  ;;  %274 = vst [vmem:[%s2589_s29 + $0x180] sm:$0xff] %v273_v48  ;;  %v281_v52 = vld [vmem:[%s2581_s28 + $0x320] sm:$0xff]  ;;  %v283_v53 = vld [vmem:[%s2581_s28 + $0x328] sm:$0xff] }
  0x2b   : > { %276 = vst [vmem:[%s2589_s29 + $0x188] sm:$0xff] %v275_v49  ;;  %278 = vst [vmem:[%s2589_s29 + $0x190] sm:$0xff] %v277_v50  ;;  %v285_v54 = vld [vmem:[%s2581_s28 + $0x330] sm:$0xff]  ;;  %v287_v55 = vld [vmem:[%s2581_s28 + $0x338] sm:$0xff] }
  0x2c   : > { %280 = vst [vmem:[%s2589_s29 + $0x198] sm:$0xff] %v279_v51  ;;  %282 = vst [vmem:[%s2589_s29 + $0x1a0] sm:$0xff] %v281_v52  ;;  %v289_v56 = vld [vmem:[%s2581_s28 + $0x340] sm:$0xff]  ;;  %v291_v57 = vld [vmem:[%s2581_s28 + $0x348] sm:$0xff] }
  0x2d   : > { %284 = vst [vmem:[%s2589_s29 + $0x1a8] sm:$0xff] %v283_v53  ;;  %286 = vst [vmem:[%s2589_s29 + $0x1b0] sm:$0xff] %v285_v54  ;;  %v293_v58 = vld [vmem:[%s2581_s28 + $0x350] sm:$0xff]  ;;  %v295_v59 = vld [vmem:[%s2581_s28 + $0x358] sm:$0xff] }
  0x2e   : > { %288 = vst [vmem:[%s2589_s29 + $0x1b8] sm:$0xff] %v287_v55  ;;  %290 = vst [vmem:[%s2589_s29 + $0x1c0] sm:$0xff] %v289_v56  ;;  %v297_v60 = vld [vmem:[%s2581_s28 + $0x360] sm:$0xff]  ;;  %v299_v61 = vld [vmem:[%s2581_s28 + $0x368] sm:$0xff] }
  0x2f   : > { %292 = vst [vmem:[%s2589_s29 + $0x1c8] sm:$0xff] %v291_v57  ;;  %294 = vst [vmem:[%s2589_s29 + $0x1d0] sm:$0xff] %v293_v58  ;;  %v301_v62 = vld [vmem:[%s2581_s28 + $0x370] sm:$0xff]  ;;  %v303_v63 = vld [vmem:[%s2581_s28 + $0x378] sm:$0xff] }
  0x30   : > { %296 = vst [vmem:[%s2589_s29 + $0x1d8] sm:$0xff] %v295_v59  ;;  %298 = vst [vmem:[%s2589_s29 + $0x1e0] sm:$0xff] %v297_v60  ;;  %v305_v0 = vld [vmem:[%s2581_s28 + $0x400] sm:$0xff]  ;;  %v307_v1 = vld [vmem:[%s2581_s28 + $0x408] sm:$0xff] }
  0x31   : > { %300 = vst [vmem:[%s2589_s29 + $0x1e8] sm:$0xff] %v299_v61  ;;  %302 = vst [vmem:[%s2589_s29 + $0x1f0] sm:$0xff] %v301_v62  ;;  %v309_v2 = vld [vmem:[%s2581_s28 + $0x410] sm:$0xff]  ;;  %v311_v3 = vld [vmem:[%s2581_s28 + $0x418] sm:$0xff] }
  0x32   : > { %304 = vst [vmem:[%s2589_s29 + $0x1f8] sm:$0xff] %v303_v63  ;;  %306 = vst [vmem:[%s2589_s29 + $0x200] sm:$0xff] %v305_v0  ;;  %v313_v4 = vld [vmem:[%s2581_s28 + $0x420] sm:$0xff]  ;;  %v315_v5 = vld [vmem:[%s2581_s28 + $0x428] sm:$0xff] }
  0x33   : > { %308 = vst [vmem:[%s2589_s29 + $0x208] sm:$0xff] %v307_v1  ;;  %310 = vst [vmem:[%s2589_s29 + $0x210] sm:$0xff] %v309_v2  ;;  %v317_v6 = vld [vmem:[%s2581_s28 + $0x430] sm:$0xff]  ;;  %v319_v7 = vld [vmem:[%s2581_s28 + $0x438] sm:$0xff] }
  0x34   : > { %312 = vst [vmem:[%s2589_s29 + $0x218] sm:$0xff] %v311_v3  ;;  %314 = vst [vmem:[%s2589_s29 + $0x220] sm:$0xff] %v313_v4  ;;  %v321_v8 = vld [vmem:[%s2581_s28 + $0x440] sm:$0xff]  ;;  %v323_v9 = vld [vmem:[%s2581_s28 + $0x448] sm:$0xff] }
  0x35   : > { %316 = vst [vmem:[%s2589_s29 + $0x228] sm:$0xff] %v315_v5  ;;  %318 = vst [vmem:[%s2589_s29 + $0x230] sm:$0xff] %v317_v6  ;;  %v325_v10 = vld [vmem:[%s2581_s28 + $0x450] sm:$0xff]  ;;  %v327_v11 = vld [vmem:[%s2581_s28 + $0x458] sm:$0xff] }
  0x36   : > { %320 = vst [vmem:[%s2589_s29 + $0x238] sm:$0xff] %v319_v7  ;;  %322 = vst [vmem:[%s2589_s29 + $0x240] sm:$0xff] %v321_v8  ;;  %v329_v12 = vld [vmem:[%s2581_s28 + $0x460] sm:$0xff]  ;;  %v331_v13 = vld [vmem:[%s2581_s28 + $0x468] sm:$0xff] }
  0x37   : > { %324 = vst [vmem:[%s2589_s29 + $0x248] sm:$0xff] %v323_v9  ;;  %326 = vst [vmem:[%s2589_s29 + $0x250] sm:$0xff] %v325_v10  ;;  %v333_v14 = vld [vmem:[%s2581_s28 + $0x470] sm:$0xff]  ;;  %v335_v15 = vld [vmem:[%s2581_s28 + $0x478] sm:$0xff] }
  0x38   : > { %328 = vst [vmem:[%s2589_s29 + $0x258] sm:$0xff] %v327_v11  ;;  %330 = vst [vmem:[%s2589_s29 + $0x260] sm:$0xff] %v329_v12 }
  0x39   : > { %332 = vst [vmem:[%s2589_s29 + $0x268] sm:$0xff] %v331_v13  ;;  %334 = vst [vmem:[%s2589_s29 + $0x270] sm:$0xff] %v333_v14 }
  0x3a   : > { %336 = vst [vmem:[%s2589_s29 + $0x278] sm:$0xff] %v335_v15 }
  0x3b PF: > { %p2125_p5 = scmp.ge.s32.totalorder %s2519_s17, 1  ;;  %p350_p6 = scmp.lt.s32.totalorder %s2519_s17, 3 }
  0x3d   : > { %p351_p7 = pnand %p2125_p5, %p350_p6 }
  0x3e   : > { %s357_s30 = sand.u32 (!%p351_p7), 1, %s2511_s15   ;;  %v2521_v16 = vmov (!%p351_p7), 0   ;;  %v482_v17 = vld [vmem:[%s3143_s1] sm:$0xf] (!%p351_p7)  ;;  %vm892_vm0 = vcmask (!%p351_p7), 1041408   ;;  %vm888_vm1 = vcmask (!%p351_p7), 293888  }
  0x3f   : > { %354 = sbr.rel (%p351_p7) target bundleno = 420 (0x1a4), region = 55  ;;  %1021 = vmatprep.mubr.bf16.mxu0 (!%p351_p7), %v2521_v16  ;;  %1062 = vmatprep.mubr.bf16.mxu1 (!%p351_p7), %v2521_v16  ;;  %v2781_v52 = vld [vmem:[%s3142_s0] sm:$0x3] (!%p351_p7)  ;;  %s2126_s11 = sshll.u32 (!%p351_p7), %s2119_s18, 5 }
  0x40   : > { %s2294_s5 = smul.u32 (!%p351_p7), 640, %s357_s30  ;;  %2320 = vset.pattern.permute.xlu0 (!%p351_p7), %v2521_v16  ;;  %p389_p8 = scmp.lt.s32.totalorder (!%p351_p7), %s2126_s11, 63 }
  0x41   : > { %485 = vperm.xlu0 (!%p351_p7), %2320, %v482_v17  }
  0x42   : > { %s2754_s8 = scalar_lea.vmem (!%p351_p7), [#allocation2], %s2294_s5 }
  0x43   : > { %v402_v18 = vld [vmem:[%s2754_s8] sm:$0xff] (!%p351_p7)  ;;  %v403_v20 = vld [vmem:[%s2754_s8 + $0x8] sm:$0xff] (!%p351_p7)  ;;  %v404_v40 = vld [vmem:[%s2754_s8 + $0x10] sm:$0xff] (!%p351_p7) }
  0x44   : > { %v418_v19 = vld [vmem:[%s2754_s8 + $0x80] sm:$0xff] (!%p351_p7)  ;;  %v419_v22 = vld [vmem:[%s2754_s8 + $0x88] sm:$0xff] (!%p351_p7)  ;;  %v420_v41 = vld [vmem:[%s2754_s8 + $0x90] sm:$0xff] (!%p351_p7) }
  0x45   : > { %v2131_v21 = vcombine.high (!%p351_p7), %v402_v18, %v418_v19  ;;  %v2130_v23 = vcombine.low (!%p351_p7), %v402_v18, %v418_v19  ;;  %v434_v24 = vld [vmem:[%s2754_s8 + $0x100] sm:$0xff] (!%p351_p7)  ;;  %v2133_v26 = vcombine.high (!%p351_p7), %v403_v20, %v419_v22  ;;  %v2132_v27 = vcombine.low (!%p351_p7), %v403_v20, %v419_v22  ;;  %v435_v29 = vld [vmem:[%s2754_s8 + $0x108] sm:$0xff] (!%p351_p7)  ;;  %v405_v42 = vld [vmem:[%s2754_s8 + $0x18] sm:$0xff] (!%p351_p7) }
  0x46   : > { %v450_v25 = vld [vmem:[%s2754_s8 + $0x180] sm:$0xff]  ;;  %v451_v30 = vld [vmem:[%s2754_s8 + $0x188] sm:$0xff]  ;;  %v421_v43 = vld [vmem:[%s2754_s8 + $0x98] sm:$0xff]  ;;  %v2135_v45 = vcombine.high %v404_v40, %v420_v41  ;;  %v2134_v53 = vcombine.low %v404_v40, %v420_v41  ;;  %s3151_s11 = smov (!%p389_p8, %s2126_s11), 63 }
  0x47   : > { %v2163_v28 = vcombine.high %v434_v24, %v450_v25  ;;  %v466_v31 = vld [vmem:[%s2754_s8 + $0x200] sm:$0x33]  ;;  %989 = vmatprep.subr.bf16.mxu0 %v2131_v21  ;;  %v2165_v32 = vcombine.high %v435_v29, %v451_v30  ;;  %v467_v33 = vld [vmem:[%s2754_s8 + $0x208] sm:$0x33]  ;;  %1030 = vmatprep.subr.bf16.mxu1 %v2133_v26  ;;  %v2162_v34 = vcombine.low %v434_v24, %v450_v25  ;;  %v436_v48 = vld [vmem:[%s2754_s8 + $0x110] sm:$0xff]  ;;  %s2127_s12 = sshll.u32 %s3151_s11, 2 }
  0x48   : > { %990 = vmatpush1.bf16.msra.mxu0 %v2130_v23  ;;  %1031 = vmatpush1.bf16.msra.mxu1 %v2132_v27  ;;  %v2164_v35 = vcombine.low %v435_v29, %v451_v30  ;;  %v2195_v36 = vcombine.high %v466_v31, %v466_v31  ;;  %v2194_v37 = vcombine.low %v466_v31, %v466_v31  ;;  %v452_v49 = vld [vmem:[%s2754_s8 + $0x190] sm:$0xff]  ;;  %v437_v50 = vld [vmem:[%s2754_s8 + $0x118] sm:$0xff]  ;;  %v406_v1 = vld [vmem:[%s2754_s8 + $0x20] sm:$0xff]  ;;  %s2929_s15 = scalar_lea.vmem %s3145_s3, %s2127_s12  ;;  %s2995_s20 = scalar_lea.vmem %s3146_s4, %s2127_s12 }
  0x49   : > { %991 = vmatprep.subr.bf16.mxu0 %v2163_v28  ;;  %1032 = vmatprep.subr.bf16.mxu1 %v2165_v32  ;;  %v2197_v38 = vcombine.high %v467_v33, %v467_v33  ;;  %v2196_v39 = vcombine.low %v467_v33, %v467_v33  ;;  %v2137_v47 = vcombine.high %v405_v42, %v421_v43  ;;  %v453_v51 = vld [vmem:[%s2754_s8 + $0x198] sm:$0xff]  ;;  %v468_v57 = vld [vmem:[%s2754_s8 + $0x210] sm:$0x33]  ;;  %v422_v2 = vld [vmem:[%s2754_s8 + $0xa0] sm:$0xff] }
  0x4a   : > { %v894_v44 = vsel %vm892_vm0, %v2194_v37, 0  ;;  %v2136_v54 = vcombine.low %v405_v42, %v421_v43  ;;  %v2167_v55 = vcombine.high %v436_v48, %v452_v49  ;;  %v2169_v56 = vcombine.high %v437_v50, %v453_v51  ;;  %v469_v58 = vld [vmem:[%s2754_s8 + $0x218] sm:$0x33]  ;;  %v407_v3 = vld [vmem:[%s2754_s8 + $0x28] sm:$0xff]  ;;  %v438_v9 = vld [vmem:[%s2754_s8 + $0x120] sm:$0xff] }
  0x4b   : > { %v900_v46 = vsel %vm892_vm0, %v2196_v39, 0  ;;  %v2166_v59 = vcombine.low %v436_v48, %v452_v49  ;;  %v2168_v60 = vcombine.low %v437_v50, %v453_v51  ;;  %v2199_v61 = vcombine.high %v468_v57, %v468_v57  ;;  %v423_v4 = vld [vmem:[%s2754_s8 + $0xa8] sm:$0xff]  ;;  %v454_v10 = vld [vmem:[%s2754_s8 + $0x1a0] sm:$0xff]  ;;  %v408_v26 = vld [vmem:[%s2754_s8 + $0x30] sm:$0xff] }
  0x4c   : > { %992 = vmatpush1.bf16.msra.mxu0 %v2162_v34  ;;  %1033 = vmatpush1.bf16.msra.mxu1 %v2164_v35  ;;  %v2198_v62 = vcombine.low %v468_v57, %v468_v57  ;;  %v2201_v63 = vcombine.high %v469_v58, %v469_v58  ;;  %v2200_v0 = vcombine.low %v469_v58, %v469_v58  ;;  %v439_v11 = vld [vmem:[%s2754_s8 + $0x128] sm:$0xff]  ;;  %v470_v18 = vld [vmem:[%s2754_s8 + $0x220] sm:$0x33]  ;;  %v424_v27 = vld [vmem:[%s2754_s8 + $0xb0] sm:$0xff] }
  0x4d   : > { %2226 = vmatprep.subr.msk.bf16.mxu0 %vm892_vm0, %v2195_v36  ;;  %2228 = vmatprep.subr.msk.bf16.mxu1 %vm892_vm0, %v2197_v38  ;;  %v2139_v6 = vcombine.high %v406_v1, %v422_v2  ;;  %v2141_v8 = vcombine.high %v407_v3, %v423_v4  ;;  %v455_v12 = vld [vmem:[%s2754_s8 + $0x1a8] sm:$0xff]  ;;  %v2138_v13 = vcombine.low %v406_v1, %v422_v2  ;;  %v409_v28 = vld [vmem:[%s2754_s8 + $0x38] sm:$0xff]  ;;  %v440_v34 = vld [vmem:[%s2754_s8 + $0x130] sm:$0xff] }
  0x4e   : > { %v906_v5 = vsel %vm892_vm0, %v2198_v62, 0  ;;  %v912_v7 = vsel %vm892_vm0, %v2200_v0, 0  ;;  %v2140_v14 = vcombine.low %v407_v3, %v423_v4  ;;  %v2171_v15 = vcombine.high %v438_v9, %v454_v10  ;;  %v471_v19 = vld [vmem:[%s2754_s8 + $0x228] sm:$0x33]  ;;  %v425_v29 = vld [vmem:[%s2754_s8 + $0xb8] sm:$0xff]  ;;  %v456_v35 = vld [vmem:[%s2754_s8 + $0x1b0] sm:$0xff] }
  0x4f   : > { %v2173_v17 = vcombine.high %v439_v11, %v455_v12  ;;  %v2170_v20 = vcombine.low %v438_v9, %v454_v10  ;;  %v2172_v21 = vcombine.low %v439_v11, %v455_v12  ;;  %v2203_v22 = vcombine.high %v470_v18, %v470_v18  ;;  %v441_v36 = vld [vmem:[%s2754_s8 + $0x138] sm:$0xff]  ;;  %v472_v42 = vld [vmem:[%s2754_s8 + $0x230] sm:$0x33]  ;;  %v410_v50 = vld [vmem:[%s2754_s8 + $0x40] sm:$0xff] }
  0x50   : > { %994 = vmatpush1.bf16.msra.mxu0 %v894_v44  ;;  %1035 = vmatpush1.bf16.msra.mxu1 %v900_v46  ;;  %v2202_v23 = vcombine.low %v470_v18, %v470_v18  ;;  %v2205_v24 = vcombine.high %v471_v19, %v471_v19  ;;  %v2204_v25 = vcombine.low %v471_v19, %v471_v19  ;;  %v457_v37 = vld [vmem:[%s2754_s8 + $0x1b8] sm:$0xff]  ;;  %v426_v51 = vld [vmem:[%s2754_s8 + $0xc0] sm:$0xff]  ;;  %v459_v62 = vld [vmem:[%s2754_s8 + $0x1c8] sm:$0xff] }
  0x51   : > { %1071 = vmatprep.subr.bf16.mxu0 %v2135_v45  ;;  %1112 = vmatprep.subr.bf16.mxu1 %v2137_v47  ;;  %v2143_v31 = vcombine.high %v408_v26, %v424_v27  ;;  %v2145_v33 = vcombine.high %v409_v28, %v425_v29  ;;  %v2142_v38 = vcombine.low %v408_v26, %v424_v27  ;;  %v473_v43 = vld [vmem:[%s2754_s8 + $0x238] sm:$0x33]  ;;  %v474_v3 = vld [vmem:[%s2754_s8 + $0x240] sm:$0x33]  ;;  %v475_v4 = vld [vmem:[%s2754_s8 + $0x248] sm:$0x33] }
  0x52   : > { %v918_v30 = vsel %vm892_vm0, %v2202_v23, 0  ;;  %v924_v32 = vsel %vm892_vm0, %v2204_v25, 0  ;;  %v2144_v39 = vcombine.low %v409_v28, %v425_v29  ;;  %v2175_v40 = vcombine.high %v440_v34, %v456_v35  ;;  %v412_v11 = vld [vmem:[%s2754_s8 + $0x50] sm:$0xff]  ;;  %v461_v23 = vld [vmem:[%s2754_s8 + $0x1d8] sm:$0xff] }
  0x53   : > { %2227 = vmatmul.mubr.msk.bf16.vlgmr.msra.gmra.mrb[0].mxu0 %vm888_vm1, %v2781_v52  ;;  %2229 = vmatmul.mubr.msk.bf16.vlgmr.msra.gmra.mrb[0].mxu1 %vm888_vm1, %v2781_v52  ;;  %v2177_v41 = vcombine.high %v441_v36, %v457_v37  ;;  %v2174_v44 = vcombine.low %v440_v34, %v456_v35  ;;  %v2176_v45 = vcombine.low %v441_v36, %v457_v37  ;;  %v428_v12 = vld [vmem:[%s2754_s8 + $0xd0] sm:$0xff]  ;;  %v477_v29 = vld [vmem:[%s2754_s8 + $0x258] sm:$0x33]  ;;  %v414_v36 = vld [vmem:[%s2754_s8 + $0x60] sm:$0xff] }
  0x54   : > { %1072 = vmatpush1.bf16.msra.mxu0 %v2134_v53  ;;  %1113 = vmatpush1.bf16.msra.mxu1 %v2136_v54  ;;  %v2207_v46 = vcombine.high %v472_v42, %v472_v42  ;;  %v2206_v47 = vcombine.low %v472_v42, %v472_v42  ;;  %v2209_v48 = vcombine.high %v473_v43, %v473_v43  ;;  %v411_v53 = vld [vmem:[%s2754_s8 + $0x48] sm:$0xff]  ;;  %v476_v28 = vld [vmem:[%s2754_s8 + $0x250] sm:$0x33]  ;;  %v430_v37 = vld [vmem:[%s2754_s8 + $0xe0] sm:$0xff] }
  0x55   : > { %1073 = vmatprep.subr.bf16.mxu0 %v2167_v55  ;;  %1114 = vmatprep.subr.bf16.mxu1 %v2169_v56  ;;  %v2208_v49 = vcombine.low %v473_v43, %v473_v43  ;;  %v427_v54 = vld [vmem:[%s2754_s8 + $0xc8] sm:$0xff]  ;;  %v2147_v56 = vcombine.high %v410_v50, %v426_v51  ;;  %v2213_v9 = vcombine.high %v475_v4, %v475_v4 }
  0x56   : > { %1103 = vmatprep.mubr.bf16.mxu0 %v2521_v16  ;;  %1144 = vmatprep.mubr.bf16.mxu1 %v2521_v16  ;;  %v930_v55 = vsel %vm892_vm0, %v2206_v47, 0  ;;  %v2149_v58 = vcombine.high %v411_v53, %v427_v54  ;;  %v2148_v0 = vcombine.low %v411_v53, %v427_v54  ;;  %v2212_v10 = vcombine.low %v475_v4, %v475_v4  ;;  %v463_v47 = vld [vmem:[%s2754_s8 + $0x1e8] sm:$0xff]  ;;  %v478_v53 = vld [vmem:[%s2754_s8 + $0x260] sm:$0x33] }
  0x57   : > { %v936_v57 = vsel %vm892_vm0, %v2208_v49, 0  ;;  %v2217_v34 = vcombine.high %v477_v29, %v477_v29  ;;  %v2216_v35 = vcombine.low %v477_v29, %v477_v29  ;;  %v479_v54 = vld [vmem:[%s2754_s8 + $0x268] sm:$0x33] }
  0x58   : > { %1074 = vmatpush1.bf16.msra.mxu0 %v2166_v59  ;;  %1115 = vmatpush1.bf16.msra.mxu1 %v2168_v60  ;;  %v442_v59 = vld [vmem:[%s2754_s8 + $0x140] sm:$0xff]  ;;  %v948_v18 = vsel %vm892_vm0, %v2212_v10, 0 }
  0x59   : > { %2230 = vmatprep.subr.msk.bf16.mxu0 %vm892_vm0, %v2199_v61  ;;  %2232 = vmatprep.subr.msk.bf16.mxu1 %vm892_vm0, %v2201_v63  ;;  %v458_v60 = vld [vmem:[%s2754_s8 + $0x1c0] sm:$0xff]  ;;  %v443_v61 = vld [vmem:[%s2754_s8 + $0x148] sm:$0xff]  ;;  %v2146_v63 = vcombine.low %v410_v50, %v426_v51  ;;  %v960_v42 = vsel %vm892_vm0, %v2216_v35, 0 }
  0x5a   : > { %v2179_v1 = vcombine.high %v442_v59, %v458_v60  ;;  %v2181_v2 = vcombine.high %v443_v61, %v459_v62 }
  0x5c   : > { %1076 = vmatpush1.bf16.msra.mxu0 %v906_v5  ;;  %1117 = vmatpush1.bf16.msra.mxu1 %v912_v7  ;;  %v2178_v5 = vcombine.low %v442_v59, %v458_v60  ;;  %v2211_v7 = vcombine.high %v474_v3, %v474_v3  ;;  %v2221_v59 = vcombine.high %v479_v54, %v479_v54 }
  0x5d   : > { %1153 = vmatprep.subr.bf16.mxu0 %v2139_v6  ;;  %1194 = vmatprep.subr.bf16.mxu1 %v2141_v8  ;;  %v2180_v6 = vcombine.low %v443_v61, %v459_v62  ;;  %v2210_v8 = vcombine.low %v474_v3, %v474_v3  ;;  %v2220_v60 = vcombine.low %v479_v54, %v479_v54  ;;  %v416_v61 = vld [vmem:[%s2754_s8 + $0x70] sm:$0xff] }
  0x5e   : > { %v432_v62 = vld [vmem:[%s2754_s8 + $0xf0] sm:$0xff] }
  0x5f   : > { %2231 = vmatmul.mubr.msk.bf16.vlgmr.msra.gmra.mrb[4].mxu0 %vm888_vm1, %v2781_v52  ;;  %2233 = vmatmul.mubr.msk.bf16.vlgmr.msra.gmra.mrb[4].mxu1 %vm888_vm1, %v2781_v52  ;;  %v972_v3 = vsel %vm892_vm0, %v2220_v60, 0 }
  0x60   : > { %1154 = vmatpush1.bf16.msra.mxu0 %v2138_v13  ;;  %1195 = vmatpush1.bf16.msra.mxu1 %v2140_v14  ;;  %v413_v13 = vld [vmem:[%s2754_s8 + $0x58] sm:$0xff] }
  0x61   : > { %1155 = vmatprep.subr.bf16.mxu0 %v2171_v15  ;;  %1196 = vmatprep.subr.bf16.mxu1 %v2173_v17  ;;  %v429_v14 = vld [vmem:[%s2754_s8 + $0xd8] sm:$0xff]  ;;  %v942_v15 = vsel %vm892_vm0, %v2210_v8, 0  ;;  %v2151_v17 = vcombine.high %v412_v11, %v428_v12 }
  0x62   : > { %1185 = vmatprep.mubr.bf16.mxu0 %v2521_v16  ;;  %1226 = vmatprep.mubr.bf16.mxu1 %v2521_v16  ;;  %v2153_v19 = vcombine.high %v413_v13, %v429_v14  ;;  %v2152_v25 = vcombine.low %v413_v13, %v429_v14  ;;  %v465_v8 = vld [vmem:[%s2754_s8 + $0x1f8] sm:$0xff]  ;;  %v480_v13 = vld [vmem:[%s2754_s8 + $0x270] sm:$0x33] }
  0x63   : > { %v481_v14 = vld [vmem:[%s2754_s8 + $0x278] sm:$0x33] }
  0x64   : > { %1156 = vmatpush1.bf16.msra.mxu0 %v2170_v20  ;;  %1197 = vmatpush1.bf16.msra.mxu1 %v2172_v21  ;;  %v444_v20 = vld [vmem:[%s2754_s8 + $0x150] sm:$0xff] }
  0x65   : > { %2234 = vmatprep.subr.msk.bf16.mxu0 %vm892_vm0, %v2203_v22  ;;  %2236 = vmatprep.subr.msk.bf16.mxu1 %vm892_vm0, %v2205_v24  ;;  %v460_v21 = vld [vmem:[%s2754_s8 + $0x1d0] sm:$0xff]  ;;  %v445_v22 = vld [vmem:[%s2754_s8 + $0x158] sm:$0xff]  ;;  %v2150_v24 = vcombine.low %v412_v11, %v428_v12 }
  0x66   : > { %v2183_v26 = vcombine.high %v444_v20, %v460_v21  ;;  %v2185_v27 = vcombine.high %v445_v22, %v461_v23 }
  0x68   : > { %1158 = vmatpush1.bf16.msra.mxu0 %v918_v30  ;;  %1199 = vmatpush1.bf16.msra.mxu1 %v924_v32  ;;  %v2182_v30 = vcombine.low %v444_v20, %v460_v21  ;;  %v2215_v32 = vcombine.high %v476_v28, %v476_v28  ;;  %v2225_v20 = vcombine.high %v481_v14, %v481_v14 }
  0x69   : > { %1235 = vmatprep.subr.bf16.mxu0 %v2143_v31  ;;  %1276 = vmatprep.subr.bf16.mxu1 %v2145_v33  ;;  %v2184_v31 = vcombine.low %v445_v22, %v461_v23  ;;  %v2214_v33 = vcombine.low %v476_v28, %v476_v28  ;;  %v2224_v21 = vcombine.low %v481_v14, %v481_v14 }
  0x6b   : > { %2235 = vmatmul.mubr.msk.bf16.vlgmr.msra.gmra.mrb[8].mxu0 %vm888_vm1, %v2781_v52  ;;  %2237 = vmatmul.mubr.msk.bf16.vlgmr.msra.gmra.mrb[8].mxu1 %vm888_vm1, %v2781_v52  ;;  %v984_v23 = vsel %vm892_vm0, %v2224_v21, 0 }
  0x6c   : > { %1236 = vmatpush1.bf16.msra.mxu0 %v2142_v38  ;;  %1277 = vmatpush1.bf16.msra.mxu1 %v2144_v39  ;;  %v415_v38 = vld [vmem:[%s2754_s8 + $0x68] sm:$0xff] }
  0x6d   : > { %1237 = vmatprep.subr.bf16.mxu0 %v2175_v40  ;;  %1278 = vmatprep.subr.bf16.mxu1 %v2177_v41  ;;  %v431_v39 = vld [vmem:[%s2754_s8 + $0xe8] sm:$0xff]  ;;  %v954_v40 = vsel %vm892_vm0, %v2214_v33, 0  ;;  %v2155_v41 = vcombine.high %v414_v36, %v430_v37 }
  0x6e   : > { %1267 = vmatprep.mubr.bf16.mxu0 %v2521_v16  ;;  %1308 = vmatprep.mubr.bf16.mxu1 %v2521_v16  ;;  %v2157_v43 = vcombine.high %v415_v38, %v431_v39  ;;  %v2156_v49 = vcombine.low %v415_v38, %v431_v39 }
  0x70   : > { %1238 = vmatpush1.bf16.msra.mxu0 %v2174_v44  ;;  %1279 = vmatpush1.bf16.msra.mxu1 %v2176_v45  ;;  %v446_v44 = vld [vmem:[%s2754_s8 + $0x160] sm:$0xff] }
  0x71   : > { %2238 = vmatprep.subr.msk.bf16.mxu0 %vm892_vm0, %v2207_v46  ;;  %2240 = vmatprep.subr.msk.bf16.mxu1 %vm892_vm0, %v2209_v48  ;;  %v462_v45 = vld [vmem:[%s2754_s8 + $0x1e0] sm:$0xff]  ;;  %v447_v46 = vld [vmem:[%s2754_s8 + $0x168] sm:$0xff]  ;;  %v2154_v48 = vcombine.low %v414_v36, %v430_v37 }
  0x72   : > { %v2187_v50 = vcombine.high %v446_v44, %v462_v45  ;;  %v2189_v51 = vcombine.high %v447_v46, %v463_v47 }
  0x74   : > { %1240 = vmatpush1.bf16.msra.mxu0 %v930_v55  ;;  %1281 = vmatpush1.bf16.msra.mxu1 %v936_v57  ;;  %v2186_v55 = vcombine.low %v446_v44, %v462_v45  ;;  %v2219_v57 = vcombine.high %v478_v53, %v478_v53 }
  0x75   : > { %1317 = vmatprep.subr.bf16.mxu0 %v2147_v56  ;;  %1358 = vmatprep.subr.bf16.mxu1 %v2149_v58  ;;  %v2188_v56 = vcombine.low %v447_v46, %v463_v47  ;;  %v2218_v58 = vcombine.low %v478_v53, %v478_v53  ;;  %v1647_v47 = vld [vmem:[%s2929_s15 + $0x10] sm:$0xff] }
  0x76   : > { %v1679_v54 = vcombine.high %v1647_v47, %v1647_v47 }
  0x77   : > { %2239 = vmatmul.mubr.msk.bf16.vlgmr.msra.gmra.mrb[12].mxu0 %vm888_vm1, %v2781_v52  ;;  %2241 = vmatmul.mubr.msk.bf16.vlgmr.msra.gmra.mrb[12].mxu1 %vm888_vm1, %v2781_v52 }
  0x78   : > { %1318 = vmatpush1.bf16.msra.mxu0 %v2146_v63  ;;  %1359 = vmatpush1.bf16.msra.mxu1 %v2148_v0  ;;  %v417_v63 = vld [vmem:[%s2754_s8 + $0x78] sm:$0xff] }
  0x79   : > { %1319 = vmatprep.subr.bf16.mxu0 %v2179_v1  ;;  %1360 = vmatprep.subr.bf16.mxu1 %v2181_v2  ;;  %v433_v0 = vld [vmem:[%s2754_s8 + $0xf8] sm:$0xff]  ;;  %v966_v1 = vsel %vm892_vm0, %v2218_v58, 0  ;;  %v2159_v2 = vcombine.high %v416_v61, %v432_v62 }
  0x7a   : > { %1349 = vmatprep.mubr.bf16.mxu0 %v2521_v16  ;;  %1390 = vmatprep.mubr.bf16.mxu1 %v2521_v16  ;;  %v2161_v4 = vcombine.high %v417_v63, %v433_v0  ;;  %v2160_v10 = vcombine.low %v417_v63, %v433_v0 }
  0x7c   : > { %1320 = vmatpush1.bf16.msra.mxu0 %v2178_v5  ;;  %1361 = vmatpush1.bf16.msra.mxu1 %v2180_v6  ;;  %v448_v5 = vld [vmem:[%s2754_s8 + $0x170] sm:$0xff] }
  0x7d   : > { %2242 = vmatprep.subr.msk.bf16.mxu0 %vm892_vm0, %v2211_v7  ;;  %2244 = vmatprep.subr.msk.bf16.mxu1 %vm892_vm0, %v2213_v9  ;;  %v464_v6 = vld [vmem:[%s2754_s8 + $0x1f0] sm:$0xff]  ;;  %v449_v7 = vld [vmem:[%s2754_s8 + $0x178] sm:$0xff]  ;;  %v2158_v9 = vcombine.low %v416_v61, %v432_v62 }
  0x7e   : > { %v2191_v11 = vcombine.high %v448_v5, %v464_v6  ;;  %v2193_v12 = vcombine.high %v449_v7, %v465_v8 }
  0x80   : > { %1322 = vmatpush1.bf16.msra.mxu0 %v942_v15  ;;  %1363 = vmatpush1.bf16.msra.mxu1 %v948_v18  ;;  %v2190_v15 = vcombine.low %v448_v5, %v464_v6  ;;  %v2223_v18 = vcombine.high %v480_v13, %v480_v13 }
  0x81   : > { %1399 = vmatprep.subr.bf16.mxu0 %v2151_v17  ;;  %1440 = vmatprep.subr.bf16.mxu1 %v2153_v19  ;;  %v2192_v17 = vcombine.low %v449_v7, %v465_v8  ;;  %v2222_v19 = vcombine.low %v480_v13, %v480_v13 }
  0x83   : > { %2243 = vmatmul.mubr.msk.bf16.vlgmr.msra.gmra.mrb[16].mxu0 %vm888_vm1, %v2781_v52  ;;  %2245 = vmatmul.mubr.msk.bf16.vlgmr.msra.gmra.mrb[16].mxu1 %vm888_vm1, %v2781_v52  ;;  %v978_v22 = vsel %vm892_vm0, %v2222_v19, 0 }
  0x84   : > { %1400 = vmatpush1.bf16.msra.mxu0 %v2150_v24  ;;  %1441 = vmatpush1.bf16.msra.mxu1 %v2152_v25 }
  0x85   : > { %1401 = vmatprep.subr.bf16.mxu0 %v2183_v26  ;;  %1442 = vmatprep.subr.bf16.mxu1 %v2185_v27 }
  0x86   : > { %1431 = vmatprep.mubr.bf16.mxu0 %v2521_v16  ;;  %1472 = vmatprep.mubr.bf16.mxu1 %v2521_v16 }
  0x88   : > { %1402 = vmatpush1.bf16.msra.mxu0 %v2182_v30  ;;  %1443 = vmatpush1.bf16.msra.mxu1 %v2184_v31 }
  0x89   : > { %2246 = vmatprep.subr.msk.bf16.mxu0 %vm892_vm0, %v2215_v32  ;;  %2248 = vmatprep.subr.msk.bf16.mxu1 %vm892_vm0, %v2217_v34 }
  0x8c   : > { %1404 = vmatpush1.bf16.msra.mxu0 %v954_v40  ;;  %1445 = vmatpush1.bf16.msra.mxu1 %v960_v42 }
  0x8d   : > { %1481 = vmatprep.subr.bf16.mxu0 %v2155_v41  ;;  %1522 = vmatprep.subr.bf16.mxu1 %v2157_v43 }
  0x8f   : > { %2247 = vmatmul.mubr.msk.bf16.vlgmr.msra.gmra.mrb[20].mxu0 %vm888_vm1, %v2781_v52  ;;  %2249 = vmatmul.mubr.msk.bf16.vlgmr.msra.gmra.mrb[20].mxu1 %vm888_vm1, %v2781_v52 }
  0x90   : > { %1482 = vmatpush1.bf16.msra.mxu0 %v2154_v48  ;;  %1523 = vmatpush1.bf16.msra.mxu1 %v2156_v49  ;;  %v1648_v48 = vld [vmem:[%s2929_s15 + $0x18] sm:$0xff] }
  0x91   : > { %1483 = vmatprep.subr.bf16.mxu0 %v2187_v50  ;;  %1524 = vmatprep.subr.bf16.mxu1 %v2189_v51  ;;  %v1680_v58 = vcombine.high %v1648_v48, %v1648_v48 }
  0x92   : > { %1513 = vmatprep.mubr.bf16.mxu0 %v2521_v16  ;;  %1554 = vmatprep.mubr.bf16.mxu1 %v2521_v16 }
  0x94   : > { %1484 = vmatpush1.bf16.msra.mxu0 %v2186_v55  ;;  %1525 = vmatpush1.bf16.msra.mxu1 %v2188_v56 }
  0x95   : > { %2250 = vmatprep.subr.msk.bf16.mxu0 %vm892_vm0, %v2219_v57  ;;  %2252 = vmatprep.subr.msk.bf16.mxu1 %vm892_vm0, %v2221_v59 }
  0x98   : > { %1486 = vmatpush1.bf16.msra.mxu0 %v966_v1  ;;  %1527 = vmatpush1.bf16.msra.mxu1 %v972_v3 }
  0x99   : > { %1563 = vmatprep.subr.bf16.mxu0 %v2159_v2  ;;  %1604 = vmatprep.subr.bf16.mxu1 %v2161_v4 }
  0x9b   : > { %2251 = vmatmul.mubr.msk.bf16.vlgmr.msra.gmra.mrb[24].mxu0 %vm888_vm1, %v2781_v52  ;;  %2253 = vmatmul.mubr.msk.bf16.vlgmr.msra.gmra.mrb[24].mxu1 %vm888_vm1, %v2781_v52 }
  0x9c   : > { %1564 = vmatpush1.bf16.msra.mxu0 %v2158_v9  ;;  %1605 = vmatpush1.bf16.msra.mxu1 %v2160_v10 }
  0x9d   : > { %1565 = vmatprep.subr.bf16.mxu0 %v2191_v11  ;;  %1606 = vmatprep.subr.bf16.mxu1 %v2193_v12 }
  0x9e   : > { %1595 = vmatprep.mubr.bf16.mxu0 %v2521_v16  ;;  %1636 = vmatprep.mubr.bf16.mxu1 %v2521_v16  ;;  %v1645_v16 = vld [vmem:[%s2929_s15] sm:$0xff] }
  0x9f   : > { %v1677_v26 = vcombine.high %v1645_v16, %v1645_v16 }
  0xa0   : > { %1566 = vmatpush1.bf16.msra.mxu0 %v2190_v15  ;;  %1607 = vmatpush1.bf16.msra.mxu1 %v2192_v17  ;;  %v1649_v15 = vld [vmem:[%s2929_s15 + $0x20] sm:$0xff] }
  0xa1   : > { %2254 = vmatprep.subr.msk.bf16.mxu0 %vm892_vm0, %v2223_v18  ;;  %2256 = vmatprep.subr.msk.bf16.mxu1 %vm892_vm0, %v2225_v20  ;;  %v1650_v18 = vld [vmem:[%s2929_s15 + $0x28] sm:$0xff]  ;;  %v1681_v20 = vcombine.high %v1649_v15, %v1649_v15 }
  0xa4   : > { %1568 = vmatpush1.bf16.msra.mxu0 %v978_v22  ;;  %1609 = vmatpush1.bf16.msra.mxu1 %v984_v23 }
  0xa7   : > { %2255 = vmatmul.mubr.msk.bf16.vlgmr.msra.gmra.mrb[28].mxu0 %vm888_vm1, %v2781_v52  ;;  %2257 = vmatmul.mubr.msk.bf16.vlgmr.msra.gmra.mrb[28].mxu1 %vm888_vm1, %v2781_v52  ;;  %v1646_v52 = vld [vmem:[%s2929_s15 + $0x8] sm:$0xff] }
  0xa8   : > { %v1678_v30 = vcombine.high %v1646_v52, %v1646_v52 }
  0xc0   : > { %v2932_v24 = vpop.permute.xlu0 %485 }
 0x126   : > { %v1023_v25 = vpop.f32.mrb[0].mxu0  ;;  %v1064_v28 = vpop.f32.mrb[0].mxu1 }
 0x127   : > { %v1024_v27 = vadd.f32 %v1023_v25, %v2932_v24  ;;  %v1025_v29 = vpop.f32.mrb[1].mxu0  ;;  %v1065_v31 = vadd.f32 %v1064_v28, %v2932_v24  ;;  %v1066_v33 = vpop.f32.mrb[1].mxu1 }
 0x128   : > { %v1026_v32 = vadd.f32 %v1025_v29, %v2932_v24  ;;  %v1027_v34 = vpop.f32.mrb[2].mxu0  ;;  %v1067_v36 = vadd.f32 %v1066_v33, %v2932_v24  ;;  %v1068_v37 = vpop.f32.mrb[2].mxu1 }
 0x129   : > { %v2938_v35 = vadd.f32 %v1645_v16, %v1024_v27  ;;  %v1028_v38 = vpop.f32.mrb[3].mxu0  ;;  %v2941_v39 = vadd.f32 %v1646_v52, %v1065_v31  ;;  %v1069_v41 = vpop.f32.mrb[3].mxu1  ;;  %v1682_v16 = vcombine.high %v1650_v18, %v1650_v18 }
 0x12a   : > { %v2943_v40 = vadd.f32 %v1677_v26, %v1026_v32  ;;  %v2946_v43 = vadd.f32 %v1678_v30, %v1067_v36 }
 0x12b   : > { %v2258_v42 = vmul.f32 -1.442695, %v2938_v35  ;;  %v2260_v44 = vmul.f32 -1.442695, %v2941_v39 }
 0x12c   : > { %v2259_v45 = vmul.f32 -1.442695, %v2943_v40  ;;  %v2261_v46 = vmul.f32 -1.442695, %v2946_v43 }
 0x12d   : > { %2369 = vpow2.f32 %v2258_v42 }
 0x12e   : > { %2371 = vpow2.f32 %v2260_v44 }
 0x12f   : > { %2373 = vpow2.f32 %v2259_v45 }
 0x130   : > { %2375 = vpow2.f32 %v2261_v46 }
 0x132   : > { %v1105_v49 = vpop.f32.mrb[4].mxu0  ;;  %v1146_v51 = vpop.f32.mrb[4].mxu1 }
 0x133   : > { %v1106_v50 = vadd.f32 %v1105_v49, %v2932_v24  ;;  %v1107_v53 = vpop.f32.mrb[5].mxu0  ;;  %v1147_v55 = vadd.f32 %v1146_v51, %v2932_v24  ;;  %v1148_v57 = vpop.f32.mrb[5].mxu1 }
 0x134   : > { %v1108_v56 = vadd.f32 %v1107_v53, %v2932_v24  ;;  %v1109_v59 = vpop.f32.mrb[6].mxu0  ;;  %v1149_v61 = vadd.f32 %v1148_v57, %v2932_v24  ;;  %v1150_v62 = vpop.f32.mrb[6].mxu1 }
 0x135   : > { %v2956_v60 = vadd.f32 %v1647_v47, %v1106_v50  ;;  %v1110_v63 = vpop.f32.mrb[7].mxu0  ;;  %v2959_v0 = vadd.f32 %v1648_v48, %v1147_v55  ;;  %v1151_v1 = vpop.f32.mrb[7].mxu1  ;;  %v1651_v55 = vld [vmem:[%s2929_s15 + $0x30] sm:$0xff] }
 0x136   : > { %v2962_v4 = vadd.f32 %v1679_v54, %v1108_v56  ;;  %v2964_v7 = vadd.f32 %v1680_v58, %v1149_v61  ;;  %v1652_v58 = vld [vmem:[%s2929_s15 + $0x38] sm:$0xff] }
 0x137   : > { %v2370_v2 = vpop.eup %2369  ;;  %v2262_v3 = vmul.f32 -1.442695, %v2956_v60  ;;  %v2264_v12 = vmul.f32 -1.442695, %v2959_v0 }
 0x138   : > { %v2372_v5 = vpop.eup %2371  ;;  %v1837_v6 = vadd.f32 1.0, %v2370_v2  ;;  %v2263_v14 = vmul.f32 -1.442695, %v2962_v4  ;;  %v2265_v17 = vmul.f32 -1.442695, %v2964_v7 }
 0x139   : > { %v2374_v8 = vpop.eup %2373  ;;  %v1839_v9 = vadd.f32 1.0, %v2372_v5  ;;  %2377 = vpow2.f32 %v2262_v3 }
 0x13a   : > { %v2376_v10 = vpop.eup %2375  ;;  %2379 = vrcp.f32 %v1837_v6  ;;  %v1838_v11 = vadd.f32 1.0, %v2374_v8 }
 0x13b   : > { %2381 = vrcp.f32 %v1839_v9  ;;  %v1840_v13 = vadd.f32 1.0, %v2376_v10  ;;  %v1684_v9 = vcombine.high %v1652_v58, %v1652_v58 }
 0x13c   : > { %2383 = vrcp.f32 %v1838_v11 }
 0x13d   : > { %2385 = vrcp.f32 %v1840_v13 }
 0x13e   : > { %2387 = vpow2.f32 %v2264_v12  ;;  %v1187_v19 = vpop.f32.mrb[8].mxu0  ;;  %v1228_v22 = vpop.f32.mrb[8].mxu1 }
 0x13f   : > { %2389 = vpow2.f32 %v2263_v14  ;;  %v1188_v21 = vadd.f32 %v1187_v19, %v2932_v24  ;;  %v1189_v23 = vpop.f32.mrb[9].mxu0  ;;  %v1229_v52 = vadd.f32 %v1228_v22, %v2932_v24  ;;  %v1230_v26 = vpop.f32.mrb[9].mxu1 }
 0x140   : > { %2391 = vpow2.f32 %v2265_v17  ;;  %v1190_v25 = vadd.f32 %v1189_v23, %v2932_v24  ;;  %v1191_v27 = vpop.f32.mrb[10].mxu0  ;;  %v1231_v29 = vadd.f32 %v1230_v26, %v2932_v24  ;;  %v1232_v30 = vpop.f32.mrb[10].mxu1 }
 0x141   : > { %v2974_v28 = vadd.f32 %v1649_v15, %v1188_v21  ;;  %v1192_v31 = vpop.f32.mrb[11].mxu0  ;;  %v2977_v32 = vadd.f32 %v1650_v18, %v1229_v52  ;;  %v1233_v34 = vpop.f32.mrb[11].mxu1 }
 0x142   : > { %v2979_v33 = vadd.f32 %v1681_v20, %v1190_v25  ;;  %v2982_v38 = vadd.f32 %v1682_v16, %v1231_v29  ;;  %v1653_v31 = vld [vmem:[%s2929_s15 + $0x40] sm:$0xff] }
 0x143   : > { %v2378_v36 = vpop.eup %2377  ;;  %v2266_v37 = vmul.f32 -1.442695, %v2974_v28  ;;  %v2268_v44 = vmul.f32 -1.442695, %v2977_v32 }
 0x144   : > { %v2380_v41 = vpop.eup %2379  ;;  %v1841_v42 = vadd.f32 1.0, %v2378_v36  ;;  %v2267_v45 = vmul.f32 -1.442695, %v2979_v33  ;;  %v2269_v48 = vmul.f32 -1.442695, %v2982_v38 }
 0x145   : > { %v2382_v46 = vpop.eup %2381  ;;  %v1933_v47 = vmul.f32 %v2380_v41, %v2938_v35  ;;  %2393 = vpow2.f32 %v2266_v37  ;;  %v1654_v37 = vld [vmem:[%s2929_s15 + $0x48] sm:$0xff] }
 0x146   : > { %v2384_v49 = vpop.eup %2383  ;;  %v1935_v50 = vmul.f32 %v2382_v46, %v2941_v39  ;;  %2395 = vrcp.f32 %v1841_v42 }
 0x147   : > { %v2386_v51 = vpop.eup %2385  ;;  %v1934_v53 = vmul.f32 %v2384_v49, %v2943_v40  ;;  %2397 = vpow2.f32 %v2268_v44 }
 0x148   : > { %v2388_v54 = vpop.eup %2387  ;;  %v1936_v35 = vmul.f32 %v2386_v51, %v2946_v43  ;;  %2399 = vpow2.f32 %v2267_v45  ;;  %v1683_v43 = vcombine.high %v1651_v55, %v1651_v55 }
 0x149   : > { %v2390_v56 = vpop.eup %2389  ;;  %v1997_v39 = vcombine.low %v1933_v47, %v1934_v53  ;;  %v1843_v57 = vadd.f32 1.0, %v2388_v54  ;;  %2401 = vpow2.f32 %v2269_v48  ;;  %v1685_v47 = vcombine.high %v1653_v31, %v1653_v31 }
 0x14a   : > { %v2392_v40 = vpop.eup %2391  ;;  %v1998_v59 = vcombine.low %v1935_v50, %v1936_v35  ;;  %v1842_v61 = vadd.f32 1.0, %v2390_v56  ;;  %v1269_v62 = vpop.f32.mrb[12].mxu0  ;;  %v1686_v54 = vcombine.high %v1654_v37, %v1654_v37 }
 0x14b   : > { %2029 = vst [vmem:[%s2995_s20] sm:$0xff] %v1997_v39  ;;  %2403 = vrcp.f32 %v1843_v57  ;;  %v1844_v63 = vadd.f32 1.0, %v2392_v40  ;;  %v1270_v1 = vadd.f32 %v1269_v62, %v2932_v24  ;;  %v1310_v2 = vpop.f32.mrb[12].mxu1  ;;  %v1271_v3 = vpop.f32.mrb[13].mxu0 }
 0x14c   : > { %2030 = vst [vmem:[%s2995_s20 + $0x8] sm:$0xff] %v1998_v59  ;;  %2405 = vrcp.f32 %v1842_v61  ;;  %v1311_v5 = vadd.f32 %v1310_v2, %v2932_v24  ;;  %v1272_v6 = vadd.f32 %v1271_v3, %v2932_v24  ;;  %v1312_v8 = vpop.f32.mrb[13].mxu1  ;;  %v1273_v10 = vpop.f32.mrb[14].mxu0 }
 0x14d   : > { %2407 = vrcp.f32 %v1844_v63  ;;  %v3005_v11 = vadd.f32 %v1651_v55, %v1270_v1  ;;  %v1313_v12 = vadd.f32 %v1312_v8, %v2932_v24  ;;  %v1314_v13 = vpop.f32.mrb[14].mxu1  ;;  %v1274_v14 = vpop.f32.mrb[15].mxu0 }
 0x14e   : > { %v3008_v15 = vadd.f32 %v1652_v58, %v1311_v5  ;;  %v1315_v17 = vpop.f32.mrb[15].mxu1  ;;  %v3011_v20 = vadd.f32 %v1683_v43, %v1272_v6 }
 0x14f   : > { %v2394_v18 = vpop.eup %2393  ;;  %v2270_v19 = vmul.f32 -1.442695, %v3005_v11  ;;  %v3014_v16 = vadd.f32 %v1684_v9, %v1313_v12 }
 0x150   : > { %v2396_v21 = vpop.eup %2395  ;;  %v1845_v22 = vadd.f32 1.0, %v2394_v18  ;;  %v2272_v23 = vmul.f32 -1.442695, %v3008_v15  ;;  %v2271_v30 = vmul.f32 -1.442695, %v3011_v20  ;;  %v1655_v18 = vld [vmem:[%s2929_s15 + $0x50] sm:$0xff] }
 0x151   : > { %v2398_v52 = vpop.eup %2397  ;;  %2409 = vpow2.f32 %v2270_v19  ;;  %v2273_v36 = vmul.f32 -1.442695, %v3014_v16  ;;  %v1937_v42 = vmul.f32 %v2396_v21, %v2956_v60 }
 0x152   : > { %v2400_v25 = vpop.eup %2399  ;;  %2411 = vrcp.f32 %v1845_v22  ;;  %v1847_v26 = vadd.f32 1.0, %v2398_v52  ;;  %v1656_v52 = vld [vmem:[%s2929_s15 + $0x58] sm:$0xff] }
 0x153   : > { %v2402_v27 = vpop.eup %2401  ;;  %v1846_v29 = vadd.f32 1.0, %v2400_v25  ;;  %2413 = vpow2.f32 %v2272_v23 }
 0x154   : > { %2415 = vrcp.f32 %v1847_v26  ;;  %v1848_v34 = vadd.f32 1.0, %v2402_v27 }
 0x155   : > { %v2404_v41 = vpop.eup %2403  ;;  %2417 = vrcp.f32 %v1846_v29  ;;  %v1687_v29 = vcombine.high %v1655_v18, %v1655_v18 }
 0x156   : > { %v2406_v44 = vpop.eup %2405  ;;  %v1939_v45 = vmul.f32 %v2404_v41, %v2959_v0  ;;  %2419 = vrcp.f32 %v1848_v34  ;;  %v1351_v46 = vpop.f32.mrb[16].mxu0  ;;  %v1688_v41 = vcombine.high %v1656_v52, %v1656_v52 }
 0x157   : > { %v2408_v48 = vpop.eup %2407  ;;  %v1938_v49 = vmul.f32 %v2406_v44, %v2962_v4  ;;  %2421 = vpow2.f32 %v2271_v30  ;;  %v1352_v50 = vadd.f32 %v1351_v46, %v2932_v24  ;;  %v1392_v51 = vpop.f32.mrb[16].mxu1 }
 0x158   : > { %v1353_v53 = vpop.f32.mrb[17].mxu0  ;;  %v1940_v35 = vmul.f32 %v2408_v48, %v2964_v7  ;;  %2423 = vpow2.f32 %v2273_v36  ;;  %v1393_v60 = vadd.f32 %v1392_v51, %v2932_v24  ;;  %v1394_v55 = vpop.f32.mrb[17].mxu1 }
 0x159   : > { %v1354_v0 = vadd.f32 %v1353_v53, %v2932_v24  ;;  %v1355_v56 = vpop.f32.mrb[18].mxu0  ;;  %v1999_v39 = vcombine.low %v1937_v42, %v1938_v49  ;;  %v3027_v57 = vadd.f32 %v1653_v31, %v1352_v50  ;;  %v1395_v4 = vadd.f32 %v1394_v55, %v2932_v24  ;;  %v1396_v58 = vpop.f32.mrb[18].mxu1 }
 0x15a   : > { %v1356_v40 = vpop.f32.mrb[19].mxu0  ;;  %v2000_v59 = vcombine.low %v1939_v45, %v1940_v35  ;;  %v3030_v61 = vadd.f32 %v1654_v37, %v1393_v60  ;;  %v1397_v62 = vpop.f32.mrb[19].mxu1 }
 0x15b   : > { %v3032_v7 = vadd.f32 %v1685_v47, %v1354_v0  ;;  %v2410_v63 = vpop.eup %2409  ;;  %2031 = vst [vmem:[%s2995_s20 + $0x10] sm:$0xff] %v1999_v39  ;;  %v2274_v1 = vmul.f32 -1.442695, %v3027_v57  ;;  %v3036_v2 = vadd.f32 %v1686_v54, %v1395_v4  ;;  %v1657_v40 = vld [vmem:[%s2929_s15 + $0x60] sm:$0xff] }
 0x15c   : > { %v2412_v3 = vpop.eup %2411  ;;  %2032 = vst [vmem:[%s2995_s20 + $0x18] sm:$0xff] %v2000_v59  ;;  %v1849_v43 = vadd.f32 1.0, %v2410_v63  ;;  %v2276_v5 = vmul.f32 -1.442695, %v3030_v61 }
 0x15d   : > { %v2414_v6 = vpop.eup %2413  ;;  %2425 = vpow2.f32 %v2274_v1  ;;  %v2275_v8 = vmul.f32 -1.442695, %v3032_v7  ;;  %v1941_v10 = vmul.f32 %v2412_v3, %v2974_v28  ;;  %v2277_v13 = vmul.f32 -1.442695, %v3036_v2  ;;  %v1658_v1 = vld [vmem:[%s2929_s15 + $0x68] sm:$0xff] }
 0x15e   : > { %v2416_v9 = vpop.eup %2415  ;;  %2427 = vrcp.f32 %v1849_v43  ;;  %v1851_v12 = vadd.f32 1.0, %v2414_v6 }
 0x15f   : > { %v2418_v14 = vpop.eup %2417  ;;  %v1943_v17 = vmul.f32 %v2416_v9, %v2977_v32  ;;  %2429 = vpow2.f32 %v2276_v5  ;;  %v1689_v9 = vcombine.high %v1657_v40, %v1657_v40 }
 0x160   : > { %v2420_v19 = vpop.eup %2419  ;;  %v1942_v21 = vmul.f32 %v2418_v14, %v2979_v33  ;;  %2431 = vrcp.f32 %v1851_v12 }
 0x161   : > { %v2422_v22 = vpop.eup %2421  ;;  %v1944_v23 = vmul.f32 %v2420_v19, %v2982_v38  ;;  %2433 = vpow2.f32 %v2275_v8 }
 0x162   : > { %v2424_v28 = vpop.eup %2423  ;;  %v2001_v25 = vcombine.low %v1941_v10, %v1942_v21  ;;  %v1850_v26 = vadd.f32 1.0, %v2422_v22  ;;  %2435 = vpow2.f32 %v2277_v13  ;;  %v1433_v27 = vpop.f32.mrb[20].mxu0 }
 0x163   : > { %v2002_v32 = vcombine.low %v1943_v17, %v1944_v23  ;;  %v1852_v30 = vadd.f32 1.0, %v2424_v28  ;;  %v1434_v31 = vadd.f32 %v1433_v27, %v2932_v24  ;;  %v1474_v34 = vpop.f32.mrb[20].mxu1  ;;  %v1435_v33 = vpop.f32.mrb[21].mxu0 }
 0x164   : > { %2033 = vst [vmem:[%s2995_s20 + $0x20] sm:$0xff] %v2001_v25  ;;  %2437 = vrcp.f32 %v1850_v26  ;;  %v1475_v36 = vadd.f32 %v1474_v34, %v2932_v24  ;;  %v1436_v38 = vadd.f32 %v1435_v33, %v2932_v24  ;;  %v1476_v37 = vpop.f32.mrb[21].mxu1  ;;  %v1437_v42 = vpop.f32.mrb[22].mxu0 }
 0x165   : > { %2034 = vst [vmem:[%s2995_s20 + $0x28] sm:$0xff] %v2002_v32  ;;  %2439 = vrcp.f32 %v1852_v30  ;;  %v3053_v44 = vadd.f32 %v1655_v18, %v1434_v31  ;;  %v1477_v45 = vadd.f32 %v1476_v37, %v2932_v24  ;;  %v1478_v46 = vpop.f32.mrb[22].mxu1  ;;  %v1438_v47 = vpop.f32.mrb[23].mxu0  ;;  %v1690_v18 = vcombine.high %v1658_v1, %v1658_v1 }
 0x166   : > { %v3056_v48 = vadd.f32 %v1656_v52, %v1475_v36  ;;  %v3058_v49 = vadd.f32 %v1687_v29, %v1436_v38  ;;  %v1479_v50 = vpop.f32.mrb[23].mxu1 }
 0x167   : > { %v2426_v51 = vpop.eup %2425  ;;  %v2278_v53 = vmul.f32 -1.442695, %v3053_v44  ;;  %v3062_v0 = vadd.f32 %v1688_v41, %v1477_v45  ;;  %v1659_v50 = vld [vmem:[%s2929_s15 + $0x70] sm:$0xff] }
 0x168   : > { %v2428_v54 = vpop.eup %2427  ;;  %v1853_v35 = vadd.f32 1.0, %v2426_v51  ;;  %v2280_v60 = vmul.f32 -1.442695, %v3056_v48  ;;  %v2279_v56 = vmul.f32 -1.442695, %v3058_v49  ;;  %v1660_v51 = vld [vmem:[%s2929_s15 + $0x78] sm:$0xff] }
 0x169   : > { %v2430_v55 = vpop.eup %2429  ;;  %2441 = vpow2.f32 %v2278_v53  ;;  %v2281_v63 = vmul.f32 -1.442695, %v3062_v0  ;;  %v1945_v3 = vmul.f32 %v2428_v54, %v3005_v11 }
 0x16a   : > { %v2432_v39 = vpop.eup %2431  ;;  %2443 = vrcp.f32 %v1853_v35  ;;  %v1855_v4 = vadd.f32 1.0, %v2430_v55 }
 0x16b   : > { %v2434_v58 = vpop.eup %2433  ;;  %2445 = vpow2.f32 %v2280_v60  ;;  %v1947_v6 = vmul.f32 %v2432_v39, %v3008_v15 }
 0x16c   : > { %v2436_v59 = vpop.eup %2435  ;;  %2447 = vrcp.f32 %v1855_v4  ;;  %v1854_v62 = vadd.f32 1.0, %v2434_v58  ;;  %v1691_v4 = vcombine.high %v1659_v50, %v1659_v50  ;;  %v1692_v58 = vcombine.high %v1660_v51, %v1660_v51 }
 0x16d   : > { %v1856_v43 = vadd.f32 1.0, %v2436_v59  ;;  %2449 = vpow2.f32 %v2279_v56 }
 0x16e   : > { %v2438_v5 = vpop.eup %2437  ;;  %2451 = vrcp.f32 %v1854_v62  ;;  %v1515_v8 = vpop.f32.mrb[24].mxu0 }
 0x16f   : > { %v2440_v10 = vpop.eup %2439  ;;  %v1946_v12 = vmul.f32 %v2438_v5, %v3011_v20  ;;  %2453 = vrcp.f32 %v1856_v43  ;;  %v1516_v13 = vadd.f32 %v1515_v8, %v2932_v24  ;;  %v1556_v14 = vpop.f32.mrb[24].mxu1 }
 0x170   : > { %v1517_v17 = vpop.f32.mrb[25].mxu0  ;;  %v1948_v19 = vmul.f32 %v2440_v10, %v3014_v16  ;;  %2455 = vpow2.f32 %v2281_v63  ;;  %v1557_v11 = vadd.f32 %v1556_v14, %v2932_v24  ;;  %v1558_v21 = vpop.f32.mrb[25].mxu1 }
 0x171   : > { %v1518_v15 = vadd.f32 %v1517_v17, %v2932_v24  ;;  %v1519_v22 = vpop.f32.mrb[26].mxu0  ;;  %v2003_v23 = vcombine.low %v1945_v3, %v1946_v12  ;;  %v3075_v52 = vadd.f32 %v1657_v40, %v1516_v13  ;;  %v1559_v20 = vadd.f32 %v1558_v21, %v2932_v24  ;;  %v1560_v28 = vpop.f32.mrb[26].mxu1 }
 0x172   : > { %v1520_v25 = vpop.f32.mrb[27].mxu0  ;;  %v2004_v26 = vcombine.low %v1947_v6, %v1948_v19  ;;  %v3078_v27 = vadd.f32 %v1658_v1, %v1557_v11  ;;  %v1561_v29 = vpop.f32.mrb[27].mxu1 }
 0x173   : > { %v3080_v16 = vadd.f32 %v1689_v9, %v1518_v15  ;;  %v2442_v32 = vpop.eup %2441  ;;  %2035 = vst [vmem:[%s2995_s20 + $0x30] sm:$0xff] %v2003_v23  ;;  %v2282_v30 = vmul.f32 -1.442695, %v3075_v52  ;;  %v3084_v31 = vadd.f32 %v1690_v18, %v1559_v20 }
 0x174   : > { %v2444_v34 = vpop.eup %2443  ;;  %2036 = vst [vmem:[%s2995_s20 + $0x38] sm:$0xff] %v2004_v26  ;;  %v1857_v33 = vadd.f32 1.0, %v2442_v32  ;;  %v2284_v36 = vmul.f32 -1.442695, %v3078_v27 }
 0x175   : > { %v2446_v38 = vpop.eup %2445  ;;  %2457 = vpow2.f32 %v2282_v30  ;;  %v2283_v37 = vmul.f32 -1.442695, %v3080_v16  ;;  %v1949_v46 = vmul.f32 %v2444_v34, %v3027_v57  ;;  %v2285_v47 = vmul.f32 -1.442695, %v3084_v31 }
 0x176   : > { %v2448_v41 = vpop.eup %2447  ;;  %2459 = vrcp.f32 %v1857_v33  ;;  %v1859_v42 = vadd.f32 1.0, %v2446_v38 }
 0x177   : > { %v2450_v45 = vpop.eup %2449  ;;  %2461 = vpow2.f32 %v2284_v36  ;;  %v1951_v54 = vmul.f32 %v2448_v41, %v3030_v61 }
 0x178   : > { %v2452_v53 = vpop.eup %2451  ;;  %2463 = vrcp.f32 %v1859_v42  ;;  %v1858_v35 = vadd.f32 1.0, %v2450_v45 }
 0x179   : > { %v2454_v60 = vpop.eup %2453  ;;  %v1950_v55 = vmul.f32 %v2452_v53, %v3032_v7  ;;  %2465 = vpow2.f32 %v2283_v37 }
 0x17a   : > { %v2456_v56 = vpop.eup %2455  ;;  %v1952_v39 = vmul.f32 %v2454_v60, %v3036_v2  ;;  %2467 = vrcp.f32 %v1858_v35  ;;  %v1597_v57 = vpop.f32.mrb[28].mxu0 }
 0x17b   : > { %v2005_v40 = vcombine.low %v1949_v46, %v1950_v55  ;;  %v1860_v59 = vadd.f32 1.0, %v2456_v56  ;;  %2469 = vpow2.f32 %v2285_v47  ;;  %v1598_v61 = vadd.f32 %v1597_v57, %v2932_v24  ;;  %v1638_v62 = vpop.f32.mrb[28].mxu1  ;;  %v1599_v63 = vpop.f32.mrb[29].mxu0 }
 0x17c   : > { %v2006_v1 = vcombine.low %v1951_v54, %v1952_v39  ;;  %v1639_v7 = vadd.f32 %v1638_v62, %v2932_v24  ;;  %v1600_v3 = vadd.f32 %v1599_v63, %v2932_v24  ;;  %v1640_v43 = vpop.f32.mrb[29].mxu1  ;;  %v1601_v2 = vpop.f32.mrb[30].mxu0 }
 0x17d   : > { %2037 = vst [vmem:[%s2995_s20 + $0x40] sm:$0xff] %v2005_v40  ;;  %2471 = vrcp.f32 %v1860_v59  ;;  %v3100_v5 = vadd.f32 %v1659_v50, %v1598_v61  ;;  %v1641_v6 = vadd.f32 %v1640_v43, %v2932_v24  ;;  %v1642_v8 = vpop.f32.mrb[30].mxu1  ;;  %v1602_v9 = vpop.f32.mrb[31].mxu0 }
 0x17e   : > { %2038 = vst [vmem:[%s2995_s20 + $0x48] sm:$0xff] %v2006_v1  ;;  %v3104_v10 = vadd.f32 %v1660_v51, %v1639_v7  ;;  %v3106_v12 = vadd.f32 %v1691_v4, %v1600_v3  ;;  %v1643_v13 = vpop.f32.mrb[31].mxu1 }
 0x17f   : > { %v2458_v14 = vpop.eup %2457  ;;  %v2286_v17 = vmul.f32 -1.442695, %v3100_v5  ;;  %v3109_v18 = vadd.f32 %v1692_v58, %v1641_v6 }
 0x180   : > { %v2460_v19 = vpop.eup %2459  ;;  %v1861_v11 = vadd.f32 1.0, %v2458_v14  ;;  %v2288_v15 = vmul.f32 -1.442695, %v3104_v10  ;;  %v2287_v24 = vmul.f32 -1.442695, %v3106_v12 }
 0x181   : > { %v2462_v21 = vpop.eup %2461  ;;  %2473 = vpow2.f32 %v2286_v17  ;;  %v1953_v28 = vmul.f32 %v2460_v19, %v3053_v44  ;;  %v2289_v25 = vmul.f32 -1.442695, %v3109_v18 }
 0x182   : > { %v2464_v22 = vpop.eup %2463  ;;  %2475 = vrcp.f32 %v1861_v11  ;;  %v1863_v23 = vadd.f32 1.0, %v2462_v21 }
 0x183   : > { %v2466_v20 = vpop.eup %2465  ;;  %2477 = vpow2.f32 %v2288_v15  ;;  %v1955_v34 = vmul.f32 %v2464_v22, %v3056_v48 }
 0x184   : > { %v2468_v26 = vpop.eup %2467  ;;  %2479 = vrcp.f32 %v1863_v23  ;;  %v1862_v29 = vadd.f32 1.0, %v2466_v20 }
 0x185   : > { %v2470_v32 = vpop.eup %2469  ;;  %v1954_v30 = vmul.f32 %v2468_v26, %v3058_v49  ;;  %2481 = vpow2.f32 %v2287_v24 }
 0x186   : > { %2483 = vrcp.f32 %v1862_v29  ;;  %v1864_v33 = vadd.f32 1.0, %v2470_v32 }
 0x187   : > { %v2472_v36 = vpop.eup %2471  ;;  %v2007_v38 = vcombine.low %v1953_v28, %v1954_v30  ;;  %2485 = vpow2.f32 %v2289_v25 }
 0x188   : > { %v1956_v44 = vmul.f32 %v2472_v36, %v3062_v0  ;;  %2487 = vrcp.f32 %v1864_v33 }
 0x189   : > { %2039 = vst [vmem:[%s2995_s20 + $0x50] sm:$0xff] %v2007_v38 }
 0x18a   : > { %v2008_v37 = vcombine.low %v1955_v34, %v1956_v44 }
 0x18b   : > { %v2474_v41 = vpop.eup %2473 }
 0x18c   : > { %v2476_v42 = vpop.eup %2475  ;;  %2040 = vst [vmem:[%s2995_s20 + $0x58] sm:$0xff] %v2008_v37  ;;  %v1865_v45 = vadd.f32 1.0, %v2474_v41 }
 0x18d   : > { %v2478_v46 = vpop.eup %2477  ;;  %v1957_v50 = vmul.f32 %v2476_v42, %v3075_v52 }
 0x18e   : > { %v2480_v47 = vpop.eup %2479  ;;  %2489 = vrcp.f32 %v1865_v45  ;;  %v1867_v49 = vadd.f32 1.0, %v2478_v46 }
 0x18f   : > { %v2482_v48 = vpop.eup %2481  ;;  %v1959_v54 = vmul.f32 %v2480_v47, %v3078_v27 }
 0x190   : > { %v2484_v51 = vpop.eup %2483  ;;  %2491 = vrcp.f32 %v1867_v49  ;;  %v1866_v53 = vadd.f32 1.0, %v2482_v48 }
 0x191   : > { %v2486_v0 = vpop.eup %2485  ;;  %v1958_v35 = vmul.f32 %v2484_v51, %v3080_v16 }
 0x192   : > { %v2488_v60 = vpop.eup %2487  ;;  %2493 = vrcp.f32 %v1866_v53  ;;  %v1868_v55 = vadd.f32 1.0, %v2486_v0 }
 0x193   : > { %v2009_v56 = vcombine.low %v1957_v50, %v1958_v35  ;;  %v1960_v39 = vmul.f32 %v2488_v60, %v3084_v31 }
 0x194   : > { %2495 = vrcp.f32 %v1868_v55 }
 0x195   : > { %2041 = vst [vmem:[%s2995_s20 + $0x60] sm:$0xff] %v2009_v56  ;;  %v2010_v57 = vcombine.low %v1959_v54, %v1960_v39 }
 0x197   : > { %2042 = vst [vmem:[%s2995_s20 + $0x68] sm:$0xff] %v2010_v57 }
 0x198   : > { %v2490_v52 = vpop.eup %2489 }
 0x199   : > { %v1961_v58 = vmul.f32 %v2490_v52, %v3100_v5 }
 0x19a   : > { %v2492_v4 = vpop.eup %2491 }
 0x19b   : > { %v1963_v27 = vmul.f32 %v2492_v4, %v3104_v10 }
 0x19c   : > { %v2494_v40 = vpop.eup %2493 }
 0x19d   : > { %v1962_v16 = vmul.f32 %v2494_v40, %v3106_v12 }
 0x19e   : > { %v2496_v59 = vpop.eup %2495 }
 0x19f   : > { %v2011_v61 = vcombine.low %v1961_v58, %v1962_v16  ;;  %v1964_v62 = vmul.f32 %v2496_v59, %v3109_v18 }
 0x1a1   : > { %2043 = vst [vmem:[%s2995_s20 + $0x70] sm:$0xff] %v2011_v61  ;;  %v2012_v31 = vcombine.low %v1963_v27, %v1964_v62 }
 0x1a3   : > { %2044 = vst [vmem:[%s2995_s20 + $0x78] sm:$0xff] %v2012_v31 }
 0x1a4 PF: > { %p11_p9 = scmp.ge.s32.totalorder %s2564_s19, 4   ;;  %s3147_s15 = smov %s2515_s16 }
 0x1a5   : > { %s3148_s16 = smov %s2573_s22  ;;  %s3149_s17 = smov %s2564_s19 }
 0x1a6   :  { %13 = sbr.rel (!%p11_p9) target bundleno = 2 (0x2), region = 97 }

// kernel: _lambda_.10
= control target key start
LH: loop header
LB: loop body
LE: loop exit
PB: predicated region body
PF: predicated region fallthrough
CT: control target
= control target key end

     0   :  { %s910_s12 = smov 0   ;;  %s912_s13 = smov 0   ;;  %s1090_s0 = inlined_call_operand.vmem [shape: bf16[8,64], index: 0, kind: input, shape index: {}]   ;;  %s1091_s1 = inlined_call_operand.vmem [shape: f32[8,1], index: 1, kind: input, shape index: {}]   ;;  %s1092_s2 = inlined_call_operand.vmem [shape: bf16[64,2048], index: 2, kind: input, shape index: {}]   ;;  %s1093_s3 = inlined_call_operand.vmem [shape: f32[8,2048], index: 3, kind: output, shape index: {}]  }
   0x1   :  { %s914_s14 = smov 0  }
   0x2 LB: > { %s749_s15 = sadd.s32 4294967295, %s887_s14   ;;  %s927_s16 = sadd.s32 1, %s887_s14   ;;  %s887_s14 = sphi %s914_s14, %s1096_s14   ;;  %s883_s13 = sphi %s912_s13, %s1095_s13   ;;  %s879_s12 = sphi %s910_s12, %s1094_s12  }
   0x3   : > { %s59_s17 = ssub.s32 %s887_s14, %s927_s16  ;;  %s62_s18 = sadd.s32 1, %s883_s13 }
   0x4   : > { %p60_p0 = scmp.eq.s32.totalorder %s59_s17, 0  ;;  %p69_p1 = scmp.ne.s32.totalorder %s883_s13, %s879_s12 }
   0x5   : > { %p70_p2 = scmp.eq.s32.totalorder %s887_s14, 0  ;;  %p752_p4 = scmp.ge.s32.totalorder %s887_s14, 2 }
   0x6   : > { %s936_s19 = scalar_select %p60_p0, %s883_s13, %s62_s18  }
   0x7   : > { %p71_p3 = por %p70_p2, %p69_p1  ;;  %127 = sbr.rel (%p752_p4) target bundleno = 34 (0x22), region = 24 }
   0xe   : > { %130 = sbr.rel (!%p71_p3) target bundleno = 34 (0x22), region = 28  ;;  %s132_s20 = sand.u32 (%p71_p3), 1, %s883_s13  }
   0xf   : > { %s806_s21 = sshll.u32 (%p71_p3), %s887_s14, 5  ;;  %s753_s22 = sshll.u32 (%p71_p3), %s132_s20, 8 }
  0x10   : > { %s944_s25 = scalar_lea.vmem (%p71_p3), %s1092_s2, %s806_s21  ;;  %s949_s26 = scalar_lea.vmem (%p71_p3), [#allocation2], %s753_s22 }
  0x11   : > { %v150_v0 = vld [vmem:[%s944_s25] sm:$0xff] (%p71_p3)  ;;  %v152_v1 = vld [vmem:[%s944_s25 + $0x8] sm:$0xff] (%p71_p3)  ;;  %v154_v2 = vld [vmem:[%s944_s25 + $0x10] sm:$0xff] (%p71_p3) }
  0x12   : > { %151 = vst [vmem:[%s949_s26] sm:$0xff] (%p71_p3), %v150_v0  ;;  %153 = vst [vmem:[%s949_s26 + $0x8] sm:$0xff] (%p71_p3), %v152_v1  ;;  %v156_v3 = vld [vmem:[%s944_s25 + $0x18] sm:$0xff] (%p71_p3)  ;;  %v158_v4 = vld [vmem:[%s944_s25 + $0x40] sm:$0xff] (%p71_p3) }
  0x13   : > { %155 = vst [vmem:[%s949_s26 + $0x10] sm:$0xff] (%p71_p3), %v154_v2  ;;  %v160_v5 = vld [vmem:[%s944_s25 + $0x48] sm:$0xff] (%p71_p3)  ;;  %157 = vst [vmem:[%s949_s26 + $0x18] sm:$0xff] (%p71_p3), %v156_v3  ;;  %v162_v6 = vld [vmem:[%s944_s25 + $0x50] sm:$0xff] (%p71_p3) }
  0x14   : > { %159 = vst [vmem:[%s949_s26 + $0x20] sm:$0xff] (%p71_p3), %v158_v4  ;;  %161 = vst [vmem:[%s949_s26 + $0x28] sm:$0xff] (%p71_p3), %v160_v5  ;;  %v164_v7 = vld [vmem:[%s944_s25 + $0x58] sm:$0xff] (%p71_p3)  ;;  %v166_v8 = vld [vmem:[%s944_s25 + $0x80] sm:$0xff] (%p71_p3) }
  0x15   : > { %163 = vst [vmem:[%s949_s26 + $0x30] sm:$0xff] %v162_v6  ;;  %165 = vst [vmem:[%s949_s26 + $0x38] sm:$0xff] %v164_v7  ;;  %v168_v9 = vld [vmem:[%s944_s25 + $0x88] sm:$0xff]  ;;  %v170_v10 = vld [vmem:[%s944_s25 + $0x90] sm:$0xff] }
  0x16   : > { %167 = vst [vmem:[%s949_s26 + $0x40] sm:$0xff] %v166_v8  ;;  %v172_v11 = vld [vmem:[%s944_s25 + $0x98] sm:$0xff]  ;;  %169 = vst [vmem:[%s949_s26 + $0x48] sm:$0xff] %v168_v9  ;;  %v174_v12 = vld [vmem:[%s944_s25 + $0xc0] sm:$0xff] }
  0x17   : > { %171 = vst [vmem:[%s949_s26 + $0x50] sm:$0xff] %v170_v10  ;;  %173 = vst [vmem:[%s949_s26 + $0x58] sm:$0xff] %v172_v11  ;;  %v176_v13 = vld [vmem:[%s944_s25 + $0xc8] sm:$0xff]  ;;  %v178_v14 = vld [vmem:[%s944_s25 + $0xd0] sm:$0xff] }
  0x18   : > { %175 = vst [vmem:[%s949_s26 + $0x60] sm:$0xff] %v174_v12  ;;  %177 = vst [vmem:[%s949_s26 + $0x68] sm:$0xff] %v176_v13  ;;  %v180_v15 = vld [vmem:[%s944_s25 + $0xd8] sm:$0xff]  ;;  %v182_v16 = vld [vmem:[%s944_s25 + $0x100] sm:$0xff] }
  0x19   : > { %179 = vst [vmem:[%s949_s26 + $0x70] sm:$0xff] %v178_v14  ;;  %v184_v17 = vld [vmem:[%s944_s25 + $0x108] sm:$0xff]  ;;  %181 = vst [vmem:[%s949_s26 + $0x78] sm:$0xff] %v180_v15  ;;  %v186_v18 = vld [vmem:[%s944_s25 + $0x110] sm:$0xff] }
  0x1a   : > { %183 = vst [vmem:[%s949_s26 + $0x80] sm:$0xff] %v182_v16  ;;  %185 = vst [vmem:[%s949_s26 + $0x88] sm:$0xff] %v184_v17  ;;  %v188_v19 = vld [vmem:[%s944_s25 + $0x118] sm:$0xff]  ;;  %v190_v20 = vld [vmem:[%s944_s25 + $0x140] sm:$0xff] }
  0x1b   : > { %187 = vst [vmem:[%s949_s26 + $0x90] sm:$0xff] %v186_v18  ;;  %189 = vst [vmem:[%s949_s26 + $0x98] sm:$0xff] %v188_v19  ;;  %v192_v21 = vld [vmem:[%s944_s25 + $0x148] sm:$0xff]  ;;  %v194_v22 = vld [vmem:[%s944_s25 + $0x150] sm:$0xff] }
  0x1c   : > { %191 = vst [vmem:[%s949_s26 + $0xa0] sm:$0xff] %v190_v20  ;;  %v196_v23 = vld [vmem:[%s944_s25 + $0x158] sm:$0xff]  ;;  %193 = vst [vmem:[%s949_s26 + $0xa8] sm:$0xff] %v192_v21  ;;  %v198_v24 = vld [vmem:[%s944_s25 + $0x180] sm:$0xff] }
  0x1d   : > { %195 = vst [vmem:[%s949_s26 + $0xb0] sm:$0xff] %v194_v22  ;;  %197 = vst [vmem:[%s949_s26 + $0xb8] sm:$0xff] %v196_v23  ;;  %v200_v25 = vld [vmem:[%s944_s25 + $0x188] sm:$0xff]  ;;  %v202_v26 = vld [vmem:[%s944_s25 + $0x190] sm:$0xff] }
  0x1e   : > { %199 = vst [vmem:[%s949_s26 + $0xc0] sm:$0xff] %v198_v24  ;;  %201 = vst [vmem:[%s949_s26 + $0xc8] sm:$0xff] %v200_v25  ;;  %v204_v27 = vld [vmem:[%s944_s25 + $0x198] sm:$0xff]  ;;  %v206_v28 = vld [vmem:[%s944_s25 + $0x1c0] sm:$0xff] }
  0x1f   : > { %203 = vst [vmem:[%s949_s26 + $0xd0] sm:$0xff] %v202_v26  ;;  %v208_v29 = vld [vmem:[%s944_s25 + $0x1c8] sm:$0xff]  ;;  %205 = vst [vmem:[%s949_s26 + $0xd8] sm:$0xff] %v204_v27  ;;  %v210_v30 = vld [vmem:[%s944_s25 + $0x1d0] sm:$0xff] }
  0x20   : > { %207 = vst [vmem:[%s949_s26 + $0xe0] sm:$0xff] %v206_v28  ;;  %209 = vst [vmem:[%s949_s26 + $0xe8] sm:$0xff] %v208_v29  ;;  %v212_v31 = vld [vmem:[%s944_s25 + $0x1d8] sm:$0xff] }
  0x21   : > { %211 = vst [vmem:[%s949_s26 + $0xf0] sm:$0xff] %v210_v30  ;;  %213 = vst [vmem:[%s949_s26 + $0xf8] sm:$0xff] %v212_v31 }
  0x22 PF: > { %p756_p5 = scmp.ge.s32.totalorder %s887_s14, 1  ;;  %p218_p6 = scmp.lt.s32.totalorder %s887_s14, 3 }
  0x24   : > { %p219_p7 = pnand %p756_p5, %p218_p6 }
  0x25   : > { %s225_s27 = sand.u32 (!%p219_p7), 1, %s879_s12   ;;  %v289_v32 = vld [vmem:[%s1091_s1] sm:$0xff] (!%p219_p7)  ;;  %v889_v33 = vmov (!%p219_p7), 0   ;;  %vm455_vm0 = vcmask (!%p219_p7), 523264   ;;  %s758_s7 = sshll.u32 (!%p219_p7), %s749_s15, 3 }
  0x26   : > { %222 = sbr.rel (%p219_p7) target bundleno = 323 (0x143), region = 51  ;;  %s757_s30 = sshll.u32 (!%p219_p7), %s225_s27, 8  ;;  %491 = vmatprep.mubr.bf16.mxu0 (!%p219_p7), %v889_v33  ;;  %532 = vmatprep.mubr.bf16.mxu1 (!%p219_p7), %v889_v33  ;;  %v256_v12 = vld [vmem:[%s1090_s0] sm:$0xf] (!%p219_p7) }
  0x27   : > { %832 = vset.pattern.permute.xlu0 (!%p219_p7), %v889_v33  ;;  %s1021_s4 = scalar_lea.vmem (!%p219_p7), [#allocation2], %s757_s30  ;;  %p250_p8 = scmp.lt.s32.totalorder (!%p219_p7), %s758_s7, 15 }
  0x28   : > { %v257_v34 = vld [vmem:[%s1021_s4] sm:$0xff] (!%p219_p7)  ;;  %v258_v36 = vld [vmem:[%s1021_s4 + $0x8] sm:$0xff] (!%p219_p7)  ;;  %292 = vperm.xlu0 (!%p219_p7), %832, %v289_v32   ;;  %v259_v0 = vld [vmem:[%s1021_s4 + $0x10] sm:$0xff] (!%p219_p7) }
  0x29   : > { %v261_v35 = vld [vmem:[%s1021_s4 + $0x20] sm:$0xff] (!%p219_p7)  ;;  %v262_v38 = vld [vmem:[%s1021_s4 + $0x28] sm:$0xff] (!%p219_p7)  ;;  %v263_v1 = vld [vmem:[%s1021_s4 + $0x30] sm:$0xff] (!%p219_p7) }
  0x2a   : > { %v761_v37 = vcombine.high (!%p219_p7), %v257_v34, %v261_v35  ;;  %v760_v39 = vcombine.low (!%p219_p7), %v257_v34, %v261_v35  ;;  %v265_v40 = vld [vmem:[%s1021_s4 + $0x40] sm:$0xff] (!%p219_p7)  ;;  %v763_v42 = vcombine.high (!%p219_p7), %v258_v36, %v262_v38  ;;  %v762_v43 = vcombine.low (!%p219_p7), %v258_v36, %v262_v38  ;;  %v266_v45 = vld [vmem:[%s1021_s4 + $0x48] sm:$0xff] (!%p219_p7)  ;;  %v260_v2 = vld [vmem:[%s1021_s4 + $0x18] sm:$0xff] (!%p219_p7) }
  0x2b   : > { %v269_v41 = vld [vmem:[%s1021_s4 + $0x60] sm:$0xff] (!%p219_p7)  ;;  %v270_v46 = vld [vmem:[%s1021_s4 + $0x68] sm:$0xff] (!%p219_p7)  ;;  %v264_v3 = vld [vmem:[%s1021_s4 + $0x38] sm:$0xff] (!%p219_p7)  ;;  %v765_v6 = vcombine.high (!%p219_p7), %v259_v0, %v263_v1  ;;  %v764_v13 = vcombine.low (!%p219_p7), %v259_v0, %v263_v1 }
  0x2c   : > { %v769_v44 = vcombine.high (!%p219_p7), %v265_v40, %v269_v41  ;;  %v273_v47 = vld [vmem:[%s1021_s4 + $0x80] sm:$0xff] (!%p219_p7)  ;;  %459 = vmatprep.subr.bf16.mxu0 (!%p219_p7), %v761_v37  ;;  %v771_v48 = vcombine.high (!%p219_p7), %v266_v45, %v270_v46  ;;  %v274_v50 = vld [vmem:[%s1021_s4 + $0x88] sm:$0xff] (!%p219_p7)  ;;  %500 = vmatprep.subr.bf16.mxu1 (!%p219_p7), %v763_v42  ;;  %v768_v52 = vcombine.low (!%p219_p7), %v265_v40, %v269_v41  ;;  %v267_v8 = vld [vmem:[%s1021_s4 + $0x50] sm:$0xff] (!%p219_p7) }
  0x2d   : > { %v277_v49 = vld [vmem:[%s1021_s4 + $0xa0] sm:$0xff]  ;;  %v278_v51 = vld [vmem:[%s1021_s4 + $0xa8] sm:$0xff]  ;;  %460 = vmatpush1.bf16.msra.mxu0 %v760_v39  ;;  %501 = vmatpush1.bf16.msra.mxu1 %v762_v43  ;;  %v770_v53 = vcombine.low %v266_v45, %v270_v46  ;;  %v767_v7 = vcombine.high %v260_v2, %v264_v3  ;;  %v271_v9 = vld [vmem:[%s1021_s4 + $0x70] sm:$0xff]  ;;  %v766_v14 = vcombine.low %v260_v2, %v264_v3  ;;  %s1098_s7 = smov (!%p250_p8, %s758_s7), 15 }
  0x2e   : > { %461 = vmatprep.subr.bf16.mxu0 %v769_v44  ;;  %v777_v54 = vcombine.high %v273_v47, %v277_v49  ;;  %502 = vmatprep.subr.bf16.mxu1 %v771_v48  ;;  %v779_v55 = vcombine.high %v274_v50, %v278_v51  ;;  %v281_v56 = vld [vmem:[%s1021_s4 + $0xc0] sm:$0xff]  ;;  %v282_v58 = vld [vmem:[%s1021_s4 + $0xc8] sm:$0xff]  ;;  %v776_v60 = vcombine.low %v273_v47, %v277_v49  ;;  %v268_v10 = vld [vmem:[%s1021_s4 + $0x58] sm:$0xff]  ;;  %s759_s8 = sshll.u32 %s1098_s7, 3 }
  0x2f   : > { %v285_v57 = vld [vmem:[%s1021_s4 + $0xe0] sm:$0xff]  ;;  %v286_v59 = vld [vmem:[%s1021_s4 + $0xe8] sm:$0xff]  ;;  %v778_v61 = vcombine.low %v274_v50, %v278_v51  ;;  %v272_v11 = vld [vmem:[%s1021_s4 + $0x78] sm:$0xff]  ;;  %v773_v15 = vcombine.high %v267_v8, %v271_v9  ;;  %v772_v21 = vcombine.low %v267_v8, %v271_v9  ;;  %s1070_s11 = scalar_lea.vmem %s1093_s3, %s759_s8 }
  0x30   : > { %v785_v62 = vcombine.high %v281_v56, %v285_v57  ;;  %v787_v63 = vcombine.high %v282_v58, %v286_v59  ;;  %v784_v4 = vcombine.low %v281_v56, %v285_v57  ;;  %v786_v5 = vcombine.low %v282_v58, %v286_v59  ;;  %v275_v17 = vld [vmem:[%s1021_s4 + $0x90] sm:$0xff]  ;;  %v276_v19 = vld [vmem:[%s1021_s4 + $0x98] sm:$0xff] }
  0x31   : > { %462 = vmatpush1.bf16.msra.mxu0 %v768_v52  ;;  %503 = vmatpush1.bf16.msra.mxu1 %v770_v53  ;;  %v775_v16 = vcombine.high %v268_v10, %v272_v11  ;;  %v279_v18 = vld [vmem:[%s1021_s4 + $0xb0] sm:$0xff]  ;;  %v280_v20 = vld [vmem:[%s1021_s4 + $0xb8] sm:$0xff]  ;;  %v774_v22 = vcombine.low %v268_v10, %v272_v11 }
  0x32   : > { %463 = vmatprep.subr.bf16.mxu0 %v777_v54  ;;  %504 = vmatprep.subr.bf16.mxu1 %v779_v55  ;;  %v781_v23 = vcombine.high %v275_v17, %v279_v18  ;;  %v783_v24 = vcombine.high %v276_v19, %v280_v20  ;;  %v283_v25 = vld [vmem:[%s1021_s4 + $0xd0] sm:$0xff]  ;;  %v284_v27 = vld [vmem:[%s1021_s4 + $0xd8] sm:$0xff]  ;;  %v780_v29 = vcombine.low %v275_v17, %v279_v18 }
  0x33   : > { %v287_v26 = vld [vmem:[%s1021_s4 + $0xf0] sm:$0xff]  ;;  %v288_v28 = vld [vmem:[%s1021_s4 + $0xf8] sm:$0xff]  ;;  %v782_v30 = vcombine.low %v276_v19, %v280_v20 }
  0x34   : > { %v789_v31 = vcombine.high %v283_v25, %v287_v26  ;;  %v791_v32 = vcombine.high %v284_v27, %v288_v28  ;;  %v788_v34 = vcombine.low %v283_v25, %v287_v26  ;;  %v790_v35 = vcombine.low %v284_v27, %v288_v28 }
  0x35   : > { %464 = vmatpush1.bf16.msra.mxu0 %v776_v60  ;;  %505 = vmatpush1.bf16.msra.mxu1 %v778_v61 }
  0x36   : > { %465 = vmatprep.subr.bf16.mxu0 %v785_v62  ;;  %506 = vmatprep.subr.bf16.mxu1 %v787_v63 }
  0x39   : > { %466 = vmatpush1.bf16.msra.mxu0 %v784_v4  ;;  %507 = vmatpush1.bf16.msra.mxu1 %v786_v5 }
  0x3a   : > { %541 = vmatprep.subr.bf16.mxu0 %v765_v6  ;;  %582 = vmatprep.subr.bf16.mxu1 %v767_v7 }
  0x3c   : > { %792 = vmatmul.mubr.msk.bf16.vlgmr.msra.gmra.mrb[0].mxu0 %vm455_vm0, %v256_v12  ;;  %793 = vmatmul.mubr.msk.bf16.vlgmr.msra.gmra.mrb[0].mxu1 %vm455_vm0, %v256_v12 }
  0x3d   : > { %542 = vmatpush1.bf16.msra.mxu0 %v764_v13  ;;  %583 = vmatpush1.bf16.msra.mxu1 %v766_v14 }
  0x3e   : > { %543 = vmatprep.subr.bf16.mxu0 %v773_v15  ;;  %584 = vmatprep.subr.bf16.mxu1 %v775_v16 }
  0x3f   : > { %573 = vmatprep.mubr.bf16.mxu0 %v889_v33  ;;  %614 = vmatprep.mubr.bf16.mxu1 %v889_v33 }
  0x41   : > { %544 = vmatpush1.bf16.msra.mxu0 %v772_v21  ;;  %585 = vmatpush1.bf16.msra.mxu1 %v774_v22 }
  0x42   : > { %545 = vmatprep.subr.bf16.mxu0 %v781_v23  ;;  %586 = vmatprep.subr.bf16.mxu1 %v783_v24 }
  0x45   : > { %546 = vmatpush1.bf16.msra.mxu0 %v780_v29  ;;  %587 = vmatpush1.bf16.msra.mxu1 %v782_v30 }
  0x46   : > { %547 = vmatprep.subr.bf16.mxu0 %v789_v31  ;;  %588 = vmatprep.subr.bf16.mxu1 %v791_v32 }
  0x49   : > { %548 = vmatpush1.bf16.msra.mxu0 %v788_v34  ;;  %589 = vmatpush1.bf16.msra.mxu1 %v790_v35 }
  0x4c   : > { %794 = vmatmul.mubr.msk.bf16.vlgmr.msra.gmra.mrb[4].mxu0 %vm455_vm0, %v256_v12  ;;  %795 = vmatmul.mubr.msk.bf16.vlgmr.msra.gmra.mrb[4].mxu1 %vm455_vm0, %v256_v12 }
  0xa7   : > { %v293_v33 = vpop.permute.xlu0 %292 }
 0x10f   : > { %v493_v36 = vpop.f32.mrb[0].mxu0  ;;  %v534_v38 = vpop.f32.mrb[0].mxu1 }
 0x110   : > { %v494_v37 = vadd.f32 %v493_v36, %v293_v33  ;;  %v495_v39 = vpop.f32.mrb[1].mxu0  ;;  %v535_v40 = vadd.f32 %v534_v38, %v293_v33  ;;  %v536_v42 = vpop.f32.mrb[1].mxu1 }
 0x111   : > { %v496_v41 = vadd.f32 %v495_v39, %v293_v33  ;;  %v497_v43 = vpop.f32.mrb[2].mxu0  ;;  %v537_v45 = vadd.f32 %v536_v42, %v293_v33  ;;  %v538_v46 = vpop.f32.mrb[2].mxu1 }
 0x112   : > { %v796_v44 = vmul.f32 -1.442695, %v494_v37  ;;  %v498_v47 = vpop.f32.mrb[3].mxu0  ;;  %v798_v48 = vmul.f32 -1.442695, %v535_v40  ;;  %v539_v50 = vpop.f32.mrb[3].mxu1 }
 0x113   : > { %v797_v49 = vmul.f32 -1.442695, %v496_v41  ;;  %v799_v51 = vmul.f32 -1.442695, %v537_v45 }
 0x114   : > { %833 = vpow2.f32 %v796_v44 }
 0x115   : > { %835 = vpow2.f32 %v798_v48 }
 0x116   : > { %837 = vpow2.f32 %v797_v49 }
 0x117   : > { %839 = vpow2.f32 %v799_v51 }
 0x11e   : > { %v834_v52 = vpop.eup %833 }
 0x11f   : > { %v836_v53 = vpop.eup %835  ;;  %v647_v54 = vadd.f32 1.0, %v834_v52  ;;  %v575_v55 = vpop.f32.mrb[4].mxu0 }
 0x120   : > { %v838_v56 = vpop.eup %837  ;;  %v649_v57 = vadd.f32 1.0, %v836_v53  ;;  %v576_v58 = vadd.f32 %v575_v55, %v293_v33  ;;  %v616_v59 = vpop.f32.mrb[4].mxu1 }
 0x121   : > { %v577_v60 = vpop.f32.mrb[5].mxu0  ;;  %v840_v61 = vpop.eup %839  ;;  %841 = vrcp.f32 %v647_v54  ;;  %v648_v62 = vadd.f32 1.0, %v838_v56  ;;  %v617_v63 = vadd.f32 %v616_v59, %v293_v33 }
 0x122   : > { %v578_v0 = vadd.f32 %v577_v60, %v293_v33  ;;  %v618_v1 = vpop.f32.mrb[5].mxu1  ;;  %v579_v2 = vpop.f32.mrb[6].mxu0  ;;  %843 = vrcp.f32 %v649_v57  ;;  %v650_v3 = vadd.f32 1.0, %v840_v61  ;;  %v800_v4 = vmul.f32 -1.442695, %v576_v58 }
 0x123   : > { %v619_v5 = vadd.f32 %v618_v1, %v293_v33  ;;  %v620_v6 = vpop.f32.mrb[6].mxu1  ;;  %v580_v7 = vpop.f32.mrb[7].mxu0  ;;  %845 = vrcp.f32 %v648_v62  ;;  %v802_v8 = vmul.f32 -1.442695, %v617_v63 }
 0x124   : > { %v801_v9 = vmul.f32 -1.442695, %v578_v0  ;;  %v621_v10 = vpop.f32.mrb[7].mxu1  ;;  %847 = vrcp.f32 %v650_v3 }
 0x125   : > { %v803_v11 = vmul.f32 -1.442695, %v619_v5  ;;  %849 = vpow2.f32 %v800_v4 }
 0x126   : > { %851 = vpow2.f32 %v802_v8 }
 0x127   : > { %853 = vpow2.f32 %v801_v9 }
 0x128   : > { %855 = vpow2.f32 %v803_v11 }
 0x12b   : > { %v842_v12 = vpop.eup %841 }
 0x12c   : > { %v844_v13 = vpop.eup %843  ;;  %v671_v14 = vmul.f32 %v842_v12, %v494_v37 }
 0x12d   : > { %v846_v15 = vpop.eup %845  ;;  %v673_v16 = vmul.f32 %v844_v13, %v535_v40 }
 0x12e   : > { %v848_v17 = vpop.eup %847  ;;  %679 = vst [vmem:[%s1070_s11] sm:$0xff] %v671_v14  ;;  %v672_v18 = vmul.f32 %v846_v15, %v496_v41 }
 0x12f   : > { %v850_v19 = vpop.eup %849  ;;  %681 = vst [vmem:[%s1070_s11 + $0x10] sm:$0xff] %v673_v16  ;;  %v674_v20 = vmul.f32 %v848_v17, %v537_v45 }
 0x130   : > { %v852_v21 = vpop.eup %851  ;;  %680 = vst [vmem:[%s1070_s11 + $0x8] sm:$0xff] %v672_v18  ;;  %v651_v22 = vadd.f32 1.0, %v850_v19 }
 0x131   : > { %v854_v23 = vpop.eup %853  ;;  %682 = vst [vmem:[%s1070_s11 + $0x18] sm:$0xff] %v674_v20  ;;  %v653_v24 = vadd.f32 1.0, %v852_v21 }
 0x132   : > { %v856_v25 = vpop.eup %855  ;;  %857 = vrcp.f32 %v651_v22  ;;  %v652_v26 = vadd.f32 1.0, %v854_v23 }
 0x133   : > { %859 = vrcp.f32 %v653_v24  ;;  %v654_v27 = vadd.f32 1.0, %v856_v25 }
 0x134   : > { %861 = vrcp.f32 %v652_v26 }
 0x135   : > { %863 = vrcp.f32 %v654_v27 }
 0x13c   : > { %v858_v28 = vpop.eup %857 }
 0x13d   : > { %v860_v29 = vpop.eup %859  ;;  %v675_v30 = vmul.f32 %v858_v28, %v576_v58 }
 0x13e   : > { %v862_v31 = vpop.eup %861  ;;  %v677_v32 = vmul.f32 %v860_v29, %v617_v63 }
 0x13f   : > { %v864_v34 = vpop.eup %863  ;;  %683 = vst [vmem:[%s1070_s11 + $0x20] sm:$0xff] %v675_v30  ;;  %v676_v35 = vmul.f32 %v862_v31, %v578_v0 }
 0x140   : > { %685 = vst [vmem:[%s1070_s11 + $0x30] sm:$0xff] %v677_v32  ;;  %v678_v33 = vmul.f32 %v864_v34, %v619_v5 }
 0x141   : > { %684 = vst [vmem:[%s1070_s11 + $0x28] sm:$0xff] %v676_v35 }
 0x142   : > { %686 = vst [vmem:[%s1070_s11 + $0x38] sm:$0xff] %v678_v33 }
 0x143 PF: > { %p10_p9 = scmp.ge.s32.totalorder %s927_s16, 4   ;;  %s1094_s12 = smov %s883_s13 }
 0x144   : > { %s1095_s13 = smov %s936_s19  ;;  %s1096_s14 = smov %s927_s16 }
 0x145   :  { %12 = sbr.rel (!%p10_p9) target bundleno = 2 (0x2), region = 90 }

// kernel: _lambda_.11
= control target key start
LH: loop header
LB: loop body
LE: loop exit
PB: predicated region body
PF: predicated region fallthrough
CT: control target
= control target key end

     0   :  { %s626_s12 = smov 0   ;;  %s628_s13 = smov 0   ;;  %s702_s0 = inlined_call_operand.vmem [shape: bf16[8,128], index: 0, kind: input, shape index: {}]   ;;  %s703_s1 = inlined_call_operand.vmem [shape: f32[8,1], index: 1, kind: input, shape index: {}]   ;;  %s704_s2 = inlined_call_operand.vmem [shape: bf16[128,512], index: 2, kind: input, shape index: {}]   ;;  %s705_s3 = inlined_call_operand.vmem [shape: f32[8,512], index: 3, kind: output, shape index: {}]  }
   0x1   :  { %s630_s14 = smov 0  }
   0x2 LB: > { %s491_s15 = sadd.s32 4294967295, %s603_s14   ;;  %s643_s16 = sadd.s32 1, %s603_s14   ;;  %s603_s14 = sphi %s630_s14, %s708_s14   ;;  %s599_s13 = sphi %s628_s13, %s707_s13   ;;  %s595_s12 = sphi %s626_s12, %s706_s12  }
   0x3   : > { %s59_s17 = ssub.s32 %s603_s14, %s643_s16  ;;  %s62_s18 = sadd.s32 1, %s599_s13 }
   0x4   : > { %p60_p0 = scmp.eq.s32.totalorder %s59_s17, 0  ;;  %p69_p1 = scmp.ne.s32.totalorder %s599_s13, %s595_s12 }
   0x5   : > { %p70_p2 = scmp.eq.s32.totalorder %s603_s14, 0  ;;  %p494_p4 = scmp.ge.s32.totalorder %s603_s14, 2 }
   0x6   : > { %s652_s19 = scalar_select %p60_p0, %s599_s13, %s62_s18  }
   0x7   : > { %p71_p3 = por %p70_p2, %p69_p1  ;;  %127 = sbr.rel (%p494_p4) target bundleno = 26 (0x1a), region = 24 }
   0xe   : > { %130 = sbr.rel (!%p71_p3) target bundleno = 26 (0x1a), region = 28  ;;  %s132_s20 = sand.u32 (%p71_p3), 1, %s599_s13  }
   0xf   : > { %s522_s21 = sshll.u32 (%p71_p3), %s603_s14, 3  ;;  %s495_s22 = sshll.u32 (%p71_p3), %s132_s20, 7 }
  0x10   : > { %s660_s25 = scalar_lea.vmem (%p71_p3), %s704_s2, %s522_s21  ;;  %s134_s26 = scalar_lea.vmem (%p71_p3), [#allocation2], %s495_s22 }
  0x11   : > { %v195_v0 = vld [vmem:[%s660_s25] sm:$0xff] (%p71_p3)  ;;  %v197_v1 = vld [vmem:[%s660_s25 + $0x10] sm:$0xff] (%p71_p3) }
  0x12   : > { %v199_v2 = vld [vmem:[%s660_s25 + $0x20] sm:$0xff] (%p71_p3)  ;;  %196 = vst [vmem:[%s134_s26] sm:$0xff] (%p71_p3), %v195_v0  ;;  %198 = vst [vmem:[%s134_s26 + $0x8] sm:$0xff] (%p71_p3), %v197_v1  ;;  %v201_v3 = vld [vmem:[%s660_s25 + $0x30] sm:$0xff] (%p71_p3) }
  0x13   : > { %200 = vst [vmem:[%s134_s26 + $0x10] sm:$0xff] (%p71_p3), %v199_v2  ;;  %v203_v4 = vld [vmem:[%s660_s25 + $0x40] sm:$0xff] (%p71_p3)  ;;  %v205_v5 = vld [vmem:[%s660_s25 + $0x50] sm:$0xff] (%p71_p3)  ;;  %202 = vst [vmem:[%s134_s26 + $0x18] sm:$0xff] (%p71_p3), %v201_v3 }
  0x14   : > { %204 = vst [vmem:[%s134_s26 + $0x20] sm:$0xff] (%p71_p3), %v203_v4  ;;  %206 = vst [vmem:[%s134_s26 + $0x28] sm:$0xff] (%p71_p3), %v205_v5  ;;  %v207_v6 = vld [vmem:[%s660_s25 + $0x60] sm:$0xff] (%p71_p3)  ;;  %v209_v7 = vld [vmem:[%s660_s25 + $0x70] sm:$0xff] (%p71_p3) }
  0x15   : > { %v211_v8 = vld [vmem:[%s660_s25 + $0x80] sm:$0xff]  ;;  %208 = vst [vmem:[%s134_s26 + $0x30] sm:$0xff] %v207_v6  ;;  %210 = vst [vmem:[%s134_s26 + $0x38] sm:$0xff] %v209_v7  ;;  %v213_v9 = vld [vmem:[%s660_s25 + $0x90] sm:$0xff] }
  0x16   : > { %212 = vst [vmem:[%s134_s26 + $0x40] sm:$0xff] %v211_v8  ;;  %v215_v10 = vld [vmem:[%s660_s25 + $0xa0] sm:$0xff]  ;;  %v217_v11 = vld [vmem:[%s660_s25 + $0xb0] sm:$0xff]  ;;  %214 = vst [vmem:[%s134_s26 + $0x48] sm:$0xff] %v213_v9 }
  0x17   : > { %216 = vst [vmem:[%s134_s26 + $0x50] sm:$0xff] %v215_v10  ;;  %218 = vst [vmem:[%s134_s26 + $0x58] sm:$0xff] %v217_v11  ;;  %v219_v12 = vld [vmem:[%s660_s25 + $0xc0] sm:$0xff]  ;;  %v221_v13 = vld [vmem:[%s660_s25 + $0xd0] sm:$0xff] }
  0x18   : > { %v223_v14 = vld [vmem:[%s660_s25 + $0xe0] sm:$0xff]  ;;  %220 = vst [vmem:[%s134_s26 + $0x60] sm:$0xff] %v219_v12  ;;  %222 = vst [vmem:[%s134_s26 + $0x68] sm:$0xff] %v221_v13  ;;  %v225_v15 = vld [vmem:[%s660_s25 + $0xf0] sm:$0xff] }
  0x19   : > { %224 = vst [vmem:[%s134_s26 + $0x70] sm:$0xff] %v223_v14  ;;  %226 = vst [vmem:[%s134_s26 + $0x78] sm:$0xff] %v225_v15 }
  0x1a PF: > { %p498_p5 = scmp.ge.s32.totalorder %s603_s14, 1  ;;  %p231_p6 = scmp.lt.s32.totalorder %s603_s14, 3 }
  0x1c   : > { %p232_p7 = pnand %p498_p5, %p231_p6 }
  0x1d   : > { %s238_s27 = sand.u32 (!%p232_p7), 1, %s595_s12   ;;  %v286_v16 = vld [vmem:[%s703_s1] sm:$0xff] (!%p232_p7)  ;;  %v605_v17 = vmov (!%p232_p7), 0   ;;  %s500_s7 = sshll.u32 (!%p232_p7), %s491_s15, 1 }
  0x1e   : > { %235 = sbr.rel (%p232_p7) target bundleno = 309 (0x135), region = 66  ;;  %s499_s30 = sshll.u32 (!%p232_p7), %s238_s27, 7  ;;  %404 = vmatprep.mubr.bf16.mxu0 (!%p232_p7), %v605_v17  ;;  %548 = vset.pattern.permute.xlu0 (!%p232_p7), %v605_v17  ;;  %v269_v34 = vld [vmem:[%s702_s0] sm:$0xf] (!%p232_p7) }
  0x1f   : > { %289 = vperm.xlu0 (!%p232_p7), %548, %v286_v16   ;;  %s240_s4 = scalar_lea.vmem (!%p232_p7), [#allocation2], %s499_s30  ;;  %p263_p8 = scmp.lt.s32.totalorder (!%p232_p7), %s500_s7, 3 }
  0x20   : > { %v549_v18 = vld [vmem:[%s240_s4 + $0x4] ss:$8 sps:$4 sm:$0xff] (!%p232_p7)   ;;  %v551_v19 = vld [vmem:[%s240_s4] ss:$8 sps:$4 sm:$0xff] (!%p232_p7)   ;;  %v552_v20 = vld [vmem:[%s240_s4 + $0x14] ss:$8 sps:$4 sm:$0xff] (!%p232_p7)  }
  0x21   : > { %372 = vmatprep.subr.bf16.mxu0 (!%p232_p7), %v549_v18  ;;  %v554_v21 = vld [vmem:[%s240_s4 + $0x10] ss:$8 sps:$4 sm:$0xff] (!%p232_p7)   ;;  %v555_v22 = vld [vmem:[%s240_s4 + $0x24] ss:$8 sps:$4 sm:$0xff] (!%p232_p7)   ;;  %v557_v23 = vld [vmem:[%s240_s4 + $0x20] ss:$8 sps:$4 sm:$0xff] (!%p232_p7)  }
  0x22   : > { %373 = vmatpush1.bf16.msra.mxu0 (!%p232_p7), %v551_v19  ;;  %v558_v24 = vld [vmem:[%s240_s4 + $0x34] ss:$8 sps:$4 sm:$0xff] (!%p232_p7)   ;;  %v560_v25 = vld [vmem:[%s240_s4 + $0x30] ss:$8 sps:$4 sm:$0xff] (!%p232_p7)   ;;  %v561_v26 = vld [vmem:[%s240_s4 + $0x44] ss:$8 sps:$4 sm:$0xff] (!%p232_p7)  }
  0x23   : > { %374 = vmatprep.subr.bf16.mxu0 (!%p232_p7), %v552_v20  ;;  %v563_v27 = vld [vmem:[%s240_s4 + $0x40] ss:$8 sps:$4 sm:$0xff] (!%p232_p7)   ;;  %v564_v28 = vld [vmem:[%s240_s4 + $0x54] ss:$8 sps:$4 sm:$0xff] (!%p232_p7)   ;;  %v566_v29 = vld [vmem:[%s240_s4 + $0x50] ss:$8 sps:$4 sm:$0xff] (!%p232_p7)  }
  0x24   : > { %v567_v30 = vld [vmem:[%s240_s4 + $0x64] ss:$8 sps:$4 sm:$0xff] (!%p232_p7)   ;;  %v569_v31 = vld [vmem:[%s240_s4 + $0x60] ss:$8 sps:$4 sm:$0xff] (!%p232_p7)   ;;  %v570_v32 = vld [vmem:[%s240_s4 + $0x74] ss:$8 sps:$4 sm:$0xff] (!%p232_p7)  }
  0x25   : > { %v572_v33 = vld [vmem:[%s240_s4 + $0x70] ss:$8 sps:$4 sm:$0xff]   ;;  %s710_s7 = smov (!%p263_p8, %s500_s7), 3 }
  0x26   : > { %375 = vmatpush1.bf16.msra.mxu0 %v554_v21  ;;  %s501_s8 = sshll.u32 %s710_s7, 3 }
  0x27   : > { %376 = vmatprep.subr.bf16.mxu0 %v555_v22  ;;  %s266_s11 = scalar_lea.vmem %s705_s3, %s501_s8 }
  0x2a   : > { %377 = vmatpush1.bf16.msra.mxu0 %v557_v23 }
  0x2b   : > { %378 = vmatprep.subr.bf16.mxu0 %v558_v24 }
  0x2e   : > { %379 = vmatpush1.bf16.msra.mxu0 %v560_v25 }
  0x2f   : > { %380 = vmatprep.subr.bf16.mxu0 %v561_v26 }
  0x32   : > { %381 = vmatpush1.bf16.msra.mxu0 %v563_v27 }
  0x33   : > { %382 = vmatprep.subr.bf16.mxu0 %v564_v28 }
  0x36   : > { %383 = vmatpush1.bf16.msra.mxu0 %v566_v29 }
  0x37   : > { %384 = vmatprep.subr.bf16.mxu0 %v567_v30 }
  0x3a   : > { %385 = vmatpush1.bf16.msra.mxu0 %v569_v31 }
  0x3b   : > { %386 = vmatprep.subr.bf16.mxu0 %v570_v32 }
  0x3e   : > { %387 = vmatpush1.bf16.msra.mxu0 %v572_v33 }
  0x41   : > { %405 = vmatmul.mubr.bf16.vlgmr.msra.gmra.mrb[0].mxu0 %v269_v34 }
  0x9e   : > { %v290_v35 = vpop.permute.xlu0 %289 }
 0x114   : > { %v406_v36 = vpop.f32.mrb[0].mxu0 }
 0x115   : > { %v407_v37 = vadd.f32 %v406_v36, %v290_v35  ;;  %v408_v38 = vpop.f32.mrb[1].mxu0 }
 0x116   : > { %v409_v39 = vadd.f32 %v408_v38, %v290_v35  ;;  %v410_v40 = vpop.f32.mrb[2].mxu0 }
 0x117   : > { %v518_v41 = vmul.f32 -1.442695, %v407_v37  ;;  %v411_v42 = vpop.f32.mrb[3].mxu0 }
 0x118   : > { %v519_v43 = vmul.f32 -1.442695, %v409_v39 }
 0x119   : > { %573 = vpow2.f32 %v518_v41 }
 0x11a   : > { %575 = vpow2.f32 %v519_v43 }
 0x123   : > { %v574_v44 = vpop.eup %573 }
 0x124   : > { %v576_v45 = vpop.eup %575  ;;  %v419_v46 = vadd.f32 1.0, %v574_v44 }
 0x125   : > { %v420_v47 = vadd.f32 1.0, %v576_v45 }
 0x126   : > { %577 = vrcp.f32 %v419_v46 }
 0x127   : > { %579 = vrcp.f32 %v420_v47 }
 0x130   : > { %v578_v48 = vpop.eup %577 }
 0x131   : > { %v580_v49 = vpop.eup %579  ;;  %v425_v50 = vmul.f32 %v578_v48, %v407_v37 }
 0x132   : > { %v426_v51 = vmul.f32 %v580_v49, %v409_v39 }
 0x133   : > { %427 = vst [vmem:[%s266_s11] sm:$0xff] %v425_v50 }
 0x134   : > { %428 = vst [vmem:[%s266_s11 + $0x8] sm:$0xff] %v426_v51 }
 0x135 PF: > { %p10_p9 = scmp.ge.s32.totalorder %s643_s16, 4   ;;  %s706_s12 = smov %s599_s13 }
 0x136   : > { %s707_s13 = smov %s652_s19  ;;  %s708_s14 = smov %s643_s16 }
 0x137   :  { %12 = sbr.rel (!%p10_p9) target bundleno = 2 (0x2), region = 105 }

// kernel: _lambda_.12
= control target key start
LH: loop header
LB: loop body
LE: loop exit
PB: predicated region body
PF: predicated region fallthrough
CT: control target
= control target key end

     0   :  { %s553_s12 = smov 0   ;;  %s555_s13 = smov 0   ;;  %s611_s0 = inlined_call_operand.vmem [shape: bf16[8,72], index: 0, kind: input, shape index: {}]   ;;  %s612_s1 = inlined_call_operand.vmem [shape: f32[8,1], index: 1, kind: input, shape index: {}]   ;;  %s613_s2 = inlined_call_operand.vmem [shape: bf16[72,512], index: 2, kind: input, shape index: {}]   ;;  %s614_s3 = inlined_call_operand.vmem [shape: f32[8,512], index: 3, kind: output, shape index: {}]  }
   0x1   :  { %s557_s14 = smov 0  }
   0x2 LB: > { %s432_s15 = sadd.s32 4294967295, %s530_s14   ;;  %s570_s16 = sadd.s32 1, %s530_s14   ;;  %s530_s14 = sphi %s557_s14, %s617_s14   ;;  %s526_s13 = sphi %s555_s13, %s616_s13   ;;  %s522_s12 = sphi %s553_s12, %s615_s12  }
   0x3   : > { %s59_s17 = ssub.s32 %s530_s14, %s570_s16  ;;  %s62_s18 = sadd.s32 1, %s526_s13 }
   0x4   : > { %p60_p0 = scmp.eq.s32.totalorder %s59_s17, 0  ;;  %p69_p1 = scmp.ne.s32.totalorder %s526_s13, %s522_s12 }
   0x5   : > { %p70_p2 = scmp.eq.s32.totalorder %s530_s14, 0  ;;  %p435_p4 = scmp.ge.s32.totalorder %s530_s14, 2 }
   0x6   : > { %s579_s19 = scalar_select %p60_p0, %s526_s13, %s62_s18  }
   0x7   : > { %p71_p3 = por %p70_p2, %p69_p1  ;;  %127 = sbr.rel (%p435_p4) target bundleno = 23 (0x17), region = 24 }
   0xe   : > { %130 = sbr.rel (!%p71_p3) target bundleno = 23 (0x17), region = 28  ;;  %s132_s20 = sand.u32 (%p71_p3), 1, %s526_s13  }
   0xf   : > { %s457_s21 = sshll.u32 (%p71_p3), %s530_s14, 3  ;;  %s458_s22 = smul.u32 (%p71_p3), 72, %s132_s20 }
  0x10   : > { %s137_s25 = scalar_lea.vmem (%p71_p3), %s613_s2, %s457_s21 }
  0x11   : > { %v181_v0 = vld [vmem:[%s137_s25] sm:$0xff] (%p71_p3)  ;;  %v183_v1 = vld [vmem:[%s137_s25 + $0x10] sm:$0xff] (%p71_p3)  ;;  %s134_s26 = scalar_lea.vmem (%p71_p3), [#allocation2], %s458_s22 }
  0x12   : > { %v185_v2 = vld [vmem:[%s137_s25 + $0x20] sm:$0xff] (%p71_p3)  ;;  %v187_v3 = vld [vmem:[%s137_s25 + $0x30] sm:$0xff] (%p71_p3)  ;;  %182 = vst [vmem:[%s134_s26] sm:$0xff] (%p71_p3), %v181_v0  ;;  %184 = vst [vmem:[%s134_s26 + $0x8] sm:$0xff] (%p71_p3), %v183_v1 }
  0x13   : > { %v189_v4 = vld [vmem:[%s137_s25 + $0x40] sm:$0xff] (%p71_p3)  ;;  %v191_v5 = vld [vmem:[%s137_s25 + $0x50] sm:$0xff] (%p71_p3)  ;;  %186 = vst [vmem:[%s134_s26 + $0x10] sm:$0xff] (%p71_p3), %v185_v2  ;;  %188 = vst [vmem:[%s134_s26 + $0x18] sm:$0xff] (%p71_p3), %v187_v3 }
  0x14   : > { %190 = vst [vmem:[%s134_s26 + $0x20] sm:$0xff] (%p71_p3), %v189_v4  ;;  %192 = vst [vmem:[%s134_s26 + $0x28] sm:$0xff] (%p71_p3), %v191_v5  ;;  %v193_v6 = vld [vmem:[%s137_s25 + $0x60] sm:$0xff] (%p71_p3)  ;;  %v195_v7 = vld [vmem:[%s137_s25 + $0x70] sm:$0xff] (%p71_p3) }
  0x15   : > { %v197_v8 = vld [vmem:[%s137_s25 + $0x80] sm:$0xff]  ;;  %194 = vst [vmem:[%s134_s26 + $0x30] sm:$0xff] %v193_v6  ;;  %196 = vst [vmem:[%s134_s26 + $0x38] sm:$0xff] %v195_v7 }
  0x16   : > { %198 = vst [vmem:[%s134_s26 + $0x40] sm:$0xff] %v197_v8 }
  0x17 PF: > { %p438_p5 = scmp.ge.s32.totalorder %s530_s14, 1  ;;  %p203_p6 = scmp.lt.s32.totalorder %s530_s14, 3 }
  0x19   : > { %p204_p7 = pnand %p438_p5, %p203_p6 }
  0x1a   : > { %s210_s27 = sand.u32 (!%p204_p7), 1, %s522_s12   ;;  %v532_v9 = vmov (!%p204_p7), 0   ;;  %v251_v10 = vld [vmem:[%s612_s1] sm:$0xff] (!%p204_p7)  ;;  %vm306_vm0 = vcmask (!%p204_p7), 1043456   ;;  %vm302_vm1 = vcmask (!%p204_p7), 588800   ;;  %s439_s7 = sshll.u32 (!%p204_p7), %s432_s15, 1 }
  0x1b   : > { %207 = sbr.rel (%p204_p7) target bundleno = 296 (0x128), region = 66  ;;  %345 = vmatprep.mubr.bf16.mxu0 (!%p204_p7), %v532_v9  ;;  %485 = vset.pattern.permute.xlu0 (!%p204_p7), %v532_v9  ;;  %v241_v23 = vld [vmem:[%s611_s0] sm:$0xf] (!%p204_p7)  ;;  %p235_p8 = scmp.lt.s32.totalorder (!%p204_p7), %s439_s7, 3 }
  0x1c   : > { %s459_s28 = smul.u32 (!%p204_p7), 72, %s210_s27  ;;  %254 = vperm.xlu0 (!%p204_p7), %485, %v251_v10  }
  0x1e   : > { %s212_s4 = scalar_lea.vmem (!%p204_p7), [#allocation2], %s459_s28 }
  0x1f   : > { %v486_v11 = vld [vmem:[%s212_s4 + $0x4] ss:$8 sps:$4 sm:$0xff] (!%p204_p7)   ;;  %v488_v12 = vld [vmem:[%s212_s4] ss:$8 sps:$4 sm:$0xff] (!%p204_p7)   ;;  %v489_v13 = vld [vmem:[%s212_s4 + $0x14] ss:$8 sps:$4 sm:$0xff] (!%p204_p7)  }
  0x20   : > { %313 = vmatprep.subr.bf16.mxu0 (!%p204_p7), %v486_v11  ;;  %v491_v14 = vld [vmem:[%s212_s4 + $0x10] ss:$8 sps:$4 sm:$0xff] (!%p204_p7)   ;;  %v492_v15 = vld [vmem:[%s212_s4 + $0x24] ss:$8 sps:$4 sm:$0xff] (!%p204_p7)   ;;  %v494_v16 = vld [vmem:[%s212_s4 + $0x20] ss:$8 sps:$4 sm:$0xff] (!%p204_p7)  }
  0x21   : > { %314 = vmatpush1.bf16.msra.mxu0 (!%p204_p7), %v488_v12  ;;  %v495_v17 = vld [vmem:[%s212_s4 + $0x34] ss:$8 sps:$4 sm:$0xff] (!%p204_p7)   ;;  %v250_v18 = vld [vmem:[%s212_s4 + $0x40] sm:$0xff] (!%p204_p7)  ;;  %v497_v19 = vld [vmem:[%s212_s4 + $0x30] ss:$8 sps:$4 sm:$0xff] (!%p204_p7)  }
  0x22   : > { %315 = vmatprep.subr.bf16.mxu0 %v489_v13  ;;  %v450_v20 = vcombine.high %v250_v18, %v250_v18  ;;  %v449_v21 = vcombine.low %v250_v18, %v250_v18  ;;  %s619_s7 = smov (!%p235_p8, %s439_s7), 3 }
  0x23   : > { %s440_s8 = sshll.u32 %s619_s7, 3 }
  0x24   : > { %v308_v22 = vsel %vm306_vm0, %v449_v21, 0  ;;  %s238_s11 = scalar_lea.vmem %s614_s3, %s440_s8 }
  0x25   : > { %316 = vmatpush1.bf16.msra.mxu0 %v491_v14 }
  0x26   : > { %317 = vmatprep.subr.bf16.mxu0 %v492_v15 }
  0x29   : > { %318 = vmatpush1.bf16.msra.mxu0 %v494_v16 }
  0x2a   : > { %319 = vmatprep.subr.bf16.mxu0 %v495_v17 }
  0x2d   : > { %320 = vmatpush1.bf16.msra.mxu0 %v497_v19 }
  0x2e   : > { %451 = vmatprep.subr.msk.bf16.mxu0 %vm306_vm0, %v450_v20 }
  0x31   : > { %322 = vmatpush1.bf16.msra.mxu0 %v308_v22 }
  0x34   : > { %452 = vmatmul.mubr.msk.bf16.vlgmr.msra.gmra.mrb[0].mxu0 %vm302_vm1, %v241_v23 }
  0x9b   : > { %v255_v24 = vpop.permute.xlu0 %254 }
 0x107   : > { %v347_v25 = vpop.f32.mrb[0].mxu0 }
 0x108   : > { %v348_v26 = vadd.f32 %v347_v25, %v255_v24  ;;  %v349_v27 = vpop.f32.mrb[1].mxu0 }
 0x109   : > { %v350_v28 = vadd.f32 %v349_v27, %v255_v24  ;;  %v351_v29 = vpop.f32.mrb[2].mxu0 }
 0x10a   : > { %v453_v30 = vmul.f32 -1.442695, %v348_v26  ;;  %v352_v31 = vpop.f32.mrb[3].mxu0 }
 0x10b   : > { %v454_v32 = vmul.f32 -1.442695, %v350_v28 }
 0x10c   : > { %500 = vpow2.f32 %v453_v30 }
 0x10d   : > { %502 = vpow2.f32 %v454_v32 }
 0x116   : > { %v501_v33 = vpop.eup %500 }
 0x117   : > { %v503_v34 = vpop.eup %502  ;;  %v360_v35 = vadd.f32 1.0, %v501_v33 }
 0x118   : > { %v361_v36 = vadd.f32 1.0, %v503_v34 }
 0x119   : > { %504 = vrcp.f32 %v360_v35 }
 0x11a   : > { %506 = vrcp.f32 %v361_v36 }
 0x123   : > { %v505_v37 = vpop.eup %504 }
 0x124   : > { %v507_v38 = vpop.eup %506  ;;  %v366_v39 = vmul.f32 %v505_v37, %v348_v26 }
 0x125   : > { %v367_v40 = vmul.f32 %v507_v38, %v350_v28 }
 0x126   : > { %368 = vst [vmem:[%s238_s11] sm:$0xff] %v366_v39 }
 0x127   : > { %369 = vst [vmem:[%s238_s11 + $0x8] sm:$0xff] %v367_v40 }
 0x128 PF: > { %p10_p9 = scmp.ge.s32.totalorder %s570_s16, 4   ;;  %s615_s12 = smov %s526_s13 }
 0x129   : > { %s616_s13 = smov %s579_s19  ;;  %s617_s14 = smov %s570_s16 }
 0x12a   :  { %12 = sbr.rel (!%p10_p9) target bundleno = 2 (0x2), region = 105 }

// kernel: _lambda_.13
= control target key start
LH: loop header
LB: loop body
LE: loop exit
PB: predicated region body
PF: predicated region fallthrough
CT: control target
= control target key end

     0   :  { %s625_s15 = smov 0   ;;  %s627_s16 = smov 0   ;;  %s686_s0 = inlined_call_operand.vmem [shape: bf16[8,72], index: 0, kind: input, shape index: {}]   ;;  %s687_s1 = inlined_call_operand.vmem [shape: f32[8,1], index: 1, kind: input, shape index: {}]   ;;  %s688_s2 = inlined_call_operand.vmem [shape: bf16[72,512], index: 2, kind: input, shape index: {}]   ;;  %s689_s3 = inlined_call_operand.vmem [shape: f32[8,512], index: 3, kind: input, shape index: {}]   ;;  %s690_s4 = inlined_call_operand.vmem [shape: f32[8,512], index: 4, kind: output, shape index: {}]  }
   0x1   :  { %s629_s17 = smov 0  }
   0x2 LB: > { %s497_s18 = sadd.s32 4294967295, %s597_s17   ;;  %s642_s19 = sadd.s32 1, %s597_s17   ;;  %s597_s17 = sphi %s629_s17, %s693_s17   ;;  %s593_s16 = sphi %s627_s16, %s692_s16   ;;  %s589_s15 = sphi %s625_s15, %s691_s15  }
   0x3   : > { %s60_s20 = ssub.s32 %s597_s17, %s642_s19  ;;  %s63_s21 = sadd.s32 1, %s593_s16 }
   0x4   : > { %p61_p0 = scmp.eq.s32.totalorder %s60_s20, 0  ;;  %p70_p1 = scmp.ne.s32.totalorder %s593_s16, %s589_s15 }
   0x5   : > { %p71_p2 = scmp.eq.s32.totalorder %s597_s17, 0  ;;  %p500_p4 = scmp.ge.s32.totalorder %s597_s17, 2 }
   0x6   : > { %s651_s22 = scalar_select %p61_p0, %s593_s16, %s63_s21  }
   0x7   : > { %p72_p3 = por %p71_p2, %p70_p1  ;;  %154 = sbr.rel (%p500_p4) target bundleno = 23 (0x17), region = 24 }
   0xe   : > { %157 = sbr.rel (!%p72_p3) target bundleno = 23 (0x17), region = 28  ;;  %s159_s23 = sand.u32 (%p72_p3), 1, %s593_s16  }
   0xf   : > { %s524_s24 = sshll.u32 (%p72_p3), %s597_s17, 3  ;;  %s525_s25 = smul.u32 (%p72_p3), 72, %s159_s23 }
  0x10   : > { %s164_s28 = scalar_lea.vmem (%p72_p3), %s688_s2, %s524_s24 }
  0x11   : > { %v208_v0 = vld [vmem:[%s164_s28] sm:$0xff] (%p72_p3)  ;;  %v210_v1 = vld [vmem:[%s164_s28 + $0x10] sm:$0xff] (%p72_p3)  ;;  %s161_s29 = scalar_lea.vmem (%p72_p3), [#allocation2], %s525_s25 }
  0x12   : > { %v212_v2 = vld [vmem:[%s164_s28 + $0x20] sm:$0xff] (%p72_p3)  ;;  %v214_v3 = vld [vmem:[%s164_s28 + $0x30] sm:$0xff] (%p72_p3)  ;;  %209 = vst [vmem:[%s161_s29] sm:$0xff] (%p72_p3), %v208_v0  ;;  %211 = vst [vmem:[%s161_s29 + $0x8] sm:$0xff] (%p72_p3), %v210_v1 }
  0x13   : > { %v216_v4 = vld [vmem:[%s164_s28 + $0x40] sm:$0xff] (%p72_p3)  ;;  %v218_v5 = vld [vmem:[%s164_s28 + $0x50] sm:$0xff] (%p72_p3)  ;;  %213 = vst [vmem:[%s161_s29 + $0x10] sm:$0xff] (%p72_p3), %v212_v2  ;;  %215 = vst [vmem:[%s161_s29 + $0x18] sm:$0xff] (%p72_p3), %v214_v3 }
  0x14   : > { %217 = vst [vmem:[%s161_s29 + $0x20] sm:$0xff] (%p72_p3), %v216_v4  ;;  %219 = vst [vmem:[%s161_s29 + $0x28] sm:$0xff] (%p72_p3), %v218_v5  ;;  %v220_v6 = vld [vmem:[%s164_s28 + $0x60] sm:$0xff] (%p72_p3)  ;;  %v222_v7 = vld [vmem:[%s164_s28 + $0x70] sm:$0xff] (%p72_p3) }
  0x15   : > { %v224_v8 = vld [vmem:[%s164_s28 + $0x80] sm:$0xff]  ;;  %221 = vst [vmem:[%s161_s29 + $0x30] sm:$0xff] %v220_v6  ;;  %223 = vst [vmem:[%s161_s29 + $0x38] sm:$0xff] %v222_v7 }
  0x16   : > { %225 = vst [vmem:[%s161_s29 + $0x40] sm:$0xff] %v224_v8 }
  0x17 PF: > { %p503_p5 = scmp.ge.s32.totalorder %s597_s17, 1  ;;  %p239_p6 = scmp.lt.s32.totalorder %s597_s17, 3 }
  0x19   : > { %p240_p7 = pnand %p503_p5, %p239_p6 }
  0x1a   : > { %s246_s30 = sand.u32 (!%p240_p7), 1, %s589_s15   ;;  %v599_v9 = vmov (!%p240_p7), 0   ;;  %v300_v10 = vld [vmem:[%s687_s1] sm:$0xff] (!%p240_p7)  ;;  %vm355_vm0 = vcmask (!%p240_p7), 1043456   ;;  %vm351_vm1 = vcmask (!%p240_p7), 588800   ;;  %s504_s11 = sshll.u32 (!%p240_p7), %s497_s18, 1 }
  0x1b   : > { %243 = sbr.rel (%p240_p7) target bundleno = 298 (0x12a), region = 70  ;;  %394 = vmatprep.mubr.bf16.mxu0 (!%p240_p7), %v599_v9  ;;  %552 = vset.pattern.permute.xlu0 (!%p240_p7), %v599_v9  ;;  %v290_v23 = vld [vmem:[%s686_s0] sm:$0xf] (!%p240_p7)  ;;  %p278_p8 = scmp.lt.s32.totalorder (!%p240_p7), %s504_s11, 3 }
  0x1c   : > { %s526_s5 = smul.u32 (!%p240_p7), 72, %s246_s30  ;;  %303 = vperm.xlu0 (!%p240_p7), %552, %v300_v10  }
  0x1e   : > { %s248_s8 = scalar_lea.vmem (!%p240_p7), [#allocation2], %s526_s5 }
  0x1f   : > { %v553_v11 = vld [vmem:[%s248_s8 + $0x4] ss:$8 sps:$4 sm:$0xff] (!%p240_p7)   ;;  %v555_v12 = vld [vmem:[%s248_s8] ss:$8 sps:$4 sm:$0xff] (!%p240_p7)   ;;  %v556_v13 = vld [vmem:[%s248_s8 + $0x14] ss:$8 sps:$4 sm:$0xff] (!%p240_p7)  }
  0x20   : > { %362 = vmatprep.subr.bf16.mxu0 (!%p240_p7), %v553_v11  ;;  %v558_v14 = vld [vmem:[%s248_s8 + $0x10] ss:$8 sps:$4 sm:$0xff] (!%p240_p7)   ;;  %v559_v15 = vld [vmem:[%s248_s8 + $0x24] ss:$8 sps:$4 sm:$0xff] (!%p240_p7)   ;;  %v561_v16 = vld [vmem:[%s248_s8 + $0x20] ss:$8 sps:$4 sm:$0xff] (!%p240_p7)  }
  0x21   : > { %363 = vmatpush1.bf16.msra.mxu0 (!%p240_p7), %v555_v12  ;;  %v562_v17 = vld [vmem:[%s248_s8 + $0x34] ss:$8 sps:$4 sm:$0xff] (!%p240_p7)   ;;  %v299_v18 = vld [vmem:[%s248_s8 + $0x40] sm:$0xff] (!%p240_p7)  ;;  %v564_v19 = vld [vmem:[%s248_s8 + $0x30] ss:$8 sps:$4 sm:$0xff] (!%p240_p7)  }
  0x22   : > { %364 = vmatprep.subr.bf16.mxu0 %v556_v13  ;;  %v517_v20 = vcombine.high %v299_v18, %v299_v18  ;;  %v516_v21 = vcombine.low %v299_v18, %v299_v18  ;;  %s695_s11 = smov (!%p278_p8, %s504_s11), 3 }
  0x23   : > { %s505_s12 = sshll.u32 %s695_s11, 3 }
  0x24   : > { %v357_v22 = vsel %vm355_vm0, %v516_v21, 0  ;;  %s281_s15 = scalar_lea.vmem %s689_s3, %s505_s12  ;;  %s287_s20 = scalar_lea.vmem %s690_s4, %s505_s12 }
  0x25   : > { %365 = vmatpush1.bf16.msra.mxu0 %v558_v14  ;;  %v403_v26 = vld [vmem:[%s281_s15] sm:$0xff]  ;;  %v404_v29 = vld [vmem:[%s281_s15 + $0x8] sm:$0xff] }
  0x26   : > { %366 = vmatprep.subr.bf16.mxu0 %v559_v15 }
  0x29   : > { %367 = vmatpush1.bf16.msra.mxu0 %v561_v16 }
  0x2a   : > { %368 = vmatprep.subr.bf16.mxu0 %v562_v17 }
  0x2d   : > { %369 = vmatpush1.bf16.msra.mxu0 %v564_v19 }
  0x2e   : > { %518 = vmatprep.subr.msk.bf16.mxu0 %vm355_vm0, %v517_v20 }
  0x31   : > { %371 = vmatpush1.bf16.msra.mxu0 %v357_v22 }
  0x34   : > { %519 = vmatmul.mubr.msk.bf16.vlgmr.msra.gmra.mrb[0].mxu0 %vm351_vm1, %v290_v23 }
  0x9b   : > { %v304_v24 = vpop.permute.xlu0 %303 }
 0x107   : > { %v396_v25 = vpop.f32.mrb[0].mxu0 }
 0x108   : > { %v397_v27 = vadd.f32 %v396_v25, %v304_v24  ;;  %v398_v28 = vpop.f32.mrb[1].mxu0 }
 0x109   : > { %v399_v30 = vadd.f32 %v398_v28, %v304_v24  ;;  %v400_v31 = vpop.f32.mrb[2].mxu0 }
 0x10a   : > { %v405_v32 = vadd.f32 %v403_v26, %v397_v27  ;;  %v401_v33 = vpop.f32.mrb[3].mxu0 }
 0x10b   : > { %v406_v34 = vadd.f32 %v404_v29, %v399_v30 }
 0x10c   : > { %v520_v35 = vmul.f32 -1.442695, %v405_v32 }
 0x10d   : > { %v521_v36 = vmul.f32 -1.442695, %v406_v34 }
 0x10e   : > { %567 = vpow2.f32 %v520_v35 }
 0x10f   : > { %569 = vpow2.f32 %v521_v36 }
 0x118   : > { %v568_v37 = vpop.eup %567 }
 0x119   : > { %v570_v38 = vpop.eup %569  ;;  %v413_v39 = vadd.f32 1.0, %v568_v37 }
 0x11a   : > { %v414_v40 = vadd.f32 1.0, %v570_v38 }
 0x11b   : > { %571 = vrcp.f32 %v413_v39 }
 0x11c   : > { %573 = vrcp.f32 %v414_v40 }
 0x125   : > { %v572_v41 = vpop.eup %571 }
 0x126   : > { %v574_v42 = vpop.eup %573  ;;  %v419_v43 = vmul.f32 %v572_v41, %v405_v32 }
 0x127   : > { %v420_v44 = vmul.f32 %v574_v42, %v406_v34 }
 0x128   : > { %421 = vst [vmem:[%s287_s20] sm:$0xff] %v419_v43 }
 0x129   : > { %422 = vst [vmem:[%s287_s20 + $0x8] sm:$0xff] %v420_v44 }
 0x12a PF: > { %p11_p9 = scmp.ge.s32.totalorder %s642_s19, 4   ;;  %s691_s15 = smov %s593_s16 }
 0x12b   : > { %s692_s16 = smov %s651_s22  ;;  %s693_s17 = smov %s642_s19 }
 0x12c   :  { %13 = sbr.rel (!%p11_p9) target bundleno = 2 (0x2), region = 112 }

// kernel: split.3
= control target key start
LH: loop header
LB: loop body
LE: loop exit
PB: predicated region body
PF: predicated region fallthrough
CT: control target
= control target key end

     0   :  { %v4_v0 = vlaneseq  ;;  %s74_s0 = inlined_call_operand.vmem [shape: f32[16,2,1,1], index: 0, kind: input, shape index: {}]   ;;  %s75_s1 = inlined_call_operand.hbm [shape: f32[8,2,1,1], index: 1, kind: output, shape index: {}]  }
   0x1   :  { %2 = vsyncpa [#allocation6], 0  ;;  %v3_v1 = vld [vmem:[%s74_s0] sm:$0x3]  ;;  %s47_s0 = smov 120   ;;  %s48_s8 = smov [#allocation5]  }
   0x2   :  { %v5_v2 = vand.u32 127, %v4_v0  ;;  %s15_s9 = sshll.u32 %s48_s8, 4  ;;  %s16_s9 = int_to_ptr.vmem [resolvable:$true] %s15_s9 }
   0x3   :  { %s23_s10 = scalar_lea.vmem %s16_s9, 32  ;;  %p28_p1 = scmp.lt.s32.totalorder %s16_s9, %s16_s9 }
   0x4   :  { %vm6_vm0 = vcmp.lt.s32.totalorder %v5_v2, 8  ;;  %p24_p0 = scmp.ne.s32.totalorder %s16_s9, %s23_s10  ;;  %p29_p2 = scmp.lt.s32.totalorder %s23_s10, %s23_s10 }
   0x5   :  { %v7_v3 = vsel %vm6_vm0, 0, %v3_v1 }
   0x6   :  { %8 = vrot.lane.b32.xlu0 %v7_v3, %s47_s0  ;;  %p30_p3 = por %p29_p2, %p28_p1 }
   0x8   :  { %p31_p4 = pnand %p30_p3, %p24_p0 }
  0x78   :  { %v9_v4 = vpop.permute.xlu0 %8 }
  0x79   :  { %10 = vst [vmem:[#allocation5] sm:$0x3] %v9_v4 }
  0x7a   :  { %34 = shalt.err (!%p31_p4)
}
  0x7b   :  { %s35_s13 = scalar_lea.hbm %s75_s1, 32 }
  0x7c   :  { %p36_p5 = scmp.ne.s32.totalorder %s75_s1, %s35_s13  ;;  %p39_p6 = scmp.lt.u32.totalorder %s35_s13, %s75_s1 }
  0x7e   :  { %p41_p7 = pnand %p39_p6, %p36_p5 }
  0x80   :  { %44 = shalt.err (!%p41_p7)
}
  0x81   :  { %18 = dma.vmem_to_hbm [thread:$0]  %s16_s9, 32, %s75_s1, [#allocation6]  }
  0x82   :  { %45 = dma.done.wait [#allocation6], 32  }
  0x83   :  { %46 = vsyncadd [#allocation6], 4294967264 }
  0x84   :  { %20 = vsyncpa [#allocation6], 1 }

</bundles_post_ra>
